<compile_context>
chip_gen: v7x
topology: tpu7x:2x2x1
jax: 0.10.0
libtpu: 0.0.40
codegen_flags: <defaults>
</compile_context>

<pallas_src>
import functools

import jax
import jax.numpy as jnp
from jax.experimental import pallas as pl
from jax.experimental.pallas import tpu as pltpu


def _dice_partial_kernel(pred_ref, lab_ref, inter_ref, psq_ref, tsq_ref,
                         inter_acc, psq_acc, tsq_acc):
    s = pl.program_id(1)

    @pl.when(s == 0)
    def _():
        inter_acc[...] = jnp.zeros_like(inter_acc)
        psq_acc[...] = jnp.zeros_like(psq_acc)
        tsq_acc[...] = jnp.zeros_like(tsq_acc)

    pred = pred_ref[...].astype(jnp.float32)      # (B, C, tk, 128)
    lab = lab_ref[...]                            # (B, tk, 128) int32
    _, C, _, _ = pred.shape

    # Class-index iota is a tiny (1, C, 1, 128) constant; the comparison
    # broadcasts it against the labels to form the one-hot mask on the fly.
    cls = jax.lax.broadcasted_iota(jnp.int32, (1, C, 1, 128), 1)
    mask = lab[:, None, :, :] == cls              # (B, C, tk, 128) bool

    # Lane-dense partial accumulation: only the sublane (tk) axis is reduced
    # each step; the cross-lane sum happens once in the finalize phase.
    inter_acc[...] += jnp.sum(jnp.where(mask, pred, 0.0), axis=2)   # (B, C, 128)
    psq_acc[...] += jnp.sum(pred * pred, axis=2)
    tsq_acc[...] += jnp.sum(mask.astype(jnp.float32), axis=2)

    @pl.when(s == pl.num_programs(1) - 1)
    def _():
        inter_ref[0] = jnp.sum(inter_acc[...], axis=-1)             # (B, C)
        psq_ref[0] = jnp.sum(psq_acc[...], axis=-1)
        tsq_ref[0] = jnp.sum(tsq_acc[...], axis=-1)


def _pick_tiling(B, C, M, itemsize, max_block_groups=None):
    """Choose (P, S, tk, M_pad): P parallel segments x S reduction steps, each
    step loading tk lane-groups (tk*128 spatial elements) per (b, c)."""
    if max_block_groups is None:
        # ~4 MiB per pred block; Pallas double-buffers inputs, so with the
        # in-kernel temporaries the live VMEM stays inside the 48 MiB limit
        # below on every chip (v7x physical VMEM is 64 MiB per TC).
        budget = 4 * 1024 * 1024
        per_group = B * C * 128 * itemsize
        cap = budget // max(per_group, 1)
    else:
        cap = max_block_groups
    cap = int(max(8, min(512, cap)))
    cap -= cap % 8
    if M <= cap:
        return 1, 1, M, M          # single block covers everything
    best = None
    for tk in range(cap, 7, -8):   # prefer tiles that divide M (no pad copy)
        if M % tk:
            continue
        S = M // tk
        if S % 2 == 0:
            return 2, S // 2, tk, M   # two parallel segments (v7x megacore)
        if best is None:
            best = (1, S, tk, M)
    if best is not None:
        return best
    # No exact fit: pad up to a multiple of 2*cap groups (pad is zeros for pred
    # and -1 for labels -> contributes nothing to any partial sum).
    tk = cap
    chunks = -(-M // tk)
    chunks += chunks % 2
    return 2, chunks // 2, tk, chunks * tk


@functools.partial(jax.jit, static_argnames=("num_class", "max_block_groups"))
def dice_loss(y_pred, y_true, num_class=36, max_block_groups=None):
    """y_pred: (B, C, D, H, W) float; y_true: (B, 1, D, H, W) int labels."""
    B, C = y_pred.shape[0], y_pred.shape[1]
    assert C == num_class
    N = 1
    for d in y_pred.shape[2:]:
        N *= d

    pred = y_pred.reshape(B, C, N)                 # free reshape, keeps dtype
    lab = y_true.reshape(B, N).astype(jnp.int32)

    M = -(-N // 128)                               # number of 128-lane groups
    P, S, tk, M_pad = _pick_tiling(B, C, M, jnp.dtype(pred.dtype).itemsize,
                                   max_block_groups)
    n_pad = M_pad * 128 - N
    if n_pad:
        pred = jnp.pad(pred, ((0, 0), (0, 0), (0, n_pad)))
        lab = jnp.pad(lab, ((0, 0), (0, n_pad)), constant_values=-1)
    pred = pred.reshape(B, C, M_pad, 128)
    lab = lab.reshape(B, M_pad, 128)

    part = jax.ShapeDtypeStruct((P, B, C), jnp.float32)
    out_block = pl.BlockSpec((1, B, C), lambda p, s: (p, 0, 0))
    inter_p, psq_p, tsq_p = pl.pallas_call(
        _dice_partial_kernel,
        out_shape=(part, part, part),
        grid_spec=pltpu.PrefetchScalarGridSpec(
            num_scalar_prefetch=0,
            grid=(P, S),
            in_specs=[
                pl.BlockSpec((B, C, tk, 128), lambda p, s: (0, 0, p * S + s, 0)),
                pl.BlockSpec((B, tk, 128), lambda p, s: (0, p * S + s, 0)),
            ],
            out_specs=(out_block, out_block, out_block),
            scratch_shapes=[
                pltpu.VMEM((B, C, 128), jnp.float32),
                pltpu.VMEM((B, C, 128), jnp.float32),
                pltpu.VMEM((B, C, 128), jnp.float32),
            ],
        ),
        compiler_params=pltpu.CompilerParams(
            dimension_semantics=("parallel", "arbitrary"),
            vmem_limit_bytes=48 * 1024 * 1024,
        ),
    )(pred, lab)

    intersection = jnp.sum(inter_p, axis=0)        # combine parallel segments
    union = jnp.sum(psq_p, axis=0) + jnp.sum(tsq_p, axis=0)
    dsc = 2.0 * intersection / (union + 1e-5)
    return 1.0 - jnp.mean(dsc)


def dice_loss_ref(y_pred, y_true, num_class=36):
    """Pure-JAX reference mirroring the PyTorch module."""
    y_true = jax.nn.one_hot(y_true, num_class, dtype=jnp.float32)  # (B,1,D,H,W,C)
    y_true = jnp.squeeze(y_true, 1)                                 # (B,D,H,W,C)
    y_true = jnp.transpose(y_true, (0, 4, 1, 2, 3))                 # (B,C,D,H,W)
    inter = jnp.sum(y_pred * y_true, axis=(2, 3, 4))
    union = jnp.sum(y_pred ** 2, axis=(2, 3, 4)) + jnp.sum(y_true ** 2, axis=(2, 3, 4))
    dsc = 2.0 * inter / (union + 1e-5)
    return 1.0 - jnp.mean(dsc)


if __name__ == "__main__":
    key = jax.random.PRNGKey(0)

    # Main check: module's default num_class=36, small 3D volume.
    k1, k2 = jax.random.split(key)
    B, C, D, H, W = 2, 36, 4, 8, 8
    y_pred = jax.random.uniform(k1, (B, C, D, H, W), dtype=jnp.float32)
    y_true = jax.random.randint(k2, (B, 1, D, H, W), 0, C, dtype=jnp.int32)
    loss = jax.block_until_ready(dice_loss(y_pred, y_true, num_class=C))
    ref = jax.block_until_ready(dice_loss_ref(y_pred, y_true, num_class=C))
    assert jnp.allclose(loss, ref, atol=1e-5, rtol=1e-4), (loss, ref)

    # Extra check: multi-step reduction + 2 parallel segments (tiny tile cap).
    k3, k4 = jax.random.split(k1)
    B, C, D, H, W = 1, 4, 8, 16, 32            # N = 4096 -> 32 lane groups
    y_pred = jax.random.uniform(k3, (B, C, D, H, W), dtype=jnp.float32)
    y_true = jax.random.randint(k4, (B, 1, D, H, W), 0, C, dtype=jnp.int32)
    loss = jax.block_until_ready(
        dice_loss(y_pred, y_true, num_class=C, max_block_groups=8))
    ref = jax.block_until_ready(dice_loss_ref(y_pred, y_true, num_class=C))
    assert jnp.allclose(loss, ref, atol=1e-5, rtol=1e-4), (loss, ref)

    # Extra check: spatial size not a multiple of 128 (padding path).
    k5, k6 = jax.random.split(k2)
    B, C, D, H, W = 1, 5, 3, 7, 11             # N = 231
    y_pred = jax.random.uniform(k5, (B, C, D, H, W), dtype=jnp.float32)
    y_true = jax.random.randint(k6, (B, 1, D, H, W), 0, C, dtype=jnp.int32)
    loss = jax.block_until_ready(dice_loss(y_pred, y_true, num_class=C))
    ref = jax.block_until_ready(dice_loss_ref(y_pred, y_true, num_class=C))
    assert jnp.allclose(loss, ref, atol=1e-5, rtol=1e-4), (loss, ref)

    print("KERNEL_OK")
</pallas_src>

<mosaic_0001>
module attributes {stable_mosaic.version = 11 : i64} {
  func.func @_dice_partial_kernel(%arg0: i32, %arg1: i32, %arg2: memref<2x36x2x128xf32, #tpu.memory_space<vmem>>, %arg3: memref<2x2x128xi32, #tpu.memory_space<vmem>>, %arg4: memref<1x2x36xf32, #tpu.memory_space<vmem>>, %arg5: memref<1x2x36xf32, #tpu.memory_space<vmem>>, %arg6: memref<1x2x36xf32, #tpu.memory_space<vmem>>, %arg7: memref<2x36x128xf32, #tpu.memory_space<vmem>>, %arg8: memref<2x36x128xf32, #tpu.memory_space<vmem>>, %arg9: memref<2x36x128xf32, #tpu.memory_space<vmem>>) attributes {dimension_semantics = [#tpu.dimension_semantics<parallel>, #tpu.dimension_semantics<arbitrary>], iteration_bounds = array<i64: 1, 1>, scalar_prefetch = 0 : i64, scratch_operands = 3 : i64, tpu.core_type = #tpu.core_type<tc>, window_params = [{transform_indices = @transform_0, window_bounds = array<i64: 2, 36, 2, 128>}, {transform_indices = @transform_1, window_bounds = array<i64: 2, 2, 128>}, {transform_indices = @transform_2, window_bounds = array<i64: 1, 2, 36>}, {transform_indices = @transform_3, window_bounds = array<i64: 1, 2, 36>}, {transform_indices = @transform_4, window_bounds = array<i64: 1, 2, 36>}]} {
    %c0_i32 = arith.constant 0 : i32
    %0 = arith.cmpi eq, %arg1, %c0_i32 : i32
    %1 = arith.extui %0 : i1 to i32
    %c0_i32_0 = arith.constant 0 : i32
    %2 = arith.cmpi ne, %1, %c0_i32_0 : i32
    scf.if %2 {
      %cst_30 = arith.constant 0.000000e+00 : f32
      %30 = vector.broadcast %cst_30 : f32 to vector<2x36x128xf32>
      %c0_31 = arith.constant 0 : index
      %c0_32 = arith.constant 0 : index
      %c0_33 = arith.constant 0 : index
      %31 = vector.load %arg7[%c0_31, %c0_32, %c0_33] : memref<2x36x128xf32, #tpu.memory_space<vmem>>, vector<2x36x128xf32>
      tpu.vector_store %arg7[%c0_31, %c0_32, %c0_33], %30 {strides = array<i32>} : memref<2x36x128xf32, #tpu.memory_space<vmem>>, vector<2x36x128xf32>,
      %cst_34 = arith.constant 0.000000e+00 : f32
      %32 = vector.broadcast %cst_34 : f32 to vector<2x36x128xf32>
      %c0_35 = arith.constant 0 : index
      %c0_36 = arith.constant 0 : index
      %c0_37 = arith.constant 0 : index
      %33 = vector.load %arg8[%c0_35, %c0_36, %c0_37] : memref<2x36x128xf32, #tpu.memory_space<vmem>>, vector<2x36x128xf32>
      tpu.vector_store %arg8[%c0_35, %c0_36, %c0_37], %32 {strides = array<i32>} : memref<2x36x128xf32, #tpu.memory_space<vmem>>, vector<2x36x128xf32>,
      %cst_38 = arith.constant 0.000000e+00 : f32
      %34 = vector.broadcast %cst_38 : f32 to vector<2x36x128xf32>
      %c0_39 = arith.constant 0 : index
      %c0_40 = arith.constant 0 : index
      %c0_41 = arith.constant 0 : index
      %35 = vector.load %arg9[%c0_39, %c0_40, %c0_41] : memref<2x36x128xf32, #tpu.memory_space<vmem>>, vector<2x36x128xf32>
      tpu.vector_store %arg9[%c0_39, %c0_40, %c0_41], %34 {strides = array<i32>} : memref<2x36x128xf32, #tpu.memory_space<vmem>>, vector<2x36x128xf32>,
    } else {
    }
    %c0 = arith.constant 0 : index
    %c0_1 = arith.constant 0 : index
    %c0_2 = arith.constant 0 : index
    %c0_3 = arith.constant 0 : index
    %3 = vector.load %arg2[%c0, %c0_1, %c0_2, %c0_3] : memref<2x36x2x128xf32, #tpu.memory_space<vmem>>, vector<2x36x2x128xf32>
    %c0_4 = arith.constant 0 : index
    %c0_5 = arith.constant 0 : index
    %c0_6 = arith.constant 0 : index
    %4 = vector.load %arg3[%c0_4, %c0_5, %c0_6] : memref<2x2x128xi32, #tpu.memory_space<vmem>>, vector<2x2x128xi32>
    %5 = tpu.iota {dimensions = array<i32: 1>} : vector<1x36x1x128xi32>
    %6 = vector.shape_cast %4 : vector<2x2x128xi32> to vector<2x1x2x128xi32>
    %7 = vector.broadcast %6 : vector<2x1x2x128xi32> to vector<2x36x2x128xi32>
    %8 = vector.broadcast %5 : vector<1x36x1x128xi32> to vector<2x36x2x128xi32>
    %9 = arith.cmpi eq, %7, %8 : vector<2x36x2x128xi32>
    %c0_7 = arith.constant 0 : index
    %c0_8 = arith.constant 0 : index
    %c0_9 = arith.constant 0 : index
    %10 = vector.load %arg7[%c0_7, %c0_8, %c0_9] : memref<2x36x128xf32, #tpu.memory_space<vmem>>, vector<2x36x128xf32>
    %cst = arith.constant 0.000000e+00 : f32
    %11 = vector.broadcast %cst : f32 to vector<2x36x2x128xf32>
    %12 = arith.select %9, %3, %11 : vector<2x36x2x128xi1>, vector<2x36x2x128xf32>
    %cst_10 = arith.constant dense<0.000000e+00> : vector<2x36x128xf32>
    %13 = vector.multi_reduction <add>, %12, %cst_10 [2] : vector<2x36x2x128xf32> to vector<2x36x128xf32>
    %14 = arith.addf %10, %13 : vector<2x36x128xf32>
    %c0_11 = arith.constant 0 : index
    %c0_12 = arith.constant 0 : index
    %c0_13 = arith.constant 0 : index
    %15 = vector.load %arg7[%c0_11, %c0_12, %c0_13] : memref<2x36x128xf32, #tpu.memory_space<vmem>>, vector<2x36x128xf32>
    tpu.vector_store %arg7[%c0_11, %c0_12, %c0_13], %14 {strides = array<i32>} : memref<2x36x128xf32, #tpu.memory_space<vmem>>, vector<2x36x128xf32>,
    %c0_14 = arith.constant 0 : index
    %c0_15 = arith.constant 0 : index
    %c0_16 = arith.constant 0 : index
    %16 = vector.load %arg8[%c0_14, %c0_15, %c0_16] : memref<2x36x128xf32, #tpu.memory_space<vmem>>, vector<2x36x128xf32>
    %17 = arith.mulf %3, %3 : vector<2x36x2x128xf32>
    %cst_17 = arith.constant dense<0.000000e+00> : vector<2x36x128xf32>
    %18 = vector.multi_reduction <add>, %17, %cst_17 [2] : vector<2x36x2x128xf32> to vector<2x36x128xf32>
    %19 = arith.addf %16, %18 : vector<2x36x128xf32>
    %c0_18 = arith.constant 0 : index
    %c0_19 = arith.constant 0 : index
    %c0_20 = arith.constant 0 : index
    %20 = vector.load %arg8[%c0_18, %c0_19, %c0_20] : memref<2x36x128xf32, #tpu.memory_space<vmem>>, vector<2x36x128xf32>
    tpu.vector_store %arg8[%c0_18, %c0_19, %c0_20], %19 {strides = array<i32>} : memref<2x36x128xf32, #tpu.memory_space<vmem>>, vector<2x36x128xf32>,
    %c0_21 = arith.constant 0 : index
    %c0_22 = arith.constant 0 : index
    %c0_23 = arith.constant 0 : index
    %21 = vector.load %arg9[%c0_21, %c0_22, %c0_23] : memref<2x36x128xf32, #tpu.memory_space<vmem>>, vector<2x36x128xf32>
    %22 = arith.extui %9 : vector<2x36x2x128xi1> to vector<2x36x2x128xi32>
    %23 = arith.sitofp %22 : vector<2x36x2x128xi32> to vector<2x36x2x128xf32>
    %cst_24 = arith.constant dense<0.000000e+00> : vector<2x36x128xf32>
    %24 = vector.multi_reduction <add>, %23, %cst_24 [2] : vector<2x36x2x128xf32> to vector<2x36x128xf32>
    %25 = arith.addf %21, %24 : vector<2x36x128xf32>
    %c0_25 = arith.constant 0 : index
    %c0_26 = arith.constant 0 : index
    %c0_27 = arith.constant 0 : index
    %26 = vector.load %arg9[%c0_25, %c0_26, %c0_27] : memref<2x36x128xf32, #tpu.memory_space<vmem>>, vector<2x36x128xf32>
    tpu.vector_store %arg9[%c0_25, %c0_26, %c0_27], %25 {strides = array<i32>} : memref<2x36x128xf32, #tpu.memory_space<vmem>>, vector<2x36x128xf32>,
    %c0_i32_28 = arith.constant 0 : i32
    %27 = arith.cmpi eq, %arg1, %c0_i32_28 : i32
    %28 = arith.extui %27 : i1 to i32
    %c0_i32_29 = arith.constant 0 : i32
    %29 = arith.cmpi ne, %28, %c0_i32_29 : i32
    scf.if %29 {
      %c0_30 = arith.constant 0 : index
      %c0_31 = arith.constant 0 : index
      %c0_32 = arith.constant 0 : index
      %30 = vector.load %arg7[%c0_30, %c0_31, %c0_32] : memref<2x36x128xf32, #tpu.memory_space<vmem>>, vector<2x36x128xf32>
      %cst_33 = arith.constant dense<0.000000e+00> : vector<2x36xf32>
      %31 = vector.multi_reduction <add>, %30, %cst_33 [2] : vector<2x36x128xf32> to vector<2x36xf32>
      %c0_34 = arith.constant 0 : index
      %c0_35 = arith.constant 0 : index
      %c0_36 = arith.constant 0 : index
      %32 = vector.load %arg4[%c0_34, %c0_35, %c0_36] : memref<1x2x36xf32, #tpu.memory_space<vmem>>, vector<1x2x36xf32>
      %33 = vector.shape_cast %32 : vector<1x2x36xf32> to vector<2x36xf32>
      %34 = vector.shape_cast %31 : vector<2x36xf32> to vector<1x2x36xf32>
      tpu.vector_store %arg4[%c0_34, %c0_35, %c0_36], %34 {strides = array<i32>} : memref<1x2x36xf32, #tpu.memory_space<vmem>>, vector<1x2x36xf32>,
      %c0_37 = arith.constant 0 : index
      %c0_38 = arith.constant 0 : index
      %c0_39 = arith.constant 0 : index
      %35 = vector.load %arg8[%c0_37, %c0_38, %c0_39] : memref<2x36x128xf32, #tpu.memory_space<vmem>>, vector<2x36x128xf32>
      %cst_40 = arith.constant dense<0.000000e+00> : vector<2x36xf32>
      %36 = vector.multi_reduction <add>, %35, %cst_40 [2] : vector<2x36x128xf32> to vector<2x36xf32>
      %c0_41 = arith.constant 0 : index
      %c0_42 = arith.constant 0 : index
      %c0_43 = arith.constant 0 : index
      %37 = vector.load %arg5[%c0_41, %c0_42, %c0_43] : memref<1x2x36xf32, #tpu.memory_space<vmem>>, vector<1x2x36xf32>
      %38 = vector.shape_cast %37 : vector<1x2x36xf32> to vector<2x36xf32>
      %39 = vector.shape_cast %36 : vector<2x36xf32> to vector<1x2x36xf32>
      tpu.vector_store %arg5[%c0_41, %c0_42, %c0_43], %39 {strides = array<i32>} : memref<1x2x36xf32, #tpu.memory_space<vmem>>, vector<1x2x36xf32>,
      %c0_44 = arith.constant 0 : index
      %c0_45 = arith.constant 0 : index
      %c0_46 = arith.constant 0 : index
      %40 = vector.load %arg9[%c0_44, %c0_45, %c0_46] : memref<2x36x128xf32, #tpu.memory_space<vmem>>, vector<2x36x128xf32>
      %cst_47 = arith.constant dense<0.000000e+00> : vector<2x36xf32>
      %41 = vector.multi_reduction <add>, %40, %cst_47 [2] : vector<2x36x128xf32> to vector<2x36xf32>
      %c0_48 = arith.constant 0 : index
      %c0_49 = arith.constant 0 : index
      %c0_50 = arith.constant 0 : index
      %42 = vector.load %arg6[%c0_48, %c0_49, %c0_50] : memref<1x2x36xf32, #tpu.memory_space<vmem>>, vector<1x2x36xf32>
      %43 = vector.shape_cast %42 : vector<1x2x36xf32> to vector<2x36xf32>
      %44 = vector.shape_cast %41 : vector<2x36xf32> to vector<1x2x36xf32>
      tpu.vector_store %arg6[%c0_48, %c0_49, %c0_50], %44 {strides = array<i32>} : memref<1x2x36xf32, #tpu.memory_space<vmem>>, vector<1x2x36xf32>,
    } else {
    }
    return
  }
  func.func @transform_0(%arg0: i32, %arg1: i32) -> (i32, i32, i32, i32) {
    %c1_i32 = arith.constant 1 : i32
    %0 = arith.muli %arg0, %c1_i32 : i32
    %1 = arith.addi %0, %arg1 : i32
    %c0_i32 = arith.constant 0 : i32
    %c0_i32_0 = arith.constant 0 : i32
    %c0_i32_1 = arith.constant 0 : i32
    %c0_i32_2 = arith.constant 0 : i32
    return %c0_i32, %c0_i32_0, %1, %c0_i32_1 : i32, i32, i32, i32
  }
  func.func @transform_1(%arg0: i32, %arg1: i32) -> (i32, i32, i32) {
    %c1_i32 = arith.constant 1 : i32
    %0 = arith.muli %arg0, %c1_i32 : i32
    %1 = arith.addi %0, %arg1 : i32
    %c0_i32 = arith.constant 0 : i32
    %c0_i32_0 = arith.constant 0 : i32
    %c0_i32_1 = arith.constant 0 : i32
    return %c0_i32, %1, %c0_i32_0 : i32, i32, i32
  }
  func.func @transform_2(%arg0: i32, %arg1: i32) -> (i32, i32, i32) {
    %c0_i32 = arith.constant 0 : i32
    %c0_i32_0 = arith.constant 0 : i32
    %c0_i32_1 = arith.constant 0 : i32
    return %arg0, %c0_i32, %c0_i32_0 : i32, i32, i32
  }
  func.func @transform_3(%arg0: i32, %arg1: i32) -> (i32, i32, i32) {
    %c0_i32 = arith.constant 0 : i32
    %c0_i32_0 = arith.constant 0 : i32
    %c0_i32_1 = arith.constant 0 : i32
    return %arg0, %c0_i32, %c0_i32_0 : i32, i32, i32
  }
  func.func @transform_4(%arg0: i32, %arg1: i32) -> (i32, i32, i32) {
    %c0_i32 = arith.constant 0 : i32
    %c0_i32_0 = arith.constant 0 : i32
    %c0_i32_1 = arith.constant 0 : i32
    return %arg0, %c0_i32, %c0_i32_0 : i32, i32, i32
  }
}

</mosaic_0001>

<bundles_post_ra>
// kernel: dice_loss.1
= control target key start
LH: loop header
LB: loop body
LE: loop exit
PB: predicated region body
PF: predicated region fallthrough
CT: control target
= control target key end

     0   :  { %vm310_vm0 = vcmask 1041408   ;;  %v4570_v3 = vmov 0.0   ;;  %vm887_vm9 = vcmask 1041409   ;;  %vm889_vm10 = vcmask 1042434   ;;  %s4541_s0 = inlined_call_operand.vmem [shape: f32[2,36,2,128], index: 0, kind: input, shape index: {}]   ;;  %s4542_s1 = inlined_call_operand.vmem [shape: s32[2,2,128], index: 1, kind: input, shape index: {}]   ;;  %s4543_s2 = inlined_call_operand.vmem [shape: f32[1,2,36], index: 2, kind: output, shape index: {0}]   ;;  %s4544_s3 = inlined_call_operand.vmem [shape: f32[1,2,36], index: 3, kind: output, shape index: {1}]   ;;  %s4545_s4 = inlined_call_operand.vmem [shape: f32[1,2,36], index: 4, kind: output, shape index: {2}]  }
   0x1   :  { %v118_v0 = vld [vmem:[%s4541_s0 + $0x48] sm:$0x3]  ;;  %v119_v1 = vld [vmem:[%s4541_s0 + $0x4a] sm:$0x3]  ;;  %v120_v2 = vld [vmem:[%s4541_s0 + $0x4c] sm:$0x3] }
   0x2   :  { %56 = vst [vmem:[#allocation2 + $0x20] sm:$0xf] %v4570_v3  ;;  %61 = vst [vmem:[#allocation2 + $0x48] sm:$0xf] %v4570_v3  ;;  %v121_v4 = vld [vmem:[%s4541_s0 + $0x4e] sm:$0x3]  ;;  %v3005_v7 = vmul.f32 %v118_v0, %v118_v0  ;;  %v3007_v8 = vmul.f32 %v119_v1, %v119_v1  ;;  %v3017_v11 = vmul.f32 %v120_v2, %v120_v2 }
   0x3   :  { %66 = vst [vmem:[#allocation3 + $0x20] sm:$0xf] %v4570_v3  ;;  %71 = vst [vmem:[#allocation3 + $0x48] sm:$0xf] %v4570_v3  ;;  %v122_v5 = vld [vmem:[%s4541_s0 + $0x50] sm:$0x3]  ;;  %v3019_v12 = vmul.f32 %v121_v4, %v121_v4 }
   0x4   :  { %76 = vst [vmem:[#allocation4 + $0x20] sm:$0xf] %v4570_v3  ;;  %81 = vst [vmem:[#allocation4 + $0x48] sm:$0xf] %v4570_v3  ;;  %v123_v6 = vld [vmem:[%s4541_s0 + $0x52] sm:$0x3]  ;;  %v3021_v13 = vmul.f32 %v122_v5, %v122_v5 }
   0x5   :  { %v124_v9 = vld [vmem:[%s4541_s0 + $0x54] sm:$0x3]  ;;  %v3015_v10 = vld [vmem:[%s4542_s1 + $0x2] sm:$0x3]  ;;  %v3023_v14 = vmul.f32 %v123_v6, %v123_v6  ;;  %v125_v15 = vld [vmem:[%s4541_s0 + $0x56] sm:$0x3] }
   0x6   :  { %4600 = vst [vmem:[#allocation5_spill] sm:$0xff] %v3015_v10  ;;  %vm4553_vm1 = vcmp.eq.s32.totalorder %v3015_v10, 0  ;;  %vm4552_vm2 = vcmp.eq.s32.totalorder %v3015_v10, 1  ;;  %vm4551_vm3 = vcmp.eq.s32.totalorder %v3015_v10, 2  ;;  %vm4550_vm4 = vcmp.eq.s32.totalorder %v3015_v10, 3 }
   0x7   :  { %vm4549_vm5 = vcmp.eq.s32.totalorder %v3015_v10, 4  ;;  %vm4548_vm6 = vcmp.eq.s32.totalorder %v3015_v10, 5  ;;  %vm4547_vm7 = vcmp.eq.s32.totalorder %v3015_v10, 6  ;;  %vm4546_vm8 = vcmp.eq.s32.totalorder %v3015_v10, 7 }
   0x8   :  { %v274_v16 = vsel %vm4553_vm1, %v118_v0, 0.0  ;;  %v275_v17 = vsel %vm4552_vm2, %v119_v1, 0.0  ;;  %v276_v18 = vsel %vm4551_vm3, %v120_v2, 0.0  ;;  %v277_v19 = vsel %vm4550_vm4, %v121_v4, 0.0 }
   0x9   :  { %v278_v20 = vsel %vm4549_vm5, %v122_v5, 0.0  ;;  %v279_v21 = vsel %vm4548_vm6, %v123_v6, 0.0  ;;  %v280_v22 = vsel %vm4547_vm7, %v124_v9, 0.0  ;;  %v281_v23 = vsel %vm4546_vm8, %v125_v15, 0.0 }
   0xa   :  { %v563_v24 = vsel %vm310_vm0, %v274_v16, 0.0  ;;  %v570_v25 = vsel %vm310_vm0, %v275_v17, 0.0  ;;  %v577_v26 = vsel %vm310_vm0, %v276_v18, 0.0  ;;  %v584_v27 = vsel %vm310_vm0, %v277_v19, 0.0 }
   0xb   :  { %v564_v28 = vrot.slane %v563_v24, 4  ;;  %v571_v29 = vrot.slane %v570_v25, 4  ;;  %v578_v30 = vrot.slane %v577_v26, 4  ;;  %v585_v31 = vrot.slane %v584_v27, 4 }
   0xc   :  { %v591_v32 = vsel %vm310_vm0, %v278_v20, 0.0  ;;  %v598_v33 = vsel %vm310_vm0, %v279_v21, 0.0  ;;  %v605_v34 = vsel %vm310_vm0, %v280_v22, 0.0  ;;  %v612_v35 = vsel %vm310_vm0, %v281_v23, 0.0  ;;  %v3063_v20 = vld [vmem:[%s4542_s1] sm:$0x3] }
   0xd   :  { %v565_v36 = vadd.f32 %v564_v28, %v563_v24  ;;  %v572_v37 = vadd.f32 %v571_v29, %v570_v25  ;;  %v579_v38 = vadd.f32 %v578_v30, %v577_v26  ;;  %v586_v39 = vadd.f32 %v585_v31, %v584_v27  ;;  %4601 = vst [vmem:[#allocation6_spill] sm:$0xff] %v3063_v20  ;;  %v3068_v21 = vld [vmem:[%s4541_s0] sm:$0x3]  ;;  %v3073_v22 = vld [vmem:[%s4541_s0 + $0x2] sm:$0x3] }
   0xe   :  { %v592_v40 = vrot.slane %v591_v32, 4  ;;  %v599_v41 = vrot.slane %v598_v33, 4  ;;  %v606_v42 = vrot.slane %v605_v34, 4  ;;  %v613_v43 = vrot.slane %v612_v35, 4  ;;  %v3078_v27 = vld [vmem:[%s4541_s0 + $0x4] sm:$0x3] }
   0xf   :  { %v566_v44 = vrot.slane %v565_v36, 2  ;;  %v573_v45 = vrot.slane %v572_v37, 2  ;;  %v580_v46 = vrot.slane %v579_v38, 2  ;;  %v587_v47 = vrot.slane %v586_v39, 2  ;;  %v3083_v28 = vld [vmem:[%s4541_s0 + $0x6] sm:$0x3] }
  0x10   :  { %v593_v48 = vadd.f32 %v592_v40, %v591_v32  ;;  %v600_v49 = vadd.f32 %v599_v41, %v598_v33  ;;  %v607_v50 = vadd.f32 %v606_v42, %v605_v34  ;;  %v614_v51 = vadd.f32 %v613_v43, %v612_v35  ;;  %v3088_v29 = vld [vmem:[%s4541_s0 + $0x8] sm:$0x3]  ;;  %v3094_v31 = vld [vmem:[%s4541_s0 + $0xa] sm:$0x3]  ;;  %v3102_v33 = vld [vmem:[%s4541_s0 + $0xc] sm:$0x3] }
  0x11   :  { %v567_v52 = vadd.f32 %v566_v44, %v565_v36  ;;  %v574_v53 = vadd.f32 %v573_v45, %v572_v37  ;;  %v581_v54 = vadd.f32 %v580_v46, %v579_v38  ;;  %v588_v55 = vadd.f32 %v587_v47, %v586_v39  ;;  %v3111_v35 = vld [vmem:[%s4541_s0 + $0xe] sm:$0x3] }
  0x12   :  { %v594_v56 = vrot.slane %v593_v48, 2  ;;  %v601_v57 = vrot.slane %v600_v49, 2  ;;  %v608_v58 = vrot.slane %v607_v50, 2  ;;  %v615_v59 = vrot.slane %v614_v51, 2 }
  0x13   :  { %v568_v60 = vrot.slane %v567_v52, 1  ;;  %v575_v61 = vrot.slane %v574_v53, 1  ;;  %v582_v62 = vrot.slane %v581_v54, 1  ;;  %v589_v63 = vrot.slane %v588_v55, 1 }
  0x14   :  { %v595_v0 = vadd.f32 %v594_v56, %v593_v48  ;;  %v602_v1 = vadd.f32 %v601_v57, %v600_v49  ;;  %v609_v2 = vadd.f32 %v608_v58, %v607_v50  ;;  %v616_v4 = vadd.f32 %v615_v59, %v614_v51 }
  0x15   :  { %v569_v5 = vadd.f32 %v568_v60, %v567_v52  ;;  %v576_v6 = vadd.f32 %v575_v61, %v574_v53  ;;  %v583_v9 = vadd.f32 %v582_v62, %v581_v54  ;;  %v590_v15 = vadd.f32 %v589_v63, %v588_v55 }
  0x16   :  { %v596_v16 = vrot.slane %v595_v0, 1  ;;  %v603_v17 = vrot.slane %v602_v1, 1  ;;  %v610_v18 = vrot.slane %v609_v2, 1  ;;  %v617_v19 = vrot.slane %v616_v4, 1 }
  0x17   :  { %vm891_vm11 = vcmask 1043459   ;;  %vm893_vm12 = vcmask 1044484   ;;  %vm895_vm13 = vcmask 1045509   ;;  %vm897_vm14 = vcmask 1046534  }
  0x18   :  { %v597_v23 = vadd.f32 %v596_v16, %v595_v0  ;;  %v604_v24 = vadd.f32 %v603_v17, %v602_v1  ;;  %v611_v25 = vadd.f32 %v610_v18, %v609_v2  ;;  %v618_v26 = vadd.f32 %v617_v19, %v616_v4 }
  0x19   :  { %vm899_vm15 = vcmask 1047559   ;;  %v925_v30 = vsel %vm887_vm9, %v576_v6, %v569_v5  ;;  %vm4561_vm8 = vcmp.eq.s32.totalorder %v3063_v20, 0  ;;  %vm4560_vm7 = vcmp.eq.s32.totalorder %v3063_v20, 1 }
  0x1a   :  { %v926_v32 = vsel %vm889_vm10, %v583_v9, %v925_v30  ;;  %vm4559_vm6 = vcmp.eq.s32.totalorder %v3063_v20, 2  ;;  %vm4558_vm5 = vcmp.eq.s32.totalorder %v3063_v20, 3  ;;  %vm4557_vm4 = vcmp.eq.s32.totalorder %v3063_v20, 4 }
  0x1b   :  { %v927_v34 = vsel %vm891_vm11, %v590_v15, %v926_v32  ;;  %vm4556_vm3 = vcmp.eq.s32.totalorder %v3063_v20, 5  ;;  %vm4555_vm2 = vcmp.eq.s32.totalorder %v3063_v20, 6  ;;  %vm4554_vm1 = vcmp.eq.s32.totalorder %v3063_v20, 7 }
  0x1c   :  { %v928_v36 = vsel %vm893_vm12, %v597_v23, %v927_v34  ;;  %v238_v37 = vsel %vm4561_vm8, %v3068_v21, 0.0  ;;  %v239_v38 = vsel %vm4560_vm7, %v3073_v22, 0.0  ;;  %v240_v39 = vsel %vm4559_vm6, %v3078_v27, 0.0 }
  0x1d   :  { %v929_v40 = vsel %vm895_vm13, %v604_v24, %v928_v36  ;;  %v241_v41 = vsel %vm4558_vm5, %v3083_v28, 0.0  ;;  %v242_v42 = vsel %vm4557_vm4, %v3088_v29, 0.0  ;;  %v243_v43 = vsel %vm4556_vm3, %v3094_v31, 0.0 }
  0x1e   :  { %v930_v44 = vsel %vm897_vm14, %v611_v25, %v929_v40  ;;  %v244_v45 = vsel %vm4555_vm2, %v3102_v33, 0.0  ;;  %v245_v46 = vsel %vm4554_vm1, %v3111_v35, 0.0  ;;  %v311_v47 = vsel %vm310_vm0, %v238_v37, 0.0 }
  0x1f   :  { %v931_v48 = vsel %vm899_vm15, %v618_v26, %v930_v44  ;;  %v312_v49 = vrot.slane %v311_v47, 4  ;;  %v318_v50 = vsel %vm310_vm0, %v239_v38, 0.0  ;;  %v325_v51 = vsel %vm310_vm0, %v240_v39, 0.0 }
  0x20   :  { %v319_v52 = vrot.slane %v318_v50, 4  ;;  %v326_v53 = vrot.slane %v325_v51, 4  ;;  %v332_v54 = vsel %vm310_vm0, %v241_v41, 0.0  ;;  %v339_v57 = vsel %vm310_vm0, %v242_v42, 0.0  ;;  %2583 = vadd.xlane.f32.xlu1 %v931_v48 }
  0x21   :  { %v313_v55 = vadd.f32 %v312_v49, %v311_v47  ;;  %v333_v56 = vrot.slane %v332_v54, 4  ;;  %v346_v58 = vsel %vm310_vm0, %v243_v43, 0.0  ;;  %v340_v61 = vrot.slane %v339_v57, 4 }
  0x22   :  { %v320_v59 = vadd.f32 %v319_v52, %v318_v50  ;;  %v327_v60 = vadd.f32 %v326_v53, %v325_v51  ;;  %v347_v62 = vrot.slane %v346_v58, 4  ;;  %v353_v1 = vsel %vm310_vm0, %v244_v45, 0.0  ;;  %v3155_v51 = vld [vmem:[%s4541_s0 + $0x58] sm:$0x3]  ;;  %v3160_v52 = vld [vmem:[%s4541_s0 + $0x5a] sm:$0x3] }
  0x23   :  { %v314_v63 = vrot.slane %v313_v55, 2  ;;  %v334_v0 = vadd.f32 %v333_v56, %v332_v54  ;;  %v360_v2 = vsel %vm310_vm0, %v245_v46, 0.0  ;;  %v341_v6 = vadd.f32 %v340_v61, %v339_v57  ;;  %v3167_v56 = vld [vmem:[%s4541_s0 + $0x5c] sm:$0x3]  ;;  %v3172_v57 = vld [vmem:[%s4541_s0 + $0x5e] sm:$0x3] }
  0x24   :  { %v321_v4 = vrot.slane %v320_v59, 2  ;;  %v328_v5 = vrot.slane %v327_v60, 2  ;;  %v348_v9 = vadd.f32 %v347_v62, %v346_v58  ;;  %v354_v17 = vrot.slane %v353_v1, 4  ;;  %v3179_v61 = vld [vmem:[%s4541_s0 + $0x60] sm:$0x3] }
  0x25   :  { %v315_v15 = vadd.f32 %v314_v63, %v313_v55  ;;  %v335_v16 = vrot.slane %v334_v0, 2  ;;  %v361_v18 = vrot.slane %v360_v2, 4  ;;  %v342_v24 = vrot.slane %v341_v6, 2  ;;  %v3186_v63 = vld [vmem:[%s4541_s0 + $0x62] sm:$0x3] }
  0x26   :  { %v322_v19 = vadd.f32 %v321_v4, %v320_v59  ;;  %v329_v23 = vadd.f32 %v328_v5, %v327_v60  ;;  %v349_v25 = vrot.slane %v348_v9, 2  ;;  %v355_v32 = vadd.f32 %v354_v17, %v353_v1  ;;  %v3195_v4 = vld [vmem:[%s4541_s0 + $0x64] sm:$0x3]  ;;  %v3200_v5 = vld [vmem:[%s4541_s0 + $0x66] sm:$0x3] }
  0x27   :  { %v316_v26 = vrot.slane %v315_v15, 1  ;;  %v336_v30 = vadd.f32 %v335_v16, %v334_v0  ;;  %v362_v34 = vadd.f32 %v361_v18, %v360_v2  ;;  %v343_v38 = vadd.f32 %v342_v24, %v341_v6 }
  0x28   :  { %v323_v36 = vrot.slane %v322_v19, 1  ;;  %v330_v37 = vrot.slane %v329_v23, 1  ;;  %v350_v39 = vadd.f32 %v349_v25, %v348_v9  ;;  %v356_v42 = vrot.slane %v355_v32, 2 }
  0x29   :  { %v317_v40 = vadd.f32 %v316_v26, %v315_v15  ;;  %v337_v41 = vrot.slane %v336_v30, 1  ;;  %v363_v43 = vrot.slane %v362_v34, 2  ;;  %v344_v46 = vrot.slane %v343_v38, 1 }
  0x2a   :  { %v324_v44 = vadd.f32 %v323_v36, %v322_v19  ;;  %v331_v45 = vadd.f32 %v330_v37, %v329_v23  ;;  %v351_v47 = vrot.slane %v350_v39, 1  ;;  %v357_v49 = vadd.f32 %v356_v42, %v355_v32 }
  0x2b   :  { %v338_v48 = vadd.f32 %v337_v41, %v336_v30  ;;  %v364_v50 = vadd.f32 %v363_v43, %v362_v34  ;;  %vm4569_vm1 = vcmp.eq.s32.totalorder %v3015_v10, 8  ;;  %v345_v53 = vadd.f32 %v344_v46, %v343_v38 }
  0x2c   :  { %v352_v54 = vadd.f32 %v351_v47, %v350_v39  ;;  %v888_v55 = vsel %vm887_vm9, %v324_v44, %v317_v40  ;;  %vm4568_vm2 = vcmp.eq.s32.totalorder %v3015_v10, 9  ;;  %v358_v58 = vrot.slane %v357_v49, 1 }
  0x2d   :  { %v365_v59 = vrot.slane %v364_v50, 1  ;;  %v890_v60 = vsel %vm889_vm10, %v331_v45, %v888_v55  ;;  %vm4567_vm3 = vcmp.eq.s32.totalorder %v3015_v10, 10  ;;  %vm4566_vm4 = vcmp.eq.s32.totalorder %v3015_v10, 11 }
  0x2e   :  { %v892_v62 = vsel %vm891_vm11, %v338_v48, %v890_v60  ;;  %vm4565_vm5 = vcmp.eq.s32.totalorder %v3015_v10, 12  ;;  %vm4564_vm6 = vcmp.eq.s32.totalorder %v3015_v10, 13  ;;  %v359_v0 = vadd.f32 %v358_v58, %v357_v49 }
  0x2f   :  { %v366_v1 = vadd.f32 %v365_v59, %v364_v50  ;;  %v894_v2 = vsel %vm893_vm12, %v345_v53, %v892_v62  ;;  %vm4563_vm7 = vcmp.eq.s32.totalorder %v3015_v10, 14  ;;  %vm4562_vm8 = vcmp.eq.s32.totalorder %v3015_v10, 15 }
  0x30   :  { %v896_v6 = vsel %vm895_vm13, %v352_v54, %v894_v2  ;;  %v282_v9 = vsel %vm4569_vm1, %v3155_v51, 0.0  ;;  %v283_v15 = vsel %vm4568_vm2, %v3160_v52, 0.0  ;;  %v284_v17 = vsel %vm4567_vm3, %v3167_v56, 0.0 }
  0x31   :  { %v898_v16 = vsel %vm897_vm14, %v359_v0, %v896_v6  ;;  %v285_v18 = vsel %vm4566_vm4, %v3172_v57, 0.0  ;;  %v286_v19 = vsel %vm4565_vm5, %v3179_v61, 0.0  ;;  %v287_v24 = vsel %vm4564_vm6, %v3186_v63, 0.0 }
  0x32   :  { %v900_v23 = vsel %vm899_vm15, %v366_v1, %v898_v16  ;;  %v288_v25 = vsel %vm4563_vm7, %v3195_v4, 0.0  ;;  %v289_v26 = vsel %vm4562_vm8, %v3200_v5, 0.0  ;;  %v619_v30 = vsel %vm310_vm0, %v282_v9, 0.0 }
  0x33   :  { %v626_v32 = vsel %vm310_vm0, %v283_v15, 0.0  ;;  %v633_v34 = vsel %vm310_vm0, %v284_v17, 0.0  ;;  %v620_v36 = vrot.slane %v619_v30, 4  ;;  %v640_v39 = vsel %vm310_vm0, %v285_v18, 0.0  ;;  %2571 = vadd.xlane.f32.xlu0 %v900_v23 }
  0x34   :  { %v627_v37 = vrot.slane %v626_v32, 4  ;;  %v634_v38 = vrot.slane %v633_v34, 4  ;;  %v641_v40 = vrot.slane %v640_v39, 4  ;;  %v647_v41 = vsel %vm310_vm0, %v286_v19, 0.0 }
  0x35   :  { %v654_v42 = vsel %vm310_vm0, %v287_v24, 0.0  ;;  %v661_v43 = vsel %vm310_vm0, %v288_v25, 0.0  ;;  %v621_v44 = vadd.f32 %v620_v36, %v619_v30  ;;  %v648_v47 = vrot.slane %v647_v41, 4 }
  0x36   :  { %v628_v45 = vadd.f32 %v627_v37, %v626_v32  ;;  %v635_v46 = vadd.f32 %v634_v38, %v633_v34  ;;  %v642_v48 = vadd.f32 %v641_v40, %v640_v39  ;;  %v655_v49 = vrot.slane %v654_v42, 4 }
  0x37   :  { %v662_v50 = vrot.slane %v661_v43, 4  ;;  %v668_v53 = vsel %vm310_vm0, %v289_v26, 0.0  ;;  %v622_v54 = vrot.slane %v621_v44, 2  ;;  %v649_v59 = vadd.f32 %v648_v47, %v647_v41 }
  0x38   :  { %v629_v55 = vrot.slane %v628_v45, 2  ;;  %v636_v58 = vrot.slane %v635_v46, 2  ;;  %v643_v60 = vrot.slane %v642_v48, 2  ;;  %v656_v62 = vadd.f32 %v655_v49, %v654_v42  ;;  %v3253_v49 = vld [vmem:[%s4541_s0 + $0x14] sm:$0x3] }
  0x39   :  { %v663_v0 = vadd.f32 %v662_v50, %v661_v43  ;;  %v669_v1 = vrot.slane %v668_v53, 4  ;;  %v623_v2 = vadd.f32 %v622_v54, %v621_v44  ;;  %v650_v15 = vrot.slane %v649_v59, 2 }
  0x3a   :  { %v630_v6 = vadd.f32 %v629_v55, %v628_v45  ;;  %v637_v9 = vadd.f32 %v636_v58, %v635_v46  ;;  %v644_v16 = vadd.f32 %v643_v60, %v642_v48  ;;  %v657_v17 = vrot.slane %v656_v62, 2  ;;  %v3242_v45 = vld [vmem:[%s4541_s0 + $0x10] sm:$0x3]  ;;  %v3248_v48 = vld [vmem:[%s4541_s0 + $0x12] sm:$0x3] }
  0x3b   :  { %v664_v18 = vrot.slane %v663_v0, 2  ;;  %v670_v19 = vadd.f32 %v669_v1, %v668_v53  ;;  %v624_v23 = vrot.slane %v623_v2, 1  ;;  %v651_v26 = vadd.f32 %v650_v15, %v649_v59  ;;  %v3261_v58 = vld [vmem:[%s4541_s0 + $0x16] sm:$0x3]  ;;  %v3266_v59 = vld [vmem:[%s4541_s0 + $0x18] sm:$0x3] }
  0x3c   :  { %v631_v24 = vrot.slane %v630_v6, 1  ;;  %v638_v25 = vrot.slane %v637_v9, 1  ;;  %v645_v30 = vrot.slane %v644_v16, 1  ;;  %v658_v32 = vadd.f32 %v657_v17, %v656_v62  ;;  %v3272_v62 = vld [vmem:[%s4541_s0 + $0x1a] sm:$0x3] }
  0x3d   :  { %v665_v34 = vadd.f32 %v664_v18, %v663_v0  ;;  %v671_v36 = vrot.slane %v670_v19, 2  ;;  %v625_v37 = vadd.f32 %v624_v23, %v623_v2  ;;  %v652_v40 = vrot.slane %v651_v26, 1  ;;  %v3281_v2 = vld [vmem:[%s4541_s0 + $0x1c] sm:$0x3] }
  0x3e   :  { %v632_v38 = vadd.f32 %v631_v24, %v630_v6  ;;  %v639_v39 = vadd.f32 %v638_v25, %v637_v9  ;;  %v646_v41 = vadd.f32 %v645_v30, %v644_v16  ;;  %v659_v42 = vrot.slane %v658_v32, 1  ;;  %v3286_v6 = vld [vmem:[%s4541_s0 + $0x1e] sm:$0x3] }
  0x3f   :  { %v666_v43 = vrot.slane %v665_v34, 1  ;;  %v672_v44 = vadd.f32 %v671_v36, %v670_v19  ;;  %v653_v46 = vadd.f32 %v652_v40, %v651_v26  ;;  %vm164_vm8 = vcmp.eq.s32.totalorder %v3063_v20, 8 }
  0x40   :  { %v932_v47 = vsel %vm887_vm9, %v632_v38, %v625_v37  ;;  %vm165_vm7 = vcmp.eq.s32.totalorder %v3063_v20, 9  ;;  %v660_v50 = vadd.f32 %v659_v42, %v658_v32  ;;  %vm166_vm6 = vcmp.eq.s32.totalorder %v3063_v20, 10 }
  0x41   :  { %v667_v53 = vadd.f32 %v666_v43, %v665_v34  ;;  %v673_v54 = vrot.slane %v672_v44, 1  ;;  %v933_v55 = vsel %vm889_vm10, %v639_v39, %v932_v47  ;;  %vm167_vm5 = vcmp.eq.s32.totalorder %v3063_v20, 11 }
  0x42   :  { %v934_v60 = vsel %vm891_vm11, %v646_v41, %v933_v55  ;;  %vm168_vm4 = vcmp.eq.s32.totalorder %v3063_v20, 12  ;;  %vm169_vm3 = vcmp.eq.s32.totalorder %v3063_v20, 13  ;;  %vm170_vm2 = vcmp.eq.s32.totalorder %v3063_v20, 14 }
  0x43   :  { %v674_v0 = vadd.f32 %v673_v54, %v672_v44  ;;  %v935_v1 = vsel %vm893_vm12, %v653_v46, %v934_v60  ;;  %vm171_vm1 = vcmp.eq.s32.totalorder %v3063_v20, 15  ;;  %v246_v15 = vsel %vm164_vm8, %v3242_v45, 0.0 }
  0x44   :  { %v936_v9 = vsel %vm895_vm13, %v660_v50, %v935_v1  ;;  %v247_v16 = vsel %vm165_vm7, %v3248_v48, 0.0  ;;  %v248_v18 = vsel %vm166_vm6, %v3253_v49, 0.0  ;;  %v249_v19 = vsel %vm167_vm5, %v3261_v58, 0.0 }
  0x45   :  { %v937_v17 = vsel %vm897_vm14, %v667_v53, %v936_v9  ;;  %v250_v23 = vsel %vm168_vm4, %v3266_v59, 0.0  ;;  %v251_v25 = vsel %vm169_vm3, %v3272_v62, 0.0  ;;  %v252_v26 = vsel %vm170_vm2, %v3281_v2, 0.0 }
  0x46   :  { %v938_v24 = vsel %vm899_vm15, %v674_v0, %v937_v17  ;;  %v253_v30 = vsel %vm171_vm1, %v3286_v6, 0.0  ;;  %v367_v32 = vsel %vm310_vm0, %v246_v15, 0.0  ;;  %v374_v34 = vsel %vm310_vm0, %v247_v16, 0.0 }
  0x47   :  { %v381_v36 = vsel %vm310_vm0, %v248_v18, 0.0  ;;  %v368_v37 = vrot.slane %v367_v32, 4  ;;  %v375_v38 = vrot.slane %v374_v34, 4  ;;  %v388_v40 = vsel %vm310_vm0, %v249_v19, 0.0  ;;  %2585 = vadd.xlane.f32.xlu1 %v938_v24 }
  0x48   :  { %v382_v39 = vrot.slane %v381_v36, 4  ;;  %v389_v41 = vrot.slane %v388_v40, 4  ;;  %v395_v42 = vsel %vm310_vm0, %v250_v23, 0.0  ;;  %v402_v43 = vsel %vm310_vm0, %v251_v25, 0.0 }
  0x49   :  { %v409_v44 = vsel %vm310_vm0, %v252_v26, 0.0  ;;  %v369_v46 = vadd.f32 %v368_v37, %v367_v32  ;;  %v376_v47 = vadd.f32 %v375_v38, %v374_v34  ;;  %v396_v53 = vrot.slane %v395_v42, 4 }
  0x4a   :  { %v383_v50 = vadd.f32 %v382_v39, %v381_v36  ;;  %v390_v54 = vadd.f32 %v389_v41, %v388_v40  ;;  %v403_v55 = vrot.slane %v402_v43, 4  ;;  %v410_v60 = vrot.slane %v409_v44, 4 }
  0x4b   :  { %v416_v0 = vsel %vm310_vm0, %v253_v30, 0.0  ;;  %v370_v1 = vrot.slane %v369_v46, 2  ;;  %v377_v9 = vrot.slane %v376_v47, 2  ;;  %v397_v16 = vadd.f32 %v396_v53, %v395_v42 }
  0x4c   :  { %v384_v15 = vrot.slane %v383_v50, 2  ;;  %v391_v17 = vrot.slane %v390_v54, 2  ;;  %v404_v18 = vadd.f32 %v403_v55, %v402_v43  ;;  %v411_v19 = vadd.f32 %v410_v60, %v409_v44 }
  0x4d   :  { %v417_v23 = vrot.slane %v416_v0, 4  ;;  %v371_v24 = vadd.f32 %v370_v1, %v369_v46  ;;  %v378_v25 = vadd.f32 %v377_v9, %v376_v47  ;;  %v398_v32 = vrot.slane %v397_v16, 2 }
  0x4e   :  { %v385_v26 = vadd.f32 %v384_v15, %v383_v50  ;;  %v392_v34 = vadd.f32 %v391_v17, %v390_v54  ;;  %v405_v36 = vrot.slane %v404_v18, 2  ;;  %v412_v37 = vrot.slane %v411_v19, 2 }
  0x4f   :  { %v418_v38 = vadd.f32 %v417_v23, %v416_v0  ;;  %v372_v39 = vrot.slane %v371_v24, 1  ;;  %v379_v40 = vrot.slane %v378_v25, 1  ;;  %v399_v30 = vadd.f32 %v398_v32, %v397_v16 }
  0x50   :  { %v386_v41 = vrot.slane %v385_v26, 1  ;;  %v393_v3 = vrot.slane %v392_v34, 1  ;;  %v406_v10 = vadd.f32 %v405_v36, %v404_v18  ;;  %v413_v20 = vadd.f32 %v412_v37, %v411_v19 }
  0x51   :  { %v419_v42 = vrot.slane %v418_v38, 2  ;;  %v373_v53 = vadd.f32 %v372_v39, %v371_v24  ;;  %v380_v43 = vadd.f32 %v379_v40, %v378_v25  ;;  %v400_v55 = vrot.slane %v399_v30, 1 }
  0x52   :  { %v387_v44 = vadd.f32 %v386_v41, %v385_v26  ;;  %v394_v46 = vadd.f32 %v393_v3, %v392_v34  ;;  %v407_v47 = vrot.slane %v406_v10, 1  ;;  %v414_v50 = vrot.slane %v413_v20, 1 }
  0x53   :  { %v420_v60 = vadd.f32 %v419_v42, %v418_v38  ;;  %v401_v54 = vadd.f32 %v400_v55, %v399_v30  ;;  %v901_v1 = vsel %vm887_vm9, %v380_v43, %v373_v53  ;;  %v1004_v0 = vmul.f32 %v3242_v45, %v3242_v45 }
  0x54   :  { %v1005_v9 = vmul.f32 %v3248_v48, %v3248_v48  ;;  %v408_v15 = vadd.f32 %v407_v47, %v406_v10  ;;  %v415_v16 = vadd.f32 %v414_v50, %v413_v20  ;;  %v902_v18 = vsel %vm889_vm10, %v387_v44, %v901_v1 }
  0x55   :  { %v421_v17 = vrot.slane %v420_v60, 1  ;;  %v903_v19 = vsel %vm891_vm11, %v394_v46, %v902_v18  ;;  %v1006_v3 = vmul.f32 %v3253_v49, %v3253_v49  ;;  %v1007_v23 = vmul.f32 %v3261_v58, %v3261_v58 }
  0x56   :  { %v1008_v24 = vmul.f32 %v3266_v59, %v3266_v59  ;;  %v904_v25 = vsel %vm893_vm12, %v401_v54, %v903_v19  ;;  %v1009_v10 = vmul.f32 %v3272_v62, %v3272_v62  ;;  %v1010_v20 = vmul.f32 %v3281_v2, %v3281_v2 }
  0x57   :  { %v422_v45 = vadd.f32 %v421_v17, %v420_v60  ;;  %v905_v48 = vsel %vm895_vm13, %v408_v15, %v904_v25  ;;  %v1011_v49 = vmul.f32 %v3286_v6, %v3286_v6  ;;  %v1124_v26 = vsel %vm310_vm0, %v1004_v0, 0.0 }
  0x58   :  { %v1131_v58 = vsel %vm310_vm0, %v1005_v9, 0.0  ;;  %v906_v59 = vsel %vm897_vm14, %v415_v16, %v905_v48  ;;  %v1125_v32 = vrot.slane %v1124_v26, 4  ;;  %v1138_v36 = vsel %vm310_vm0, %v1006_v3, 0.0 }
  0x59   :  { %v1132_v34 = vrot.slane %v1131_v58, 4  ;;  %v907_v62 = vsel %vm899_vm15, %v422_v45, %v906_v59  ;;  %v1139_v37 = vrot.slane %v1138_v36, 4  ;;  %v1145_v2 = vsel %vm310_vm0, %v1007_v23, 0.0 }
  0x5a   :  { %v1152_v38 = vsel %vm310_vm0, %v1008_v24, 0.0  ;;  %v1126_v39 = vadd.f32 %v1125_v32, %v1124_v26  ;;  %v1146_v6 = vrot.slane %v1145_v2, 4  ;;  %v1159_v42 = vsel %vm310_vm0, %v1009_v10, 0.0  ;;  %2573 = vadd.xlane.f32.xlu0 %v907_v62 }
  0x5b   :  { %v1133_v40 = vadd.f32 %v1132_v34, %v1131_v58  ;;  %v1140_v41 = vadd.f32 %v1139_v37, %v1138_v36  ;;  %v1153_v30 = vrot.slane %v1152_v38, 4  ;;  %v1166_v53 = vsel %vm310_vm0, %v1010_v20, 0.0 }
  0x5c   :  { %v1127_v43 = vrot.slane %v1126_v39, 2  ;;  %v1147_v55 = vadd.f32 %v1146_v6, %v1145_v2  ;;  %v1160_v46 = vrot.slane %v1159_v42, 4  ;;  %v1167_v60 = vrot.slane %v1166_v53, 4 }
  0x5d   :  { %v1134_v44 = vrot.slane %v1133_v40, 2  ;;  %v1141_v47 = vrot.slane %v1140_v41, 2  ;;  %v1154_v50 = vadd.f32 %v1153_v30, %v1152_v38  ;;  %v1173_v54 = vsel %vm310_vm0, %v1011_v49, 0.0 }
  0x5e   :  { %v1128_v1 = vadd.f32 %v1127_v43, %v1126_v39  ;;  %v1148_v9 = vrot.slane %v1147_v55, 2  ;;  %v1161_v15 = vadd.f32 %v1160_v46, %v1159_v42  ;;  %v1168_v18 = vadd.f32 %v1167_v60, %v1166_v53 }
  0x5f   :  { %v1135_v0 = vadd.f32 %v1134_v44, %v1133_v40  ;;  %v1142_v16 = vadd.f32 %v1141_v47, %v1140_v41  ;;  %v1155_v17 = vrot.slane %v1154_v50, 2  ;;  %v1174_v19 = vrot.slane %v1173_v54, 4 }
  0x60   :  { %v1129_v3 = vrot.slane %v1128_v1, 1  ;;  %v1149_v24 = vadd.f32 %v1148_v9, %v1147_v55  ;;  %v1162_v45 = vrot.slane %v1161_v15, 2  ;;  %v1169_v20 = vrot.slane %v1168_v18, 2 }
  0x61   :  { %v1136_v23 = vrot.slane %v1135_v0, 1  ;;  %v1143_v25 = vrot.slane %v1142_v16, 1  ;;  %v1156_v10 = vadd.f32 %v1155_v17, %v1154_v50  ;;  %v1175_v48 = vadd.f32 %v1174_v19, %v1173_v54 }
  0x62   :  { %v1130_v26 = vadd.f32 %v1129_v3, %v1128_v1  ;;  %v1150_v59 = vrot.slane %v1149_v24, 1  ;;  %v1163_v49 = vadd.f32 %v1162_v45, %v1161_v15  ;;  %v1170_v36 = vadd.f32 %v1169_v20, %v1168_v18 }
  0x63   :  { %v1137_v58 = vadd.f32 %v1136_v23, %v1135_v0  ;;  %v1144_v32 = vadd.f32 %v1143_v25, %v1142_v16  ;;  %v1157_v34 = vrot.slane %v1156_v10, 1  ;;  %v1176_v62 = vrot.slane %v1175_v48, 2 }
  0x64   :  { %v1151_v37 = vadd.f32 %v1150_v59, %v1149_v24  ;;  %v1164_v2 = vrot.slane %v1163_v49, 1  ;;  %v996_v39 = vmul.f32 %v3068_v21, %v3068_v21  ;;  %v1171_v6 = vrot.slane %v1170_v36, 1 }
  0x65   :  { %v1651_v38 = vsel %vm887_vm9, %v1137_v58, %v1130_v26  ;;  %v1158_v40 = vadd.f32 %v1157_v34, %v1156_v10  ;;  %v1177_v41 = vadd.f32 %v1176_v62, %v1175_v48  ;;  %v997_v43 = vmul.f32 %v3073_v22, %v3073_v22 }
  0x66   :  { %v1652_v30 = vsel %vm889_vm10, %v1144_v32, %v1651_v38  ;;  %v1165_v42 = vadd.f32 %v1164_v2, %v1163_v49  ;;  %v998_v44 = vmul.f32 %v3078_v27, %v3078_v27  ;;  %v1172_v55 = vadd.f32 %v1171_v6, %v1170_v36 }
  0x67   :  { %v1653_v53 = vsel %vm891_vm11, %v1151_v37, %v1652_v30  ;;  %v1178_v46 = vrot.slane %v1177_v41, 1  ;;  %v999_v21 = vmul.f32 %v3083_v28, %v3083_v28  ;;  %v1000_v60 = vmul.f32 %v3088_v29, %v3088_v29 }
  0x68   :  { %v1654_v47 = vsel %vm893_vm12, %v1158_v40, %v1653_v53  ;;  %v1001_v54 = vmul.f32 %v3094_v31, %v3094_v31  ;;  %v1002_v22 = vmul.f32 %v3102_v33, %v3102_v33  ;;  %v1003_v0 = vmul.f32 %v3111_v35, %v3111_v35 }
  0x69   :  { %v1655_v50 = vsel %vm895_vm13, %v1165_v42, %v1654_v47  ;;  %v1179_v1 = vadd.f32 %v1178_v46, %v1177_v41  ;;  %v1068_v9 = vsel %vm310_vm0, %v996_v39, 0.0  ;;  %v1075_v15 = vsel %vm310_vm0, %v997_v43, 0.0 }
  0x6a   :  { %v1656_v27 = vsel %vm897_vm14, %v1172_v55, %v1655_v50  ;;  %v1069_v28 = vrot.slane %v1068_v9, 4  ;;  %v1082_v16 = vsel %vm310_vm0, %v998_v44, 0.0  ;;  %v1089_v29 = vsel %vm310_vm0, %v999_v21, 0.0 }
  0x6b   :  { %v1657_v31 = vsel %vm899_vm15, %v1179_v1, %v1656_v27  ;;  %v1076_v17 = vrot.slane %v1075_v15, 4  ;;  %v1083_v18 = vrot.slane %v1082_v16, 4  ;;  %v1090_v33 = vrot.slane %v1089_v29, 4 }
  0x6c   :  { %v1070_v19 = vadd.f32 %v1069_v28, %v1068_v9  ;;  %v1096_v3 = vsel %vm310_vm0, %v1000_v60, 0.0  ;;  %v1103_v23 = vsel %vm310_vm0, %v1001_v54, 0.0  ;;  %2678 = vadd.xlane.f32.xlu1 %v1657_v31  ;;  %v1110_v48 = vsel %vm310_vm0, %v1002_v22, 0.0 }
  0x6d   :  { %v1077_v35 = vadd.f32 %v1076_v17, %v1075_v15  ;;  %v1084_v24 = vadd.f32 %v1083_v18, %v1082_v16  ;;  %v1091_v45 = vadd.f32 %v1090_v33, %v1089_v29  ;;  %v1097_v25 = vrot.slane %v1096_v3, 4 }
  0x6e   :  { %v1071_v10 = vrot.slane %v1070_v19, 2  ;;  %v1104_v20 = vrot.slane %v1103_v23, 4  ;;  %v1117_v26 = vsel %vm310_vm0, %v1003_v0, 0.0  ;;  %v1111_v62 = vrot.slane %v1110_v48, 4 }
  0x6f   :  { %v1078_v58 = vrot.slane %v1077_v35, 2  ;;  %v1085_v59 = vrot.slane %v1084_v24, 2  ;;  %v1092_v49 = vrot.slane %v1091_v45, 2  ;;  %v1098_v32 = vadd.f32 %v1097_v25, %v1096_v3 }
  0x70   :  { %v1072_v34 = vadd.f32 %v1071_v10, %v1070_v19  ;;  %v1105_v36 = vadd.f32 %v1104_v20, %v1103_v23  ;;  %v1118_v37 = vrot.slane %v1117_v26, 4  ;;  %v1112_v30 = vadd.f32 %v1111_v62, %v1110_v48 }
  0x71   :  { %v1079_v2 = vadd.f32 %v1078_v58, %v1077_v35  ;;  %v1086_v38 = vadd.f32 %v1085_v59, %v1084_v24  ;;  %v1093_v39 = vadd.f32 %v1092_v49, %v1091_v45  ;;  %v1099_v40 = vrot.slane %v1098_v32, 2 }
  0x72   :  { %v1073_v6 = vrot.slane %v1072_v34, 1  ;;  %v1106_v41 = vrot.slane %v1105_v36, 2  ;;  %v1119_v42 = vadd.f32 %v1118_v37, %v1117_v26  ;;  %v1113_v21 = vrot.slane %v1112_v30, 2 }
  0x73   :  { %v1080_v53 = vrot.slane %v1079_v2, 1  ;;  %v1087_v43 = vrot.slane %v1086_v38, 1  ;;  %v1094_v44 = vrot.slane %v1093_v39, 1  ;;  %v1100_v55 = vadd.f32 %v1099_v40, %v1098_v32 }
  0x74   :  { %v1074_v46 = vadd.f32 %v1073_v6, %v1072_v34  ;;  %v1107_v47 = vadd.f32 %v1106_v41, %v1105_v36  ;;  %v1120_v50 = vrot.slane %v1119_v42, 2  ;;  %v1114_v0 = vadd.f32 %v1113_v21, %v1112_v30 }
  0x75   :  { %v1081_v60 = vadd.f32 %v1080_v53, %v1079_v2  ;;  %v1088_v54 = vadd.f32 %v1087_v43, %v1086_v38  ;;  %v1095_v22 = vadd.f32 %v1094_v44, %v1093_v39  ;;  %v1101_v1 = vrot.slane %v1100_v55, 1 }
  0x76   :  { %v1108_v27 = vrot.slane %v1107_v47, 1  ;;  %v1121_v9 = vadd.f32 %v1120_v50, %v1119_v42  ;;  %v1040_v28 = vmul.f32 %v3155_v51, %v3155_v51  ;;  %v1041_v29 = vmul.f32 %v3160_v52, %v3160_v52 }
  0x77   :  { %v1102_v15 = vadd.f32 %v1101_v1, %v1100_v55  ;;  %v1644_v16 = vsel %vm887_vm9, %v1081_v60, %v1074_v46  ;;  %v1042_v31 = vmul.f32 %v3167_v56, %v3167_v56  ;;  %v1115_v18 = vrot.slane %v1114_v0, 1 }
  0x78   :  { %v1109_v17 = vadd.f32 %v1108_v27, %v1107_v47  ;;  %v1122_v33 = vrot.slane %v1121_v9, 1  ;;  %v1645_v19 = vsel %vm889_vm10, %v1088_v54, %v1644_v16  ;;  %v1043_v23 = vmul.f32 %v3172_v57, %v3172_v57 }
  0x79   :  { %v1646_v3 = vsel %vm891_vm11, %v1095_v22, %v1645_v19  ;;  %v1044_v51 = vmul.f32 %v3179_v61, %v3179_v61  ;;  %v1045_v35 = vmul.f32 %v3186_v63, %v3186_v63  ;;  %v1116_v52 = vadd.f32 %v1115_v18, %v1114_v0 }
  0x7a   :  { %v1123_v24 = vadd.f32 %v1122_v33, %v1121_v9  ;;  %v1647_v56 = vsel %vm893_vm12, %v1102_v15, %v1646_v3  ;;  %v1046_v45 = vmul.f32 %v3195_v4, %v3195_v4  ;;  %v1047_v10 = vmul.f32 %v3200_v5, %v3200_v5 }
  0x7b   :  { %v1648_v25 = vsel %vm895_vm13, %v1109_v17, %v1647_v56  ;;  %v1376_v57 = vsel %vm310_vm0, %v1040_v28, 0.0  ;;  %v1383_v20 = vsel %vm310_vm0, %v1041_v29, 0.0  ;;  %v1390_v26 = vsel %vm310_vm0, %v1042_v31, 0.0 }
  0x7c   :  { %v1649_v61 = vsel %vm897_vm14, %v1116_v52, %v1648_v25  ;;  %v1377_v48 = vrot.slane %v1376_v57, 4  ;;  %v1384_v63 = vrot.slane %v1383_v20, 4  ;;  %v1391_v59 = vrot.slane %v1390_v26, 4  ;;  %v2949_v52 = vld [vmem:[%s4541_s0 + $0x54] sm:$0x3] }
  0x7d   :  { %v1650_v58 = vsel %vm899_vm15, %v1123_v24, %v1649_v61  ;;  %v1397_v4 = vsel %vm310_vm0, %v1043_v23, 0.0  ;;  %v1404_v49 = vsel %vm310_vm0, %v1044_v51, 0.0  ;;  %v1411_v37 = vsel %vm310_vm0, %v1045_v35, 0.0  ;;  %v2950_v61 = vld [vmem:[%s4541_s0 + $0x56] sm:$0x3] }
  0x7e   :  { %v1378_v32 = vadd.f32 %v1377_v48, %v1376_v57  ;;  %v1385_v34 = vadd.f32 %v1384_v63, %v1383_v20  ;;  %v1398_v5 = vrot.slane %v1397_v4, 4  ;;  %v1392_v36 = vadd.f32 %v1391_v59, %v1390_v26  ;;  %2676 = vadd.xlane.f32.xlu0 %v1650_v58 }
  0x7f   :  { %v1405_v62 = vrot.slane %v1404_v49, 4  ;;  %v1418_v2 = vsel %vm310_vm0, %v1046_v45, 0.0  ;;  %v1412_v6 = vrot.slane %v1411_v37, 4  ;;  %v1425_v53 = vsel %vm310_vm0, %v1047_v10, 0.0 }
  0x80   :  { %v1379_v38 = vrot.slane %v1378_v32, 2  ;;  %v1386_v39 = vrot.slane %v1385_v34, 2  ;;  %v1399_v40 = vadd.f32 %v1398_v5, %v1397_v4  ;;  %v1393_v41 = vrot.slane %v1392_v36, 2 }
  0x81   :  { %v1406_v30 = vadd.f32 %v1405_v62, %v1404_v49  ;;  %v1419_v42 = vrot.slane %v1418_v2, 4  ;;  %v1413_v46 = vadd.f32 %v1412_v6, %v1411_v37  ;;  %v1426_v60 = vrot.slane %v1425_v53, 4 }
  0x82   :  { %v1380_v43 = vadd.f32 %v1379_v38, %v1378_v32  ;;  %v1387_v44 = vadd.f32 %v1386_v39, %v1385_v34  ;;  %v1400_v55 = vrot.slane %v1399_v40, 2  ;;  %v1394_v47 = vadd.f32 %v1393_v41, %v1392_v36 }
  0x83   :  { %v1407_v21 = vrot.slane %v1406_v30, 2  ;;  %v1420_v50 = vadd.f32 %v1419_v42, %v1418_v2  ;;  %v1414_v27 = vrot.slane %v1413_v46, 2  ;;  %v1427_v15 = vadd.f32 %v1426_v60, %v1425_v53 }
  0x84   :  { %v1381_v54 = vrot.slane %v1380_v43, 1  ;;  %v1388_v22 = vrot.slane %v1387_v44, 1  ;;  %v1401_v1 = vadd.f32 %v1400_v55, %v1399_v40  ;;  %v1395_v0 = vrot.slane %v1394_v47, 1 }
  0x85   :  { %v1408_v9 = vadd.f32 %v1407_v21, %v1406_v30  ;;  %v1421_v28 = vrot.slane %v1420_v50, 2  ;;  %v1415_v17 = vadd.f32 %v1414_v27, %v1413_v46  ;;  %v1428_v3 = vrot.slane %v1427_v15, 2 }
  0x86   :  { %v1382_v16 = vadd.f32 %v1381_v54, %v1380_v43  ;;  %v1389_v29 = vadd.f32 %v1388_v22, %v1387_v44  ;;  %v1402_v31 = vrot.slane %v1401_v1, 1  ;;  %v1396_v18 = vadd.f32 %v1395_v0, %v1394_v47 }
  0x87   :  { %v1409_v33 = vrot.slane %v1408_v9, 1  ;;  %v1422_v19 = vadd.f32 %v1421_v28, %v1420_v50  ;;  %v1416_v51 = vrot.slane %v1415_v17, 1  ;;  %v1038_v24 = vmul.f32 %v2949_v52, %v2949_v52 }
  0x88   :  { %v1403_v23 = vadd.f32 %v1402_v31, %v1401_v1  ;;  %v1682_v35 = vsel %vm887_vm9, %v1389_v29, %v1382_v16  ;;  %v1429_v25 = vadd.f32 %v1428_v3, %v1427_v15  ;;  %v1039_v48 = vmul.f32 %v2950_v61, %v2950_v61 }
  0x89   :  { %v1410_v56 = vadd.f32 %v1409_v33, %v1408_v9  ;;  %v1423_v45 = vrot.slane %v1422_v19, 1  ;;  %v1683_v10 = vsel %vm889_vm10, %v1396_v18, %v1682_v35  ;;  %v1417_v57 = vadd.f32 %v1416_v51, %v1415_v17  ;;  %v4603_v51 = vld [vmem:[#allocation6_spill] sm:$0xff] }
  0x8a   :  { %v1684_v20 = vsel %vm891_vm11, %v1403_v23, %v1683_v10  ;;  %v1320_v63 = vsel %vm310_vm0, %v3005_v7, 0.0  ;;  %v1430_v58 = vrot.slane %v1429_v25, 1  ;;  %v1327_v32 = vsel %vm310_vm0, %v3007_v8, 0.0 }
  0x8b   :  { %v1424_v26 = vadd.f32 %v1423_v45, %v1422_v19  ;;  %v1685_v59 = vsel %vm893_vm12, %v1410_v56, %v1684_v20  ;;  %v1321_v4 = vrot.slane %v1320_v63, 4  ;;  %v1334_v34 = vsel %vm310_vm0, %v3017_v11, 0.0 }
  0x8c   :  { %v1686_v49 = vsel %vm895_vm13, %v1417_v57, %v1685_v59  ;;  %v1341_v5 = vsel %vm310_vm0, %v3019_v12, 0.0  ;;  %v1431_v36 = vadd.f32 %v1430_v58, %v1429_v25  ;;  %v1328_v37 = vrot.slane %v1327_v32, 4 }
  0x8d   :  { %v1687_v62 = vsel %vm897_vm14, %v1424_v26, %v1686_v49  ;;  %v1322_v7 = vadd.f32 %v1321_v4, %v1320_v63  ;;  %v1335_v2 = vrot.slane %v1334_v34, 4  ;;  %v1342_v38 = vrot.slane %v1341_v5, 4 }
  0x8e   :  { %v1348_v39 = vsel %vm310_vm0, %v3021_v13, 0.0  ;;  %v1355_v40 = vsel %vm310_vm0, %v3023_v14, 0.0  ;;  %v1688_v8 = vsel %vm899_vm15, %v1431_v36, %v1687_v62  ;;  %v1329_v11 = vadd.f32 %v1328_v37, %v1327_v32 }
  0x8f   :  { %v1323_v6 = vrot.slane %v1322_v7, 2  ;;  %v1349_v41 = vrot.slane %v1348_v39, 4  ;;  %v1336_v30 = vadd.f32 %v1335_v2, %v1334_v34  ;;  %v1343_v12 = vadd.f32 %v1342_v38, %v1341_v5  ;;  %2689 = vadd.xlane.f32.xlu1 %v1688_v8 }
  0x90   :  { %v1356_v42 = vrot.slane %v1355_v40, 4  ;;  %v1330_v43 = vrot.slane %v1329_v11, 2  ;;  %v1362_v55 = vsel %vm310_vm0, %v1038_v24, 0.0  ;;  %v1369_v54 = vsel %vm310_vm0, %v1039_v48, 0.0 }
  0x91   :  { %v1324_v53 = vadd.f32 %v1323_v6, %v1322_v7  ;;  %v1350_v44 = vadd.f32 %v1349_v41, %v1348_v39  ;;  %v1337_v46 = vrot.slane %v1336_v30, 2  ;;  %v1344_v47 = vrot.slane %v1343_v12, 2 }
  0x92   :  { %v1357_v13 = vadd.f32 %v1356_v42, %v1355_v40  ;;  %v1363_v21 = vrot.slane %v1362_v55, 4  ;;  %v1331_v14 = vadd.f32 %v1330_v43, %v1329_v11  ;;  %v1370_v16 = vrot.slane %v1369_v54, 4 }
  0x93   :  { %v1325_v50 = vrot.slane %v1324_v53, 1  ;;  %v1351_v60 = vrot.slane %v1350_v44, 2  ;;  %v1338_v22 = vadd.f32 %v1337_v46, %v1336_v30  ;;  %v1345_v1 = vadd.f32 %v1344_v47, %v1343_v12 }
  0x94   :  { %v1358_v27 = vrot.slane %v1357_v13, 2  ;;  %v1364_v0 = vadd.f32 %v1363_v21, %v1362_v55  ;;  %v1332_v28 = vrot.slane %v1331_v14, 1  ;;  %v1371_v3 = vadd.f32 %v1370_v16, %v1369_v54 }
  0x95   :  { %v1326_v9 = vadd.f32 %v1325_v50, %v1324_v53  ;;  %v1352_v15 = vadd.f32 %v1351_v60, %v1350_v44  ;;  %v1339_v29 = vrot.slane %v1338_v22, 1  ;;  %v1346_v31 = vrot.slane %v1345_v1, 1 }
  0x96   :  { %v1359_v17 = vadd.f32 %v1358_v27, %v1357_v13  ;;  %v1365_v18 = vrot.slane %v1364_v0, 2  ;;  %v1333_v33 = vadd.f32 %v1332_v28, %v1331_v14  ;;  %v4602_v23 = vmov 0.0  }
  0x97   :  { %v1353_v19 = vrot.slane %v1352_v15, 1  ;;  %v2884_v35 = vsel %vm164_vm8, 1.0, %v4602_v23  ;;  %v1340_v52 = vadd.f32 %v1339_v29, %v1338_v22  ;;  %v1347_v24 = vadd.f32 %v1346_v31, %v1345_v1 }
  0x98   :  { %v1360_v56 = vrot.slane %v1359_v17, 1  ;;  %v1366_v45 = vadd.f32 %v1365_v18, %v1364_v0  ;;  %v1372_v10 = vrot.slane %v1371_v3, 2  ;;  %v1675_v57 = vsel %vm887_vm9, %v1333_v33, %v1326_v9 }
  0x99   :  { %v1354_v25 = vadd.f32 %v1353_v19, %v1352_v15  ;;  %v2885_v20 = vsel %vm165_vm7, 1.0, %v4602_v23  ;;  %v1676_v63 = vsel %vm889_vm10, %v1340_v52, %v1675_v57  ;;  %v2886_v26 = vsel %vm166_vm6, 1.0, %v4602_v23 }
  0x9a   :  { %v1361_v61 = vadd.f32 %v1360_v56, %v1359_v17  ;;  %v1367_v48 = vrot.slane %v1366_v45, 1  ;;  %v1373_v58 = vadd.f32 %v1372_v10, %v1371_v3  ;;  %v1677_v59 = vsel %vm891_vm11, %v1347_v24, %v1676_v63 }
  0x9b   :  { %v2887_v4 = vsel %vm167_vm5, 1.0, %v4602_v23  ;;  %v2888_v49 = vsel %vm168_vm4, 1.0, %v4602_v23  ;;  %v1678_v34 = vsel %vm893_vm12, %v1354_v25, %v1677_v59  ;;  %v2889_v5 = vsel %vm169_vm3, 1.0, %v4602_v23 }
  0x9c   :  { %v1368_v32 = vadd.f32 %v1367_v48, %v1366_v45  ;;  %v2890_v36 = vsel %vm170_vm2, 1.0, %v4602_v23  ;;  %v1374_v62 = vrot.slane %v1373_v58, 1  ;;  %v1679_v7 = vsel %vm895_vm13, %v1361_v61, %v1678_v34 }
  0x9d   :  { %v2891_v37 = vsel %vm171_vm1, 1.0, %v4602_v23  ;;  %v1946_v2 = vsel %vm310_vm0, %v2884_v35, 0.0  ;;  %v1953_v40 = vsel %vm310_vm0, %v2885_v20, 0.0  ;;  %v1960_v8 = vsel %vm310_vm0, %v2886_v26, 0.0 }
  0x9e   :  { %v1680_v38 = vsel %vm897_vm14, %v1368_v32, %v1679_v7  ;;  %v1947_v39 = vrot.slane %v1946_v2, 4  ;;  %v1375_v6 = vadd.f32 %v1374_v62, %v1373_v58  ;;  %v1954_v11 = vrot.slane %v1953_v40, 4 }
  0x9f   :  { %v1961_v41 = vrot.slane %v1960_v8, 4  ;;  %v1967_v30 = vsel %vm310_vm0, %v2887_v4, 0.0  ;;  %v1974_v53 = vsel %vm310_vm0, %v2888_v49, 0.0  ;;  %v1981_v43 = vsel %vm310_vm0, %v2889_v5, 0.0 }
  0xa0   :  { %v1948_v12 = vadd.f32 %v1947_v39, %v1946_v2  ;;  %v1968_v42 = vrot.slane %v1967_v30, 4  ;;  %v1681_v44 = vsel %vm899_vm15, %v1375_v6, %v1680_v38  ;;  %v1955_v55 = vadd.f32 %v1954_v11, %v1953_v40 }
  0xa1   :  { %v1962_v46 = vadd.f32 %v1961_v41, %v1960_v8  ;;  %v1975_v47 = vrot.slane %v1974_v53, 4  ;;  %v1982_v50 = vrot.slane %v1981_v43, 4  ;;  %v1988_v22 = vsel %vm310_vm0, %v2890_v36, 0.0  ;;  %2687 = vadd.xlane.f32.xlu0 %v1681_v44 }
  0xa2   :  { %v1949_v13 = vrot.slane %v1948_v12, 2  ;;  %v1969_v21 = vadd.f32 %v1968_v42, %v1967_v30  ;;  %v1956_v14 = vrot.slane %v1955_v55, 2  ;;  %v1989_v9 = vrot.slane %v1988_v22, 4 }
  0xa3   :  { %v1963_v60 = vrot.slane %v1962_v46, 2  ;;  %v1976_v54 = vadd.f32 %v1975_v47, %v1974_v53  ;;  %v1983_v0 = vadd.f32 %v1982_v50, %v1981_v43  ;;  %v1995_v29 = vsel %vm310_vm0, %v2891_v37, 0.0 }
  0xa4   :  { %v1950_v1 = vadd.f32 %v1949_v13, %v1948_v12  ;;  %v1970_v27 = vrot.slane %v1969_v21, 2  ;;  %v1957_v28 = vadd.f32 %v1956_v14, %v1955_v55  ;;  %v1990_v33 = vadd.f32 %v1989_v9, %v1988_v22 }
  0xa5   :  { %v1964_v15 = vadd.f32 %v1963_v60, %v1962_v46  ;;  %v1977_v16 = vrot.slane %v1976_v54, 2  ;;  %v1984_v18 = vrot.slane %v1983_v0, 2  ;;  %v1996_v52 = vrot.slane %v1995_v29, 4 }
  0xa6   :  { %v1951_v31 = vrot.slane %v1950_v1, 1  ;;  %v1971_v17 = vadd.f32 %v1970_v27, %v1969_v21  ;;  %v1958_v19 = vrot.slane %v1957_v28, 1  ;;  %v1991_v25 = vrot.slane %v1990_v33, 2 }
  0xa7   :  { %v1965_v3 = vrot.slane %v1964_v15, 1  ;;  %v1978_v35 = vadd.f32 %v1977_v16, %v1976_v54  ;;  %v1985_v45 = vadd.f32 %v1984_v18, %v1983_v0  ;;  %v1997_v61 = vadd.f32 %v1996_v52, %v1995_v29 }
  0xa8   :  { %v1952_v24 = vadd.f32 %v1951_v31, %v1950_v1  ;;  %v1972_v56 = vrot.slane %v1971_v17, 1  ;;  %v1959_v10 = vadd.f32 %v1958_v19, %v1957_v28  ;;  %v1992_v26 = vadd.f32 %v1991_v25, %v1990_v33 }
  0xa9   :  { %v1966_v57 = vadd.f32 %v1965_v3, %v1964_v15  ;;  %v1979_v20 = vrot.slane %v1978_v35, 1  ;;  %v1986_v63 = vrot.slane %v1985_v45, 1  ;;  %vm4604_vm1 = vcmp.eq.s32.totalorder %v4603_v51, 0 }
  0xaa   :  { %v1973_v48 = vadd.f32 %v1972_v56, %v1971_v17  ;;  %v2876_v58 = vsel %vm4604_vm1, 1.0, %v4602_v23  ;;  %v1998_v4 = vrot.slane %v1997_v61, 2  ;;  %v2473_v49 = vsel %vm887_vm9, %v1959_v10, %v1952_v24 }
  0xab   :  { %v1980_v59 = vadd.f32 %v1979_v20, %v1978_v35  ;;  %vm4605_vm2 = vcmp.eq.s32.totalorder %v4603_v51, 1  ;;  %v1987_v34 = vadd.f32 %v1986_v63, %v1985_v45  ;;  %v1993_v5 = vrot.slane %v1992_v26, 1 }
  0xac   :  { %v2877_v32 = vsel %vm4605_vm2, 1.0, %v4602_v23  ;;  %v2474_v36 = vsel %vm889_vm10, %v1966_v57, %v2473_v49  ;;  %vm4606_vm3 = vcmp.eq.s32.totalorder %v4603_v51, 2  ;;  %v1999_v7 = vadd.f32 %v1998_v4, %v1997_v61 }
  0xad   :  { %v2878_v62 = vsel %vm4606_vm3, 1.0, %v4602_v23  ;;  %v2475_v37 = vsel %vm891_vm11, %v1973_v48, %v2474_v36  ;;  %vm4607_vm4 = vcmp.eq.s32.totalorder %v4603_v51, 3  ;;  %vm4608_vm5 = vcmp.eq.s32.totalorder %v4603_v51, 4 }
  0xae   :  { %v2879_v2 = vsel %vm4607_vm4, 1.0, %v4602_v23  ;;  %v2880_v38 = vsel %vm4608_vm5, 1.0, %v4602_v23  ;;  %v1994_v39 = vadd.f32 %v1993_v5, %v1992_v26  ;;  %v2476_v40 = vsel %vm893_vm12, %v1980_v59, %v2475_v37 }
  0xaf   :  { %vm4609_vm6 = vcmp.eq.s32.totalorder %v4603_v51, 5  ;;  %vm4610_vm7 = vcmp.eq.s32.totalorder %v4603_v51, 6  ;;  %v2000_v11 = vrot.slane %v1999_v7, 1  ;;  %v2477_v41 = vsel %vm895_vm13, %v1987_v34, %v2476_v40 }
  0xb0   :  { %v2881_v8 = vsel %vm4609_vm6, 1.0, %v4602_v23  ;;  %v2882_v6 = vsel %vm4610_vm7, 1.0, %v4602_v23  ;;  %vm4611_vm8 = vcmp.eq.s32.totalorder %v4603_v51, 7  ;;  %v1890_v12 = vsel %vm310_vm0, %v2876_v58, 0.0 }
  0xb1   :  { %v2883_v30 = vsel %vm4611_vm8, 1.0, %v4602_v23  ;;  %v2478_v42 = vsel %vm897_vm14, %v1994_v39, %v2477_v41  ;;  %v1891_v53 = vrot.slane %v1890_v12, 4  ;;  %v1897_v43 = vsel %vm310_vm0, %v2877_v32, 0.0 }
  0xb2   :  { %v1904_v44 = vsel %vm310_vm0, %v2878_v62, 0.0  ;;  %v2001_v55 = vadd.f32 %v2000_v11, %v1999_v7  ;;  %v1898_v46 = vrot.slane %v1897_v43, 4  ;;  %v1911_v13 = vsel %vm310_vm0, %v2879_v2, 0.0  ;;  %v4612_v62 = vld [vmem:[#allocation5_spill] sm:$0xff] }
  0xb3   :  { %v1905_v47 = vrot.slane %v1904_v44, 4  ;;  %v1892_v21 = vadd.f32 %v1891_v53, %v1890_v12  ;;  %v1912_v50 = vrot.slane %v1911_v13, 4  ;;  %v1918_v14 = vsel %vm310_vm0, %v2880_v38, 0.0 }
  0xb4   :  { %v1925_v51 = vsel %vm310_vm0, %v2881_v8, 0.0  ;;  %v2479_v60 = vsel %vm899_vm15, %v2001_v55, %v2478_v42  ;;  %v1899_v54 = vadd.f32 %v1898_v46, %v1897_v43  ;;  %v1919_v1 = vrot.slane %v1918_v14, 4 }
  0xb5   :  { %v1906_v22 = vadd.f32 %v1905_v47, %v1904_v44  ;;  %v1893_v27 = vrot.slane %v1892_v21, 2  ;;  %v1913_v0 = vadd.f32 %v1912_v50, %v1911_v13  ;;  %v1926_v9 = vrot.slane %v1925_v51, 4  ;;  %2771 = vadd.xlane.f32.xlu1 %v2479_v60 }
  0xb6   :  { %v1900_v28 = vrot.slane %v1899_v54, 2  ;;  %v1920_v16 = vadd.f32 %v1919_v1, %v1918_v14  ;;  %v1932_v29 = vsel %vm310_vm0, %v2882_v6, 0.0  ;;  %v1939_v52 = vsel %vm310_vm0, %v2883_v30, 0.0 }
  0xb7   :  { %v1907_v15 = vrot.slane %v1906_v22, 2  ;;  %v1894_v31 = vadd.f32 %v1893_v27, %v1892_v21  ;;  %v1914_v17 = vrot.slane %v1913_v0, 2  ;;  %v1927_v18 = vadd.f32 %v1926_v9, %v1925_v51 }
  0xb8   :  { %v1933_v33 = vrot.slane %v1932_v29, 4  ;;  %v1901_v19 = vadd.f32 %v1900_v28, %v1899_v54  ;;  %v1921_v35 = vrot.slane %v1920_v16, 2  ;;  %v1940_v61 = vrot.slane %v1939_v52, 4 }
  0xb9   :  { %v1908_v3 = vadd.f32 %v1907_v15, %v1906_v22  ;;  %v1895_v24 = vrot.slane %v1894_v31, 1  ;;  %v1915_v56 = vadd.f32 %v1914_v17, %v1913_v0  ;;  %v1928_v45 = vrot.slane %v1927_v18, 2 }
  0xba   :  { %v1934_v25 = vadd.f32 %v1933_v33, %v1932_v29  ;;  %v1902_v10 = vrot.slane %v1901_v19, 1  ;;  %v1922_v20 = vadd.f32 %v1921_v35, %v1920_v16  ;;  %v1941_v32 = vadd.f32 %v1940_v61, %v1939_v52 }
  0xbb   :  { %v1909_v57 = vrot.slane %v1908_v3, 1  ;;  %v1896_v48 = vadd.f32 %v1895_v24, %v1894_v31  ;;  %v1916_v63 = vrot.slane %v1915_v56, 1  ;;  %v1929_v26 = vadd.f32 %v1928_v45, %v1927_v18 }
  0xbc   :  { %v1935_v58 = vrot.slane %v1934_v25, 2  ;;  %v1903_v59 = vadd.f32 %v1902_v10, %v1901_v19  ;;  %v1923_v49 = vrot.slane %v1922_v20, 1  ;;  %vm4613_vm1 = vcmp.eq.s32.totalorder %v4612_v62, 8 }
  0xbd   :  { %v1910_v4 = vadd.f32 %v1909_v57, %v1908_v3  ;;  %v1917_v34 = vadd.f32 %v1916_v63, %v1915_v56  ;;  %v1930_v5 = vrot.slane %v1929_v26, 1  ;;  %v2920_v7 = vsel %vm4613_vm1, 1.0, %v4602_v23 }
  0xbe   :  { %v1936_v36 = vadd.f32 %v1935_v58, %v1934_v25  ;;  %v1924_v37 = vadd.f32 %v1923_v49, %v1922_v20  ;;  %v1942_v2 = vrot.slane %v1941_v32, 2  ;;  %v2466_v38 = vsel %vm887_vm9, %v1903_v59, %v1896_v48 }
  0xbf   :  { %vm4614_vm2 = vcmp.eq.s32.totalorder %v4612_v62, 9  ;;  %v1931_v40 = vadd.f32 %v1930_v5, %v1929_v26  ;;  %v2467_v6 = vsel %vm889_vm10, %v1910_v4, %v2466_v38  ;;  %vm4615_vm3 = vcmp.eq.s32.totalorder %v4612_v62, 10 }
  0xc0   :  { %v2921_v39 = vsel %vm4614_vm2, 1.0, %v4602_v23  ;;  %v1937_v8 = vrot.slane %v1936_v36, 1  ;;  %v2922_v11 = vsel %vm4615_vm3, 1.0, %v4602_v23  ;;  %v1943_v41 = vadd.f32 %v1942_v2, %v1941_v32 }
  0xc1   :  { %v2468_v30 = vsel %vm891_vm11, %v1917_v34, %v2467_v6  ;;  %vm4616_vm4 = vcmp.eq.s32.totalorder %v4612_v62, 11  ;;  %vm4617_vm5 = vcmp.eq.s32.totalorder %v4612_v62, 12  ;;  %vm4618_vm6 = vcmp.eq.s32.totalorder %v4612_v62, 13 }
  0xc2   :  { %v2923_v12 = vsel %vm4616_vm4, 1.0, %v4602_v23  ;;  %v2924_v42 = vsel %vm4617_vm5, 1.0, %v4602_v23  ;;  %v1938_v53 = vadd.f32 %v1937_v8, %v1936_v36  ;;  %v2469_v43 = vsel %vm893_vm12, %v1924_v37, %v2468_v30 }
  0xc3   :  { %v2925_v44 = vsel %vm4618_vm6, 1.0, %v4602_v23  ;;  %vm4619_vm7 = vcmp.eq.s32.totalorder %v4612_v62, 14  ;;  %v1944_v46 = vrot.slane %v1943_v41, 1  ;;  %v2470_v47 = vsel %vm895_vm13, %v1931_v40, %v2469_v43 }
  0xc4   :  { %v2926_v55 = vsel %vm4619_vm7, 1.0, %v4602_v23  ;;  %vm4620_vm8 = vcmp.eq.s32.totalorder %v4612_v62, 15  ;;  %v2198_v21 = vsel %vm310_vm0, %v2920_v7, 0.0  ;;  %v2471_v50 = vsel %vm897_vm14, %v1938_v53, %v2470_v47 }
  0xc5   :  { %v2927_v13 = vsel %vm4620_vm8, 1.0, %v4602_v23  ;;  %v2199_v14 = vrot.slane %v2198_v21, 4  ;;  %v2205_v51 = vsel %vm310_vm0, %v2921_v39, 0.0  ;;  %v2212_v60 = vsel %vm310_vm0, %v2922_v11, 0.0 }
  0xc6   :  { %v1945_v54 = vadd.f32 %v1944_v46, %v1943_v41  ;;  %v2206_v22 = vrot.slane %v2205_v51, 4  ;;  %v2213_v1 = vrot.slane %v2212_v60, 4  ;;  %v2219_v27 = vsel %vm310_vm0, %v2923_v12, 0.0 }
  0xc7   :  { %v2200_v0 = vadd.f32 %v2199_v14, %v2198_v21  ;;  %v2220_v9 = vrot.slane %v2219_v27, 4  ;;  %v2226_v28 = vsel %vm310_vm0, %v2924_v42, 0.0  ;;  %v2233_v15 = vsel %vm310_vm0, %v2925_v44, 0.0 }
  0xc8   :  { %v2472_v16 = vsel %vm899_vm15, %v1945_v54, %v2471_v50  ;;  %v2207_v29 = vadd.f32 %v2206_v22, %v2205_v51  ;;  %v2214_v31 = vadd.f32 %v2213_v1, %v2212_v60  ;;  %v2227_v17 = vrot.slane %v2226_v28, 4 }
  0xc9   :  { %v2201_v18 = vrot.slane %v2200_v0, 2  ;;  %v2221_v33 = vadd.f32 %v2220_v9, %v2219_v27  ;;  %v2234_v19 = vrot.slane %v2233_v15, 4  ;;  %v2240_v24 = vsel %vm310_vm0, %v2926_v55, 0.0  ;;  %2769 = vadd.xlane.f32.xlu0 %v2472_v16 }
  0xca   :  { %v2208_v3 = vrot.slane %v2207_v29, 2  ;;  %v2215_v35 = vrot.slane %v2214_v31, 2  ;;  %v2228_v52 = vadd.f32 %v2227_v17, %v2226_v28  ;;  %v2241_v10 = vrot.slane %v2240_v24, 4 }
  0xcb   :  { %v2202_v56 = vadd.f32 %v2201_v18, %v2200_v0  ;;  %v2222_v45 = vrot.slane %v2221_v33, 2  ;;  %v2235_v25 = vadd.f32 %v2234_v19, %v2233_v15  ;;  %v2247_v48 = vsel %vm310_vm0, %v2927_v13, 0.0 }
  0xcc   :  { %v2209_v57 = vadd.f32 %v2208_v3, %v2207_v29  ;;  %v2216_v20 = vadd.f32 %v2215_v35, %v2214_v31  ;;  %v2229_v61 = vrot.slane %v2228_v52, 2  ;;  %v2242_v59 = vadd.f32 %v2241_v10, %v2240_v24 }
  0xcd   :  { %v2203_v63 = vrot.slane %v2202_v56, 1  ;;  %v2223_v26 = vadd.f32 %v2222_v45, %v2221_v33  ;;  %v2236_v58 = vrot.slane %v2235_v25, 2  ;;  %v2248_v34 = vrot.slane %v2247_v48, 4 }
  0xce   :  { %v2210_v4 = vrot.slane %v2209_v57, 1  ;;  %v2217_v49 = vrot.slane %v2216_v20, 1  ;;  %v2230_v32 = vadd.f32 %v2229_v61, %v2228_v52  ;;  %v2243_v37 = vrot.slane %v2242_v59, 2 }
  0xcf   :  { %v2204_v5 = vadd.f32 %v2203_v63, %v2202_v56  ;;  %v2224_v36 = vrot.slane %v2223_v26, 1  ;;  %v2237_v7 = vadd.f32 %v2236_v58, %v2235_v25  ;;  %v2249_v40 = vadd.f32 %v2248_v34, %v2247_v48 }
  0xd0   :  { %v2211_v2 = vadd.f32 %v2210_v4, %v2209_v57  ;;  %v2218_v38 = vadd.f32 %v2217_v49, %v2216_v20  ;;  %v2231_v39 = vrot.slane %v2230_v32, 1  ;;  %v2244_v11 = vadd.f32 %v2243_v37, %v2242_v59 }
  0xd1   :  { %v2225_v8 = vadd.f32 %v2224_v36, %v2223_v26  ;;  %v2238_v6 = vrot.slane %v2237_v7, 1  ;;  %vm4621_vm1 = vcmp.eq.s32.totalorder %v4612_v62, 0  ;;  %v2250_v12 = vrot.slane %v2249_v40, 2 }
  0xd2   :  { %v2912_v41 = vsel %vm4621_vm1, 1.0, %v4602_v23  ;;  %v2232_v30 = vadd.f32 %v2231_v39, %v2230_v32  ;;  %v2504_v42 = vsel %vm887_vm9, %v2211_v2, %v2204_v5  ;;  %vm4622_vm2 = vcmp.eq.s32.totalorder %v4612_v62, 1 }
  0xd3   :  { %v2913_v53 = vsel %vm4622_vm2, 1.0, %v4602_v23  ;;  %v2239_v43 = vadd.f32 %v2238_v6, %v2237_v7  ;;  %v2245_v44 = vrot.slane %v2244_v11, 1  ;;  %v2505_v55 = vsel %vm889_vm10, %v2218_v38, %v2504_v42 }
  0xd4   :  { %vm4623_vm3 = vcmp.eq.s32.totalorder %v4612_v62, 2  ;;  %v2251_v47 = vadd.f32 %v2250_v12, %v2249_v40  ;;  %v2506_v13 = vsel %vm891_vm11, %v2225_v8, %v2505_v55  ;;  %vm4624_vm4 = vcmp.eq.s32.totalorder %v4612_v62, 3 }
  0xd5   :  { %v2914_v46 = vsel %vm4623_vm3, 1.0, %v4602_v23  ;;  %v2915_v21 = vsel %vm4624_vm4, 1.0, %v4602_v23  ;;  %vm4625_vm5 = vcmp.eq.s32.totalorder %v4612_v62, 4  ;;  %v2246_v14 = vadd.f32 %v2245_v44, %v2244_v11 }
  0xd6   :  { %v2916_v50 = vsel %vm4625_vm5, 1.0, %v4602_v23  ;;  %v2507_v51 = vsel %vm893_vm12, %v2232_v30, %v2506_v13  ;;  %vm4626_vm6 = vcmp.eq.s32.totalorder %v4612_v62, 5  ;;  %vm4627_vm7 = vcmp.eq.s32.totalorder %v4612_v62, 6 }
  0xd7   :  { %v2917_v60 = vsel %vm4626_vm6, 1.0, %v4602_v23  ;;  %v2918_v54 = vsel %vm4627_vm7, 1.0, %v4602_v23  ;;  %v2252_v22 = vrot.slane %v2251_v47, 1  ;;  %v2508_v1 = vsel %vm895_vm13, %v2239_v43, %v2507_v51 }
  0xd8   :  { %vm4628_vm8 = vcmp.eq.s32.totalorder %v4612_v62, 7  ;;  %v2142_v0 = vsel %vm310_vm0, %v2912_v41, 0.0  ;;  %v2509_v9 = vsel %vm897_vm14, %v2246_v14, %v2508_v1  ;;  %v2149_v15 = vsel %vm310_vm0, %v2913_v53, 0.0 }
  0xd9   :  { %v2919_v27 = vsel %vm4628_vm8, 1.0, %v4602_v23  ;;  %v2143_v28 = vrot.slane %v2142_v0, 4  ;;  %v2156_v16 = vsel %vm310_vm0, %v2914_v46, 0.0  ;;  %v2253_v29 = vadd.f32 %v2252_v22, %v2251_v47  ;;  %v3605_v46 = vld [vmem:[%s4542_s1 + $0x2] sm:$0x3] }
  0xda   :  { %v2150_v31 = vrot.slane %v2149_v15, 4  ;;  %v2157_v17 = vrot.slane %v2156_v16, 4  ;;  %v2163_v18 = vsel %vm310_vm0, %v2915_v21, 0.0  ;;  %v2170_v3 = vsel %vm310_vm0, %v2916_v50, 0.0  ;;  %v3612_v50 = vld [vmem:[%s4541_s0 + $0x68] sm:$0x3] }
  0xdb   :  { %v2144_v33 = vadd.f32 %v2143_v28, %v2142_v0  ;;  %v2164_v19 = vrot.slane %v2163_v18, 4  ;;  %v2177_v62 = vsel %vm310_vm0, %v2917_v60, 0.0  ;;  %v2510_v35 = vsel %vm899_vm15, %v2253_v29, %v2509_v9  ;;  %v3624_v22 = vld [vmem:[%s4541_s0 + $0x6c] sm:$0x3]  ;;  %v3631_v0 = vld [vmem:[%s4541_s0 + $0x6e] sm:$0x3] }
  0xdc   :  { %v2151_v52 = vadd.f32 %v2150_v31, %v2149_v15  ;;  %v2158_v24 = vadd.f32 %v2157_v17, %v2156_v16  ;;  %v2171_v56 = vrot.slane %v2170_v3, 4  ;;  %v2178_v10 = vrot.slane %v2177_v62, 4  ;;  %2782 = vadd.xlane.f32.xlu1 %v2510_v35  ;;  %v3636_v9 = vld [vmem:[%s4541_s0 + $0x70] sm:$0x3]  ;;  %v3644_v16 = vld [vmem:[%s4541_s0 + $0x72] sm:$0x3] }
  0xdd   :  { %v2145_v45 = vrot.slane %v2144_v33, 2  ;;  %v2165_v25 = vadd.f32 %v2164_v19, %v2163_v18  ;;  %v2184_v48 = vsel %vm310_vm0, %v2918_v54, 0.0  ;;  %v2191_v34 = vsel %vm310_vm0, %v2919_v27, 0.0  ;;  %v3619_v54 = vld [vmem:[%s4541_s0 + $0x6a] sm:$0x3] }
  0xde   :  { %v2152_v57 = vrot.slane %v2151_v52, 2  ;;  %v2159_v20 = vrot.slane %v2158_v24, 2  ;;  %v2172_v61 = vadd.f32 %v2171_v56, %v2170_v3  ;;  %v2179_v58 = vadd.f32 %v2178_v10, %v2177_v62  ;;  %v3649_v29 = vld [vmem:[%s4541_s0 + $0x74] sm:$0x3]  ;;  %v3657_v18 = vld [vmem:[%s4541_s0 + $0x76] sm:$0x3] }
  0xdf   :  { %v2146_v63 = vadd.f32 %v2145_v45, %v2144_v33  ;;  %v2166_v26 = vrot.slane %v2165_v25, 2  ;;  %v2185_v59 = vrot.slane %v2184_v48, 4  ;;  %v2192_v40 = vrot.slane %v2191_v34, 4 }
  0xe0   :  { %v2153_v4 = vadd.f32 %v2152_v57, %v2151_v52  ;;  %v2160_v49 = vadd.f32 %v2159_v20, %v2158_v24  ;;  %v2173_v32 = vrot.slane %v2172_v61, 2  ;;  %v2180_v7 = vrot.slane %v2179_v58, 2 }
  0xe1   :  { %v2147_v5 = vrot.slane %v2146_v63, 1  ;;  %v2167_v36 = vadd.f32 %v2166_v26, %v2165_v25  ;;  %v2186_v37 = vadd.f32 %v2185_v59, %v2184_v48  ;;  %v2193_v53 = vadd.f32 %v2192_v40, %v2191_v34 }
  0xe2   :  { %v2154_v2 = vrot.slane %v2153_v4, 1  ;;  %v2161_v38 = vrot.slane %v2160_v49, 1  ;;  %v2174_v39 = vadd.f32 %v2173_v32, %v2172_v61  ;;  %v2181_v11 = vadd.f32 %v2180_v7, %v2179_v58 }
  0xe3   :  { %v2148_v8 = vadd.f32 %v2147_v5, %v2146_v63  ;;  %v2168_v6 = vrot.slane %v2167_v36, 1  ;;  %v2187_v41 = vrot.slane %v2186_v37, 2  ;;  %vm4583_vm1 = vcmp.eq.s32.totalorder %v3605_v46, 16 }
  0xe4   :  { %v2155_v30 = vadd.f32 %v2154_v2, %v2153_v4  ;;  %v2162_v12 = vadd.f32 %v2161_v38, %v2160_v49  ;;  %v2175_v42 = vrot.slane %v2174_v39, 1  ;;  %v2182_v44 = vrot.slane %v2181_v11, 1 }
  0xe5   :  { %v2169_v43 = vadd.f32 %v2168_v6, %v2167_v36  ;;  %v2188_v55 = vadd.f32 %v2187_v41, %v2186_v37  ;;  %v2194_v13 = vrot.slane %v2193_v53, 2  ;;  %vm4582_vm2 = vcmp.eq.s32.totalorder %v3605_v46, 17 }
  0xe6   :  { %v2176_v47 = vadd.f32 %v2175_v42, %v2174_v39  ;;  %v2497_v21 = vsel %vm887_vm9, %v2155_v30, %v2148_v8  ;;  %v2183_v14 = vadd.f32 %v2182_v44, %v2181_v11  ;;  %vm4581_vm3 = vcmp.eq.s32.totalorder %v3605_v46, 18 }
  0xe7   :  { %v2189_v51 = vrot.slane %v2188_v55, 1  ;;  %v2498_v60 = vsel %vm889_vm10, %v2162_v12, %v2497_v21  ;;  %v2195_v1 = vadd.f32 %v2194_v13, %v2193_v53  ;;  %vm4580_vm4 = vcmp.eq.s32.totalorder %v3605_v46, 19 }
  0xe8   :  { %v2499_v27 = vsel %vm891_vm11, %v2169_v43, %v2498_v60  ;;  %vm4579_vm5 = vcmp.eq.s32.totalorder %v3605_v46, 20  ;;  %vm4578_vm6 = vcmp.eq.s32.totalorder %v3605_v46, 21  ;;  %vm4577_vm7 = vcmp.eq.s32.totalorder %v3605_v46, 22 }
  0xe9   :  { %v2190_v28 = vadd.f32 %v2189_v51, %v2188_v55  ;;  %v2500_v15 = vsel %vm893_vm12, %v2176_v47, %v2499_v27  ;;  %v2196_v31 = vrot.slane %v2195_v1, 1  ;;  %vm4576_vm8 = vcmp.eq.s32.totalorder %v3605_v46, 23 }
  0xea   :  { %v2501_v17 = vsel %vm895_vm13, %v2183_v14, %v2500_v15  ;;  %v290_v33 = vsel %vm4583_vm1, %v3612_v50, 0.0  ;;  %v291_v3 = vsel %vm4582_vm2, %v3619_v54, 0.0  ;;  %v292_v62 = vsel %vm4581_vm3, %v3624_v22, 0.0 }
  0xeb   :  { %v2502_v19 = vsel %vm897_vm14, %v2190_v28, %v2501_v17  ;;  %v293_v35 = vsel %vm4580_vm4, %v3631_v0, 0.0  ;;  %v2197_v52 = vadd.f32 %v2196_v31, %v2195_v1  ;;  %v294_v24 = vsel %vm4579_vm5, %v3636_v9, 0.0 }
  0xec   :  { %v295_v56 = vsel %vm4578_vm6, %v3644_v16, 0.0  ;;  %v296_v45 = vsel %vm4577_vm7, %v3649_v29, 0.0  ;;  %v297_v25 = vsel %vm4576_vm8, %v3657_v18, 0.0  ;;  %v675_v10 = vsel %vm310_vm0, %v290_v33, 0.0 }
  0xed   :  { %v682_v57 = vsel %vm310_vm0, %v291_v3, 0.0  ;;  %v689_v20 = vsel %vm310_vm0, %v292_v62, 0.0  ;;  %v2503_v61 = vsel %vm899_vm15, %v2197_v52, %v2502_v19  ;;  %v676_v48 = vrot.slane %v675_v10, 4 }
  0xee   :  { %v683_v63 = vrot.slane %v682_v57, 4  ;;  %v690_v26 = vrot.slane %v689_v20, 4  ;;  %v696_v58 = vsel %vm310_vm0, %v293_v35, 0.0  ;;  %v703_v59 = vsel %vm310_vm0, %v294_v24, 0.0  ;;  %2780 = vadd.xlane.f32.xlu0 %v2503_v61 }
  0xef   :  { %v710_v4 = vsel %vm310_vm0, %v295_v56, 0.0  ;;  %v677_v49 = vadd.f32 %v676_v48, %v675_v10  ;;  %v697_v5 = vrot.slane %v696_v58, 4  ;;  %v704_v36 = vrot.slane %v703_v59, 4  ;;  %v3708_v10 = vld [vmem:[%s4542_s1] sm:$0x3] }
  0xf0   :  { %v684_v32 = vadd.f32 %v683_v63, %v682_v57  ;;  %v691_v34 = vadd.f32 %v690_v26, %v689_v20  ;;  %v711_v7 = vrot.slane %v710_v4, 4  ;;  %v717_v37 = vsel %vm310_vm0, %v296_v45, 0.0  ;;  %v3698_v45 = vld [vmem:[%s4541_s0 + $0x20] sm:$0x3]  ;;  %v3715_v63 = vld [vmem:[%s4541_s0 + $0x24] sm:$0x3] }
  0xf1   :  { %v724_v2 = vsel %vm310_vm0, %v297_v25, 0.0  ;;  %v678_v38 = vrot.slane %v677_v49, 2  ;;  %v698_v8 = vadd.f32 %v697_v5, %v696_v58  ;;  %v705_v6 = vadd.f32 %v704_v36, %v703_v59  ;;  %v3703_v25 = vld [vmem:[%s4541_s0 + $0x22] sm:$0x3]  ;;  %v3720_v26 = vld [vmem:[%s4541_s0 + $0x26] sm:$0x3] }
  0xf2   :  { %v685_v39 = vrot.slane %v684_v32, 2  ;;  %v692_v40 = vrot.slane %v691_v34, 2  ;;  %v712_v11 = vadd.f32 %v711_v7, %v710_v4  ;;  %v718_v41 = vrot.slane %v717_v37, 4  ;;  %v3726_v59 = vld [vmem:[%s4541_s0 + $0x28] sm:$0x3] }
  0xf3   :  { %v725_v30 = vrot.slane %v724_v2, 4  ;;  %v679_v12 = vadd.f32 %v678_v38, %v677_v49  ;;  %v699_v43 = vrot.slane %v698_v8, 2  ;;  %v706_v44 = vrot.slane %v705_v6, 2  ;;  %v3740_v5 = vld [vmem:[%s4541_s0 + $0x2c] sm:$0x3] }
  0xf4   :  { %v686_v42 = vadd.f32 %v685_v39, %v684_v32  ;;  %v693_v53 = vadd.f32 %v692_v40, %v691_v34  ;;  %v713_v55 = vrot.slane %v712_v11, 2  ;;  %v719_v47 = vadd.f32 %v718_v41, %v717_v37  ;;  %v3735_v34 = vld [vmem:[%s4541_s0 + $0x2a] sm:$0x3]  ;;  %v3747_v7 = vld [vmem:[%s4541_s0 + $0x2e] sm:$0x3] }
  0xf5   :  { %v726_v13 = vadd.f32 %v725_v30, %v724_v2  ;;  %v680_v21 = vrot.slane %v679_v12, 1  ;;  %v700_v60 = vadd.f32 %v699_v43, %v698_v8  ;;  %v707_v1 = vadd.f32 %v706_v44, %v705_v6 }
  0xf6   :  { %v687_v14 = vrot.slane %v686_v42, 1  ;;  %v694_v51 = vrot.slane %v693_v53, 1  ;;  %v714_v27 = vadd.f32 %v713_v55, %v712_v11  ;;  %v720_v28 = vrot.slane %v719_v47, 2 }
  0xf7   :  { %v727_v15 = vrot.slane %v726_v13, 2  ;;  %v681_v31 = vadd.f32 %v680_v21, %v679_v12  ;;  %v701_v19 = vrot.slane %v700_v60, 1  ;;  %v708_v3 = vrot.slane %v707_v1, 1 }
  0xf8   :  { %v688_v17 = vadd.f32 %v687_v14, %v686_v42  ;;  %v695_v33 = vadd.f32 %v694_v51, %v693_v53  ;;  %v715_v62 = vrot.slane %v714_v27, 1  ;;  %v721_v35 = vadd.f32 %v720_v28, %v719_v47 }
  0xf9   :  { %v728_v52 = vadd.f32 %v727_v15, %v726_v13  ;;  %v702_v24 = vadd.f32 %v701_v19, %v700_v60  ;;  %vm172_vm8 = vcmp.eq.s32.totalorder %v3708_v10, 16  ;;  %vm173_vm7 = vcmp.eq.s32.totalorder %v3708_v10, 17 }
  0xfa   :  { %v939_v56 = vsel %vm887_vm9, %v688_v17, %v681_v31  ;;  %v709_v57 = vadd.f32 %v708_v3, %v707_v1  ;;  %v716_v20 = vadd.f32 %v715_v62, %v714_v27  ;;  %v722_v61 = vrot.slane %v721_v35, 1 }
  0xfb   :  { %v729_v48 = vrot.slane %v728_v52, 1  ;;  %v940_v58 = vsel %vm889_vm10, %v695_v33, %v939_v56  ;;  %vm174_vm6 = vcmp.eq.s32.totalorder %v3708_v10, 18  ;;  %vm175_vm5 = vcmp.eq.s32.totalorder %v3708_v10, 19 }
  0xfc   :  { %vm4587_vm4 = vcmp.eq.s32.totalorder %v3708_v10, 20  ;;  %v723_v4 = vadd.f32 %v722_v61, %v721_v35  ;;  %v941_v32 = vsel %vm891_vm11, %v702_v24, %v940_v58  ;;  %vm4586_vm3 = vcmp.eq.s32.totalorder %v3708_v10, 21 }
  0xfd   :  { %v730_v49 = vadd.f32 %v729_v48, %v728_v52  ;;  %v942_v36 = vsel %vm893_vm12, %v709_v57, %v941_v32  ;;  %vm4585_vm2 = vcmp.eq.s32.totalorder %v3708_v10, 22  ;;  %vm4584_vm1 = vcmp.eq.s32.totalorder %v3708_v10, 23 }
  0xfe   :  { %v254_v37 = vsel %vm172_vm8, %v3698_v45, 0.0  ;;  %v943_v2 = vsel %vm895_vm13, %v716_v20, %v942_v36  ;;  %v255_v38 = vsel %vm173_vm7, %v3703_v25, 0.0  ;;  %v256_v39 = vsel %vm174_vm6, %v3715_v63, 0.0 }
  0xff   :  { %v257_v40 = vsel %vm175_vm5, %v3720_v26, 0.0  ;;  %v944_v8 = vsel %vm897_vm14, %v723_v4, %v943_v2  ;;  %v258_v6 = vsel %vm4587_vm4, %v3726_v59, 0.0  ;;  %v259_v11 = vsel %vm4586_vm3, %v3735_v34, 0.0 }
 0x100   :  { %v260_v41 = vsel %vm4585_vm2, %v3740_v5, 0.0  ;;  %v945_v30 = vsel %vm899_vm15, %v730_v49, %v944_v8  ;;  %v261_v12 = vsel %vm4584_vm1, %v3747_v7, 0.0  ;;  %v423_v42 = vsel %vm310_vm0, %v254_v37, 0.0 }
 0x101   :  { %v430_v53 = vsel %vm310_vm0, %v255_v38, 0.0  ;;  %v424_v43 = vrot.slane %v423_v42, 4  ;;  %v437_v55 = vsel %vm310_vm0, %v256_v39, 0.0  ;;  %v444_v13 = vsel %vm310_vm0, %v257_v40, 0.0  ;;  %2587 = vadd.xlane.f32.xlu1 %v945_v30 }
 0x102   :  { %v431_v44 = vrot.slane %v430_v53, 4  ;;  %v438_v47 = vrot.slane %v437_v55, 4  ;;  %v451_v21 = vsel %vm310_vm0, %v258_v6, 0.0  ;;  %v458_v14 = vsel %vm310_vm0, %v259_v11, 0.0 }
 0x103   :  { %v425_v51 = vadd.f32 %v424_v43, %v423_v42  ;;  %v445_v1 = vrot.slane %v444_v13, 4  ;;  %v452_v27 = vrot.slane %v451_v21, 4  ;;  %v459_v15 = vrot.slane %v458_v14, 4 }
 0x104   :  { %v432_v60 = vadd.f32 %v431_v44, %v430_v53  ;;  %v439_v28 = vadd.f32 %v438_v47, %v437_v55  ;;  %v465_v31 = vsel %vm310_vm0, %v260_v41, 0.0  ;;  %v472_v17 = vsel %vm310_vm0, %v261_v12, 0.0 }
 0x105   :  { %v426_v33 = vrot.slane %v425_v51, 2  ;;  %v446_v3 = vadd.f32 %v445_v1, %v444_v13  ;;  %v453_v62 = vadd.f32 %v452_v27, %v451_v21  ;;  %v460_v52 = vadd.f32 %v459_v15, %v458_v14 }
 0x106   :  { %v433_v19 = vrot.slane %v432_v60, 2  ;;  %v440_v35 = vrot.slane %v439_v28, 2  ;;  %v466_v24 = vrot.slane %v465_v31, 4  ;;  %v473_v56 = vrot.slane %v472_v17, 4 }
 0x107   :  { %v427_v57 = vadd.f32 %v426_v33, %v425_v51  ;;  %v447_v61 = vrot.slane %v446_v3, 2  ;;  %v454_v48 = vrot.slane %v453_v62, 2  ;;  %v461_v4 = vrot.slane %v460_v52, 2 }
 0x108   :  { %v434_v20 = vadd.f32 %v433_v19, %v432_v60  ;;  %v441_v58 = vadd.f32 %v440_v35, %v439_v28  ;;  %v467_v49 = vadd.f32 %v466_v24, %v465_v31  ;;  %v474_v32 = vadd.f32 %v473_v56, %v472_v17 }
 0x109   :  { %v428_v36 = vrot.slane %v427_v57, 1  ;;  %v448_v2 = vadd.f32 %v447_v61, %v446_v3  ;;  %v455_v38 = vadd.f32 %v454_v48, %v453_v62  ;;  %v462_v40 = vadd.f32 %v461_v4, %v460_v52 }
 0x10a   :  { %v435_v37 = vrot.slane %v434_v20, 1  ;;  %v442_v39 = vrot.slane %v441_v58, 1  ;;  %v468_v8 = vrot.slane %v467_v49, 2  ;;  %v475_v6 = vrot.slane %v474_v32, 2 }
 0x10b   :  { %v429_v11 = vadd.f32 %v428_v36, %v427_v57  ;;  %v449_v30 = vrot.slane %v448_v2, 1  ;;  %v456_v12 = vrot.slane %v455_v38, 1  ;;  %v463_v53 = vrot.slane %v462_v40, 1 }
 0x10c   :  { %v436_v41 = vadd.f32 %v435_v37, %v434_v20  ;;  %v443_v42 = vadd.f32 %v442_v39, %v441_v58  ;;  %v469_v43 = vadd.f32 %v468_v8, %v467_v49  ;;  %v476_v44 = vadd.f32 %v475_v6, %v474_v32 }
 0x10d   :  { %v450_v55 = vadd.f32 %v449_v30, %v448_v2  ;;  %v457_v47 = vadd.f32 %v456_v12, %v455_v38  ;;  %v1048_v21 = vmul.f32 %v3612_v50, %v3612_v50  ;;  %v464_v14 = vadd.f32 %v463_v53, %v462_v40 }
 0x10e   :  { %v908_v13 = vsel %vm887_vm9, %v436_v41, %v429_v11  ;;  %v470_v51 = vrot.slane %v469_v43, 1  ;;  %v477_v60 = vrot.slane %v476_v44, 1  ;;  %v1049_v28 = vmul.f32 %v3619_v54, %v3619_v54 }
 0x10f   :  { %v909_v1 = vsel %vm889_vm10, %v443_v42, %v908_v13  ;;  %v1050_v15 = vmul.f32 %v3624_v22, %v3624_v22  ;;  %v1051_v31 = vmul.f32 %v3631_v0, %v3631_v0  ;;  %v1052_v19 = vmul.f32 %v3636_v9, %v3636_v9 }
 0x110   :  { %v910_v27 = vsel %vm891_vm11, %v450_v55, %v909_v1  ;;  %v471_v17 = vadd.f32 %v470_v51, %v469_v43  ;;  %v478_v33 = vadd.f32 %v477_v60, %v476_v44  ;;  %v1053_v62 = vmul.f32 %v3644_v16, %v3644_v16 }
 0x111   :  { %v911_v50 = vsel %vm893_vm12, %v457_v47, %v910_v27  ;;  %v1054_v54 = vmul.f32 %v3649_v29, %v3649_v29  ;;  %v1055_v22 = vmul.f32 %v3657_v18, %v3657_v18  ;;  %v1432_v35 = vsel %vm310_vm0, %v1048_v21, 0.0 }
 0x112   :  { %v912_v3 = vsel %vm895_vm13, %v464_v14, %v911_v50  ;;  %v1439_v52 = vsel %vm310_vm0, %v1049_v28, 0.0  ;;  %v1446_v24 = vsel %vm310_vm0, %v1050_v15, 0.0  ;;  %v1433_v56 = vrot.slane %v1432_v35, 4 }
 0x113   :  { %v913_v0 = vsel %vm897_vm14, %v471_v17, %v912_v3  ;;  %v1440_v57 = vrot.slane %v1439_v52, 4  ;;  %v1447_v20 = vrot.slane %v1446_v24, 4  ;;  %v1453_v16 = vsel %vm310_vm0, %v1051_v31, 0.0 }
 0x114   :  { %v914_v9 = vsel %vm899_vm15, %v478_v33, %v913_v0  ;;  %v1460_v29 = vsel %vm310_vm0, %v1052_v19, 0.0  ;;  %v1467_v61 = vsel %vm310_vm0, %v1053_v62, 0.0  ;;  %v1434_v18 = vadd.f32 %v1433_v56, %v1432_v35 }
 0x115   :  { %v1441_v48 = vadd.f32 %v1440_v57, %v1439_v52  ;;  %v1448_v58 = vadd.f32 %v1447_v20, %v1446_v24  ;;  %v1454_v4 = vrot.slane %v1453_v16, 4  ;;  %2575 = vadd.xlane.f32.xlu0 %v914_v9  ;;  %v1461_v49 = vrot.slane %v1460_v29, 4 }
 0x116   :  { %v1468_v32 = vrot.slane %v1467_v61, 4  ;;  %v1474_v36 = vsel %vm310_vm0, %v1054_v54, 0.0  ;;  %v1481_v37 = vsel %vm310_vm0, %v1055_v22, 0.0  ;;  %v1435_v2 = vrot.slane %v1434_v18, 2 }
 0x117   :  { %v1442_v38 = vrot.slane %v1441_v48, 2  ;;  %v1449_v39 = vrot.slane %v1448_v58, 2  ;;  %v1455_v40 = vadd.f32 %v1454_v4, %v1453_v16  ;;  %v1462_v8 = vadd.f32 %v1461_v49, %v1460_v29 }
 0x118   :  { %v1469_v6 = vadd.f32 %v1468_v32, %v1467_v61  ;;  %v1475_v11 = vrot.slane %v1474_v36, 4  ;;  %v1482_v41 = vrot.slane %v1481_v37, 4  ;;  %v1436_v30 = vadd.f32 %v1435_v2, %v1434_v18 }
 0x119   :  { %v1443_v12 = vadd.f32 %v1442_v38, %v1441_v48  ;;  %v1450_v42 = vadd.f32 %v1449_v39, %v1448_v58  ;;  %v1456_v53 = vrot.slane %v1455_v40, 2  ;;  %v1463_v43 = vrot.slane %v1462_v8, 2 }
 0x11a   :  { %v1470_v44 = vrot.slane %v1469_v6, 2  ;;  %v1476_v55 = vadd.f32 %v1475_v11, %v1474_v36  ;;  %v1483_v47 = vadd.f32 %v1482_v41, %v1481_v37  ;;  %v1437_v13 = vrot.slane %v1436_v30, 1 }
 0x11b   :  { %v1444_v21 = vrot.slane %v1443_v12, 1  ;;  %v1451_v14 = vrot.slane %v1450_v42, 1  ;;  %v1457_v51 = vadd.f32 %v1456_v53, %v1455_v40  ;;  %v1464_v60 = vadd.f32 %v1463_v43, %v1462_v8 }
 0x11c   :  { %v1471_v1 = vadd.f32 %v1470_v44, %v1469_v6  ;;  %v1477_v27 = vrot.slane %v1476_v55, 2  ;;  %v1484_v28 = vrot.slane %v1483_v47, 2  ;;  %v1438_v15 = vadd.f32 %v1437_v13, %v1436_v30 }
 0x11d   :  { %v1445_v31 = vadd.f32 %v1444_v21, %v1443_v12  ;;  %v1452_v17 = vadd.f32 %v1451_v14, %v1450_v42  ;;  %v1458_v33 = vrot.slane %v1457_v51, 1  ;;  %v1465_v50 = vrot.slane %v1464_v60, 1 }
 0x11e   :  { %v1472_v19 = vrot.slane %v1471_v1, 1  ;;  %v1478_v3 = vadd.f32 %v1477_v27, %v1476_v55  ;;  %v1485_v62 = vadd.f32 %v1484_v28, %v1483_v47  ;;  %v1012_v0 = vmul.f32 %v3698_v45, %v3698_v45 }
 0x11f   :  { %v1459_v54 = vadd.f32 %v1458_v33, %v1457_v51  ;;  %v1689_v22 = vsel %vm887_vm9, %v1445_v31, %v1438_v15  ;;  %v1013_v35 = vmul.f32 %v3703_v25, %v3703_v25  ;;  %v1466_v52 = vadd.f32 %v1465_v50, %v1464_v60 }
 0x120   :  { %v1473_v24 = vadd.f32 %v1472_v19, %v1471_v1  ;;  %v1479_v9 = vrot.slane %v1478_v3, 1  ;;  %v1486_v56 = vrot.slane %v1485_v62, 1  ;;  %v1690_v57 = vsel %vm889_vm10, %v1452_v17, %v1689_v22 }
 0x121   :  { %v1014_v20 = vmul.f32 %v3715_v63, %v3715_v63  ;;  %v1015_v16 = vmul.f32 %v3720_v26, %v3720_v26  ;;  %v1016_v29 = vmul.f32 %v3726_v59, %v3726_v59  ;;  %v1691_v18 = vsel %vm891_vm11, %v1459_v54, %v1690_v57 }
 0x122   :  { %v1480_v61 = vadd.f32 %v1479_v9, %v1478_v3  ;;  %v1487_v45 = vadd.f32 %v1486_v56, %v1485_v62  ;;  %v1017_v25 = vmul.f32 %v3735_v34, %v3735_v34  ;;  %v1692_v48 = vsel %vm893_vm12, %v1466_v52, %v1691_v18 }
 0x123   :  { %v1018_v58 = vmul.f32 %v3740_v5, %v3740_v5  ;;  %v1019_v63 = vmul.f32 %v3747_v7, %v3747_v7  ;;  %v1180_v26 = vsel %vm310_vm0, %v1012_v0, 0.0  ;;  %v1693_v4 = vsel %vm895_vm13, %v1473_v24, %v1692_v48 }
 0x124   :  { %v1181_v59 = vrot.slane %v1180_v26, 4  ;;  %v1187_v49 = vsel %vm310_vm0, %v1013_v35, 0.0  ;;  %v1194_v32 = vsel %vm310_vm0, %v1014_v20, 0.0  ;;  %v1694_v36 = vsel %vm897_vm14, %v1480_v61, %v1693_v4 }
 0x125   :  { %v1188_v34 = vrot.slane %v1187_v49, 4  ;;  %v1195_v37 = vrot.slane %v1194_v32, 4  ;;  %v1201_v2 = vsel %vm310_vm0, %v1015_v16, 0.0  ;;  %v1695_v5 = vsel %vm899_vm15, %v1487_v45, %v1694_v36 }
 0x126   :  { %v1182_v38 = vadd.f32 %v1181_v59, %v1180_v26  ;;  %v1202_v39 = vrot.slane %v1201_v2, 4  ;;  %v1208_v7 = vsel %vm310_vm0, %v1016_v29, 0.0  ;;  %v1215_v30 = vsel %vm310_vm0, %v1017_v25, 0.0  ;;  %2691 = vadd.xlane.f32.xlu1 %v1695_v5 }
 0x127   :  { %v1189_v40 = vadd.f32 %v1188_v34, %v1187_v49  ;;  %v1196_v8 = vadd.f32 %v1195_v37, %v1194_v32  ;;  %v1209_v6 = vrot.slane %v1208_v7, 4  ;;  %v1222_v12 = vsel %vm310_vm0, %v1018_v58, 0.0 }
 0x128   :  { %v1183_v11 = vrot.slane %v1182_v38, 2  ;;  %v1203_v41 = vadd.f32 %v1202_v39, %v1201_v2  ;;  %v1216_v44 = vrot.slane %v1215_v30, 4  ;;  %v1223_v13 = vrot.slane %v1222_v12, 4 }
 0x129   :  { %v1190_v42 = vrot.slane %v1189_v40, 2  ;;  %v1197_v53 = vrot.slane %v1196_v8, 2  ;;  %v1210_v43 = vadd.f32 %v1209_v6, %v1208_v7  ;;  %v1229_v21 = vsel %vm310_vm0, %v1019_v63, 0.0 }
 0x12a   :  { %v1184_v55 = vadd.f32 %v1183_v11, %v1182_v38  ;;  %v1204_v47 = vrot.slane %v1203_v41, 2  ;;  %v1217_v1 = vadd.f32 %v1216_v44, %v1215_v30  ;;  %v1224_v15 = vadd.f32 %v1223_v13, %v1222_v12 }
 0x12b   :  { %v1191_v14 = vadd.f32 %v1190_v42, %v1189_v40  ;;  %v1198_v51 = vadd.f32 %v1197_v53, %v1196_v8  ;;  %v1211_v60 = vrot.slane %v1210_v43, 2  ;;  %v1230_v31 = vrot.slane %v1229_v21, 4 }
 0x12c   :  { %v1185_v27 = vrot.slane %v1184_v55, 1  ;;  %v1205_v28 = vadd.f32 %v1204_v47, %v1203_v41  ;;  %v1218_v19 = vrot.slane %v1217_v1, 2  ;;  %v1225_v54 = vrot.slane %v1224_v15, 2 }
 0x12d   :  { %v1192_v17 = vrot.slane %v1191_v14, 1  ;;  %v1199_v33 = vrot.slane %v1198_v51, 1  ;;  %v1212_v50 = vadd.f32 %v1211_v60, %v1210_v43  ;;  %v1231_v22 = vadd.f32 %v1230_v31, %v1229_v21 }
 0x12e   :  { %v1186_v3 = vadd.f32 %v1185_v27, %v1184_v55  ;;  %v1206_v62 = vrot.slane %v1205_v28, 1  ;;  %v1219_v24 = vadd.f32 %v1218_v19, %v1217_v1  ;;  %v1226_v56 = vadd.f32 %v1225_v54, %v1224_v15 }
 0x12f   :  { %v1193_v0 = vadd.f32 %v1192_v17, %v1191_v14  ;;  %v1200_v35 = vadd.f32 %v1199_v33, %v1198_v51  ;;  %v1213_v52 = vrot.slane %v1212_v50, 1  ;;  %v1232_v57 = vrot.slane %v1231_v22, 2 }
 0x130   :  { %v1207_v9 = vadd.f32 %v1206_v62, %v1205_v28  ;;  %vm4629_vm1 = vcmp.eq.s32.totalorder %v3605_v46, 16  ;;  %v1220_v29 = vrot.slane %v1219_v24, 1  ;;  %vm4630_vm2 = vcmp.eq.s32.totalorder %v3605_v46, 17 }
 0x131   :  { %v2928_v20 = vsel %vm4629_vm1, 1.0, %v4602_v23  ;;  %v1214_v16 = vadd.f32 %v1213_v52, %v1212_v50  ;;  %v1658_v61 = vsel %vm887_vm9, %v1193_v0, %v1186_v3  ;;  %v2929_v45 = vsel %vm4630_vm2, 1.0, %v4602_v23 }
 0x132   :  { %v1227_v18 = vrot.slane %v1226_v56, 1  ;;  %v1233_v25 = vadd.f32 %v1232_v57, %v1231_v22  ;;  %v1659_v48 = vsel %vm889_vm10, %v1200_v35, %v1658_v61  ;;  %vm4631_vm3 = vcmp.eq.s32.totalorder %v3605_v46, 18 }
 0x133   :  { %v2930_v58 = vsel %vm4631_vm3, 1.0, %v4602_v23  ;;  %v1221_v63 = vadd.f32 %v1220_v29, %v1219_v24  ;;  %v1660_v26 = vsel %vm891_vm11, %v1207_v9, %v1659_v48  ;;  %vm4632_vm1 = vcmp.eq.s32.totalorder %v3605_v46, 19 }
 0x134   :  { %v2931_v4 = vsel %vm4632_vm1, 1.0, %v4602_v23  ;;  %vm4633_vm4 = vcmp.eq.s32.totalorder %v3605_v46, 20  ;;  %v1228_v49 = vadd.f32 %v1227_v18, %v1226_v56  ;;  %v1234_v32 = vrot.slane %v1233_v25, 1 }
 0x135   :  { %v2932_v59 = vsel %vm4633_vm4, 1.0, %v4602_v23  ;;  %v1661_v36 = vsel %vm893_vm12, %v1214_v16, %v1660_v26  ;;  %vm4634_vm2 = vcmp.eq.s32.totalorder %v3605_v46, 21  ;;  %vm4635_vm3 = vcmp.eq.s32.totalorder %v3605_v46, 22 }
 0x136   :  { %v2933_v34 = vsel %vm4634_vm2, 1.0, %v4602_v23  ;;  %v1662_v37 = vsel %vm895_vm13, %v1221_v63, %v1661_v36  ;;  %v2934_v2 = vsel %vm4635_vm3, 1.0, %v4602_v23  ;;  %vm4636_vm1 = vcmp.eq.s32.totalorder %v3605_v46, 23 }
 0x137   :  { %v2935_v5 = vsel %vm4636_vm1, 1.0, %v4602_v23  ;;  %v2254_v38 = vsel %vm310_vm0, %v2928_v20, 0.0  ;;  %v1235_v39 = vadd.f32 %v1234_v32, %v1233_v25  ;;  %v1663_v7 = vsel %vm897_vm14, %v1228_v49, %v1662_v37 }
 0x138   :  { %v2255_v40 = vrot.slane %v2254_v38, 4  ;;  %v2261_v8 = vsel %vm310_vm0, %v2929_v45, 0.0  ;;  %v2268_v11 = vsel %vm310_vm0, %v2930_v58, 0.0  ;;  %v2275_v41 = vsel %vm310_vm0, %v2931_v4, 0.0 }
 0x139   :  { %v2262_v6 = vrot.slane %v2261_v8, 4  ;;  %v2282_v30 = vsel %vm310_vm0, %v2932_v59, 0.0  ;;  %v1664_v12 = vsel %vm899_vm15, %v1235_v39, %v1663_v7  ;;  %v2269_v53 = vrot.slane %v2268_v11, 4 }
 0x13a   :  { %v2256_v42 = vadd.f32 %v2255_v40, %v2254_v38  ;;  %v2276_v43 = vrot.slane %v2275_v41, 4  ;;  %v2283_v55 = vrot.slane %v2282_v30, 4  ;;  %v2289_v47 = vsel %vm310_vm0, %v2933_v34, 0.0  ;;  %2680 = vadd.xlane.f32.xlu0 %v1664_v12 }
 0x13b   :  { %v2263_v44 = vadd.f32 %v2262_v6, %v2261_v8  ;;  %v2270_v21 = vadd.f32 %v2269_v53, %v2268_v11  ;;  %v2290_v51 = vrot.slane %v2289_v47, 4  ;;  %v2296_v27 = vsel %vm310_vm0, %v2934_v2, 0.0 }
 0x13c   :  { %v2257_v13 = vrot.slane %v2256_v42, 2  ;;  %v2277_v14 = vadd.f32 %v2276_v43, %v2275_v41  ;;  %v2284_v1 = vadd.f32 %v2283_v55, %v2282_v30  ;;  %v2303_v28 = vsel %vm310_vm0, %v2935_v5, 0.0 }
 0x13d   :  { %v2264_v60 = vrot.slane %v2263_v44, 2  ;;  %v2271_v31 = vrot.slane %v2270_v21, 2  ;;  %v2291_v33 = vadd.f32 %v2290_v51, %v2289_v47  ;;  %v2297_v3 = vrot.slane %v2296_v27, 4 }
 0x13e   :  { %v2258_v15 = vadd.f32 %v2257_v13, %v2256_v42  ;;  %v2278_v17 = vrot.slane %v2277_v14, 2  ;;  %v2285_v19 = vrot.slane %v2284_v1, 2  ;;  %v2304_v62 = vrot.slane %v2303_v28, 4 }
 0x13f   :  { %v2265_v50 = vadd.f32 %v2264_v60, %v2263_v44  ;;  %v2272_v22 = vadd.f32 %v2271_v31, %v2270_v21  ;;  %v2292_v35 = vrot.slane %v2291_v33, 2  ;;  %v2298_v9 = vadd.f32 %v2297_v3, %v2296_v27 }
 0x140   :  { %v2259_v54 = vrot.slane %v2258_v15, 1  ;;  %v2279_v0 = vadd.f32 %v2278_v17, %v2277_v14  ;;  %v2286_v24 = vadd.f32 %v2285_v19, %v2284_v1  ;;  %v2305_v56 = vadd.f32 %v2304_v62, %v2303_v28 }
 0x141   :  { %v2266_v52 = vrot.slane %v2265_v50, 1  ;;  %v2273_v20 = vrot.slane %v2272_v22, 1  ;;  %v2293_v29 = vadd.f32 %v2292_v35, %v2291_v33  ;;  %v2299_v18 = vrot.slane %v2298_v9, 2 }
 0x142   :  { %v2260_v57 = vadd.f32 %v2259_v54, %v2258_v15  ;;  %v2280_v16 = vrot.slane %v2279_v0, 1  ;;  %v2287_v45 = vrot.slane %v2286_v24, 1  ;;  %v2306_v25 = vrot.slane %v2305_v56, 2 }
 0x143   :  { %v2267_v61 = vadd.f32 %v2266_v52, %v2265_v50  ;;  %v2274_v48 = vadd.f32 %v2273_v20, %v2272_v22  ;;  %v2294_v63 = vrot.slane %v2293_v29, 1  ;;  %v2892_v26 = vsel %vm172_vm8, 1.0, %v4602_v23 }
 0x144   :  { %v2281_v58 = vadd.f32 %v2280_v16, %v2279_v0  ;;  %v2288_v4 = vadd.f32 %v2287_v45, %v2286_v24  ;;  %v2300_v59 = vadd.f32 %v2299_v18, %v2298_v9  ;;  %v2307_v49 = vadd.f32 %v2306_v25, %v2305_v56 }
 0x145   :  { %v2511_v32 = vsel %vm887_vm9, %v2267_v61, %v2260_v57  ;;  %v2295_v36 = vadd.f32 %v2294_v63, %v2293_v29  ;;  %v2893_v37 = vsel %vm173_vm7, 1.0, %v4602_v23  ;;  %v2894_v2 = vsel %vm174_vm6, 1.0, %v4602_v23 }
 0x146   :  { %v2512_v34 = vsel %vm889_vm10, %v2274_v48, %v2511_v32  ;;  %v2301_v5 = vrot.slane %v2300_v59, 1  ;;  %v2308_v38 = vrot.slane %v2307_v49, 1  ;;  %v2895_v7 = vsel %vm175_vm5, 1.0, %v4602_v23 }
 0x147   :  { %v2513_v39 = vsel %vm891_vm11, %v2281_v58, %v2512_v34  ;;  %vm4637_vm4 = vcmp.eq.s32.totalorder %v3708_v10, 20  ;;  %vm4638_vm7 = vcmp.eq.s32.totalorder %v3708_v10, 21  ;;  %vm4639_vm6 = vcmp.eq.s32.totalorder %v3708_v10, 22 }
 0x148   :  { %v2514_v40 = vsel %vm893_vm12, %v2288_v4, %v2513_v39  ;;  %v2896_v8 = vsel %vm4637_vm4, 1.0, %v4602_v23  ;;  %v2897_v6 = vsel %vm4638_vm7, 1.0, %v4602_v23  ;;  %v2898_v11 = vsel %vm4639_vm6, 1.0, %v4602_v23 }
 0x149   :  { %v2302_v41 = vadd.f32 %v2301_v5, %v2300_v59  ;;  %v2309_v30 = vadd.f32 %v2308_v38, %v2307_v49  ;;  %v2515_v12 = vsel %vm895_vm13, %v2295_v36, %v2514_v40  ;;  %vm4640_vm5 = vcmp.eq.s32.totalorder %v3708_v10, 23  ;;  %v3930_v40 = vld [vmem:[%s4541_s0 + $0x78] sm:$0x3] }
 0x14a   :  { %v2899_v42 = vsel %vm4640_vm5, 1.0, %v4602_v23  ;;  %v2002_v53 = vsel %vm310_vm0, %v2892_v26, 0.0  ;;  %v2009_v43 = vsel %vm310_vm0, %v2893_v37, 0.0  ;;  %v2016_v44 = vsel %vm310_vm0, %v2894_v2, 0.0 }
 0x14b   :  { %v2023_v55 = vsel %vm310_vm0, %v2895_v7, 0.0  ;;  %v2516_v47 = vsel %vm897_vm14, %v2302_v41, %v2515_v12  ;;  %v2003_v13 = vrot.slane %v2002_v53, 4  ;;  %v2010_v21 = vrot.slane %v2009_v43, 4  ;;  %v3943_v12 = vld [vmem:[%s4541_s0 + $0x7c] sm:$0x3] }
 0x14c   :  { %v2017_v14 = vrot.slane %v2016_v44, 4  ;;  %v2517_v51 = vsel %vm899_vm15, %v2309_v30, %v2516_v47  ;;  %v2024_v60 = vrot.slane %v2023_v55, 4  ;;  %v2030_v1 = vsel %vm310_vm0, %v2896_v8, 0.0  ;;  %v3938_v30 = vld [vmem:[%s4541_s0 + $0x7a] sm:$0x3] }
 0x14d   :  { %v2037_v27 = vsel %vm310_vm0, %v2897_v6, 0.0  ;;  %v2004_v28 = vadd.f32 %v2003_v13, %v2002_v53  ;;  %v2011_v15 = vadd.f32 %v2010_v21, %v2009_v43  ;;  %v2031_v33 = vrot.slane %v2030_v1, 4  ;;  %2784 = vadd.xlane.f32.xlu1 %v2517_v51  ;;  %v3967_v21 = vld [vmem:[%s4541_s0 + $0x84] sm:$0x3]  ;;  %v3975_v51 = vld [vmem:[%s4541_s0 + $0x86] sm:$0x3] }
 0x14e   :  { %v2018_v31 = vadd.f32 %v2017_v14, %v2016_v44  ;;  %v2025_v17 = vadd.f32 %v2024_v60, %v2023_v55  ;;  %v2038_v50 = vrot.slane %v2037_v27, 4  ;;  %v2044_v19 = vsel %vm310_vm0, %v2898_v11, 0.0  ;;  %v3954_v44 = vld [vmem:[%s4541_s0 + $0x80] sm:$0x3]  ;;  %v3959_v55 = vld [vmem:[%s4541_s0 + $0x82] sm:$0x3] }
 0x14f   :  { %v2005_v3 = vrot.slane %v2004_v28, 2  ;;  %v2012_v62 = vrot.slane %v2011_v15, 2  ;;  %v2045_v22 = vrot.slane %v2044_v19, 4  ;;  %v2032_v35 = vadd.f32 %v2031_v33, %v2030_v1 }
 0x150   :  { %v2019_v54 = vrot.slane %v2018_v31, 2  ;;  %v2026_v0 = vrot.slane %v2025_v17, 2  ;;  %v2039_v52 = vadd.f32 %v2038_v50, %v2037_v27  ;;  %v2051_v24 = vsel %vm310_vm0, %v2899_v42, 0.0  ;;  %v3948_v42 = vld [vmem:[%s4541_s0 + $0x7e] sm:$0x3] }
 0x151   :  { %v2006_v9 = vadd.f32 %v2005_v3, %v2004_v28  ;;  %v2013_v56 = vadd.f32 %v2012_v62, %v2011_v15  ;;  %v2046_v20 = vadd.f32 %v2045_v22, %v2044_v19  ;;  %v2033_v29 = vrot.slane %v2032_v35, 2 }
 0x152   :  { %v2020_v57 = vadd.f32 %v2019_v54, %v2018_v31  ;;  %v2027_v16 = vadd.f32 %v2026_v0, %v2025_v17  ;;  %v2040_v61 = vrot.slane %v2039_v52, 2  ;;  %v2052_v45 = vrot.slane %v2051_v24, 4 }
 0x153   :  { %v2007_v18 = vrot.slane %v2006_v9, 1  ;;  %v2014_v25 = vrot.slane %v2013_v56, 1  ;;  %v2047_v58 = vrot.slane %v2046_v20, 2  ;;  %v2034_v26 = vadd.f32 %v2033_v29, %v2032_v35 }
 0x154   :  { %v2021_v48 = vrot.slane %v2020_v57, 1  ;;  %v2028_v63 = vrot.slane %v2027_v16, 1  ;;  %v2041_v4 = vadd.f32 %v2040_v61, %v2039_v52  ;;  %v2053_v59 = vadd.f32 %v2052_v45, %v2051_v24 }
 0x155   :  { %v2008_v49 = vadd.f32 %v2007_v18, %v2006_v9  ;;  %v2015_v32 = vadd.f32 %v2014_v25, %v2013_v56  ;;  %v2048_v34 = vadd.f32 %v2047_v58, %v2046_v20  ;;  %v2035_v2 = vrot.slane %v2034_v26, 1 }
 0x156   :  { %v2022_v36 = vadd.f32 %v2021_v48, %v2020_v57  ;;  %v2029_v37 = vadd.f32 %v2028_v63, %v2027_v16  ;;  %v2042_v5 = vrot.slane %v2041_v4, 1  ;;  %v2054_v38 = vrot.slane %v2053_v59, 2 }
 0x157   :  { %v2049_v39 = vrot.slane %v2048_v34, 1  ;;  %v2480_v7 = vsel %vm887_vm9, %v2015_v32, %v2008_v49  ;;  %vm4595_vm8 = vcmp.eq.s32.totalorder %v3605_v46, 24  ;;  %vm4594_vm2 = vcmp.eq.s32.totalorder %v3605_v46, 25 }
 0x158   :  { %v2036_v8 = vadd.f32 %v2035_v2, %v2034_v26  ;;  %v2043_v6 = vadd.f32 %v2042_v5, %v2041_v4  ;;  %v2055_v11 = vadd.f32 %v2054_v38, %v2053_v59  ;;  %v2481_v41 = vsel %vm889_vm10, %v2022_v36, %v2480_v7 }
 0x159   :  { %v2050_v53 = vadd.f32 %v2049_v39, %v2048_v34  ;;  %v2482_v43 = vsel %vm891_vm11, %v2029_v37, %v2481_v41  ;;  %vm4593_vm3 = vcmp.eq.s32.totalorder %v3605_v46, 26  ;;  %vm4592_vm1 = vcmp.eq.s32.totalorder %v3605_v46, 27 }
 0x15a   :  { %v2056_v47 = vrot.slane %v2055_v11, 1  ;;  %v2483_v13 = vsel %vm893_vm12, %v2036_v8, %v2482_v43  ;;  %vm4591_vm4 = vcmp.eq.s32.totalorder %v3605_v46, 28  ;;  %vm4590_vm7 = vcmp.eq.s32.totalorder %v3605_v46, 29 }
 0x15b   :  { %v2484_v14 = vsel %vm895_vm13, %v2043_v6, %v2483_v13  ;;  %vm4589_vm6 = vcmp.eq.s32.totalorder %v3605_v46, 30  ;;  %vm4588_vm5 = vcmp.eq.s32.totalorder %v3605_v46, 31  ;;  %v298_v60 = vsel %vm4595_vm8, %v3930_v40, 0.0 }
 0x15c   :  { %v2057_v1 = vadd.f32 %v2056_v47, %v2055_v11  ;;  %v2485_v27 = vsel %vm897_vm14, %v2050_v53, %v2484_v14  ;;  %v299_v28 = vsel %vm4594_vm2, %v3938_v30, 0.0  ;;  %v300_v15 = vsel %vm4593_vm3, %v3943_v12, 0.0 }
 0x15d   :  { %v301_v31 = vsel %vm4592_vm1, %v3948_v42, 0.0  ;;  %v302_v17 = vsel %vm4591_vm4, %v3954_v44, 0.0  ;;  %v303_v33 = vsel %vm4590_vm7, %v3959_v55, 0.0  ;;  %v304_v50 = vsel %vm4589_vm6, %v3967_v21, 0.0 }
 0x15e   :  { %v2486_v19 = vsel %vm899_vm15, %v2057_v1, %v2485_v27  ;;  %v305_v3 = vsel %vm4588_vm5, %v3975_v51, 0.0  ;;  %v731_v62 = vsel %vm310_vm0, %v298_v60, 0.0  ;;  %v738_v54 = vsel %vm310_vm0, %v299_v28, 0.0 }
 0x15f   :  { %v732_v22 = vrot.slane %v731_v62, 4  ;;  %v739_v0 = vrot.slane %v738_v54, 4  ;;  %v745_v35 = vsel %vm310_vm0, %v300_v15, 0.0  ;;  %v752_v24 = vsel %vm310_vm0, %v301_v31, 0.0  ;;  %2773 = vadd.xlane.f32.xlu0 %v2486_v19 }
 0x160   :  { %v746_v52 = vrot.slane %v745_v35, 4  ;;  %v759_v9 = vsel %vm310_vm0, %v302_v17, 0.0  ;;  %v766_v56 = vsel %vm310_vm0, %v303_v33, 0.0  ;;  %v753_v16 = vrot.slane %v752_v24, 4 }
 0x161   :  { %v733_v57 = vadd.f32 %v732_v22, %v731_v62  ;;  %v740_v20 = vadd.f32 %v739_v0, %v738_v54  ;;  %v760_v29 = vrot.slane %v759_v9, 4  ;;  %v767_v45 = vrot.slane %v766_v56, 4  ;;  %v4022_v62 = vld [vmem:[%s4541_s0 + $0x32] sm:$0x3] }
 0x162   :  { %v747_v61 = vadd.f32 %v746_v52, %v745_v35  ;;  %v773_v18 = vsel %vm310_vm0, %v304_v50, 0.0  ;;  %v780_v25 = vsel %vm310_vm0, %v305_v3, 0.0  ;;  %v754_v63 = vadd.f32 %v753_v16, %v752_v24  ;;  %v4017_v3 = vld [vmem:[%s4541_s0 + $0x30] sm:$0x3]  ;;  %v4029_v52 = vld [vmem:[%s4541_s0 + $0x34] sm:$0x3] }
 0x163   :  { %v734_v48 = vrot.slane %v733_v57, 2  ;;  %v741_v58 = vrot.slane %v740_v20, 2  ;;  %v761_v26 = vadd.f32 %v760_v29, %v759_v9  ;;  %v768_v59 = vadd.f32 %v767_v45, %v766_v56  ;;  %v4034_v24 = vld [vmem:[%s4541_s0 + $0x36] sm:$0x3]  ;;  %v4040_v56 = vld [vmem:[%s4541_s0 + $0x38] sm:$0x3] }
 0x164   :  { %v748_v4 = vrot.slane %v747_v61, 2  ;;  %v774_v49 = vrot.slane %v773_v18, 4  ;;  %v781_v32 = vrot.slane %v780_v25, 4  ;;  %v755_v37 = vrot.slane %v754_v63, 2  ;;  %v4049_v29 = vld [vmem:[%s4541_s0 + $0x3a] sm:$0x3] }
 0x165   :  { %v735_v36 = vadd.f32 %v734_v48, %v733_v57  ;;  %v742_v34 = vadd.f32 %v741_v58, %v740_v20  ;;  %v762_v2 = vrot.slane %v761_v26, 2  ;;  %v769_v38 = vrot.slane %v768_v59, 2 }
 0x166   :  { %v749_v5 = vadd.f32 %v748_v4, %v747_v61  ;;  %v775_v39 = vadd.f32 %v774_v49, %v773_v18  ;;  %v782_v7 = vadd.f32 %v781_v32, %v780_v25  ;;  %v756_v11 = vadd.f32 %v755_v37, %v754_v63  ;;  %v4054_v61 = vld [vmem:[%s4541_s0 + $0x3c] sm:$0x3]  ;;  %v4061_v18 = vld [vmem:[%s4541_s0 + $0x3e] sm:$0x3] }
 0x167   :  { %v736_v8 = vrot.slane %v735_v36, 1  ;;  %v743_v6 = vrot.slane %v742_v34, 1  ;;  %v763_v41 = vadd.f32 %v762_v2, %v761_v26  ;;  %v770_v43 = vadd.f32 %v769_v38, %v768_v59 }
 0x168   :  { %v750_v53 = vrot.slane %v749_v5, 1  ;;  %v776_v47 = vrot.slane %v775_v39, 2  ;;  %v783_v13 = vrot.slane %v782_v7, 2  ;;  %v757_v1 = vrot.slane %v756_v11, 1 }
 0x169   :  { %v737_v14 = vadd.f32 %v736_v8, %v735_v36  ;;  %v744_v60 = vadd.f32 %v743_v6, %v742_v34  ;;  %v764_v27 = vrot.slane %v763_v41, 1  ;;  %v771_v15 = vrot.slane %v770_v43, 1 }
 0x16a   :  { %v751_v28 = vadd.f32 %v750_v53, %v749_v5  ;;  %v777_v31 = vadd.f32 %v776_v47, %v775_v39  ;;  %v784_v17 = vadd.f32 %v783_v13, %v782_v7  ;;  %v758_v33 = vadd.f32 %v757_v1, %v756_v11 }
 0x16b   :  { %v765_v50 = vadd.f32 %v764_v27, %v763_v41  ;;  %v946_v19 = vsel %vm887_vm9, %v744_v60, %v737_v14  ;;  %vm180_vm5 = vcmp.eq.s32.totalorder %v3708_v10, 24  ;;  %v772_v54 = vadd.f32 %v771_v15, %v770_v43 }
 0x16c   :  { %v778_v22 = vrot.slane %v777_v31, 1  ;;  %v785_v0 = vrot.slane %v784_v17, 1  ;;  %v947_v35 = vsel %vm889_vm10, %v751_v28, %v946_v19  ;;  %vm181_vm6 = vcmp.eq.s32.totalorder %v3708_v10, 25 }
 0x16d   :  { %v948_v9 = vsel %vm891_vm11, %v758_v33, %v947_v35  ;;  %vm182_vm7 = vcmp.eq.s32.totalorder %v3708_v10, 26  ;;  %vm183_vm4 = vcmp.eq.s32.totalorder %v3708_v10, 27  ;;  %vm4599_vm1 = vcmp.eq.s32.totalorder %v3708_v10, 28 }
 0x16e   :  { %v779_v57 = vadd.f32 %v778_v22, %v777_v31  ;;  %v786_v20 = vadd.f32 %v785_v0, %v784_v17  ;;  %v949_v16 = vsel %vm893_vm12, %v765_v50, %v948_v9  ;;  %vm4598_vm3 = vcmp.eq.s32.totalorder %v3708_v10, 29 }
 0x16f   :  { %v950_v45 = vsel %vm895_vm13, %v772_v54, %v949_v16  ;;  %vm4597_vm2 = vcmp.eq.s32.totalorder %v3708_v10, 30  ;;  %vm4596_vm8 = vcmp.eq.s32.totalorder %v3708_v10, 31  ;;  %v262_v48 = vsel %vm180_vm5, %v4017_v3, 0.0 }
 0x170   :  { %v951_v25 = vsel %vm897_vm14, %v779_v57, %v950_v45  ;;  %v263_v58 = vsel %vm181_vm6, %v4022_v62, 0.0  ;;  %v264_v63 = vsel %vm182_vm7, %v4029_v52, 0.0  ;;  %v265_v4 = vsel %vm183_vm4, %v4034_v24, 0.0 }
 0x171   :  { %v952_v26 = vsel %vm899_vm15, %v786_v20, %v951_v25  ;;  %v266_v59 = vsel %vm4599_vm1, %v4040_v56, 0.0  ;;  %v267_v49 = vsel %vm4598_vm3, %v4049_v29, 0.0  ;;  %v268_v32 = vsel %vm4597_vm2, %v4054_v61, 0.0 }
 0x172   :  { %v269_v36 = vsel %vm4596_vm8, %v4061_v18, 0.0  ;;  %v479_v34 = vsel %vm310_vm0, %v262_v48, 0.0  ;;  %v486_v2 = vsel %vm310_vm0, %v263_v58, 0.0  ;;  %v493_v5 = vsel %vm310_vm0, %v264_v63, 0.0  ;;  %2589 = vadd.xlane.f32.xlu1 %v952_v26 }
 0x173   :  { %v480_v37 = vrot.slane %v479_v34, 4  ;;  %v500_v38 = vsel %vm310_vm0, %v265_v4, 0.0  ;;  %v487_v39 = vrot.slane %v486_v2, 4  ;;  %v494_v7 = vrot.slane %v493_v5, 4 }
 0x174   :  { %v501_v8 = vrot.slane %v500_v38, 4  ;;  %v507_v6 = vsel %vm310_vm0, %v266_v59, 0.0  ;;  %v514_v53 = vsel %vm310_vm0, %v267_v49, 0.0  ;;  %v521_v43 = vsel %vm310_vm0, %v268_v32, 0.0 }
 0x175   :  { %v481_v11 = vadd.f32 %v480_v37, %v479_v34  ;;  %v508_v41 = vrot.slane %v507_v6, 4  ;;  %v488_v47 = vadd.f32 %v487_v39, %v486_v2  ;;  %v495_v13 = vadd.f32 %v494_v7, %v493_v5 }
 0x176   :  { %v502_v14 = vadd.f32 %v501_v8, %v500_v38  ;;  %v515_v60 = vrot.slane %v514_v53, 4  ;;  %v522_v28 = vrot.slane %v521_v43, 4  ;;  %v528_v15 = vsel %vm310_vm0, %v269_v36, 0.0 }
 0x177   :  { %v482_v1 = vrot.slane %v481_v11, 2  ;;  %v509_v27 = vadd.f32 %v508_v41, %v507_v6  ;;  %v489_v31 = vrot.slane %v488_v47, 2  ;;  %v496_v17 = vrot.slane %v495_v13, 2 }
 0x178   :  { %v503_v33 = vrot.slane %v502_v14, 2  ;;  %v516_v50 = vadd.f32 %v515_v60, %v514_v53  ;;  %v523_v22 = vadd.f32 %v522_v28, %v521_v43  ;;  %v529_v0 = vrot.slane %v528_v15, 4 }
 0x179   :  { %v483_v19 = vadd.f32 %v482_v1, %v481_v11  ;;  %v510_v54 = vrot.slane %v509_v27, 2  ;;  %v490_v35 = vadd.f32 %v489_v31, %v488_v47  ;;  %v497_v9 = vadd.f32 %v496_v17, %v495_v13 }
 0x17a   :  { %v504_v57 = vadd.f32 %v503_v33, %v502_v14  ;;  %v517_v20 = vrot.slane %v516_v50, 2  ;;  %v524_v25 = vrot.slane %v523_v22, 2  ;;  %v530_v48 = vadd.f32 %v529_v0, %v528_v15 }
 0x17b   :  { %v484_v16 = vrot.slane %v483_v19, 1  ;;  %v511_v45 = vadd.f32 %v510_v54, %v509_v27  ;;  %v491_v58 = vrot.slane %v490_v35, 1  ;;  %v498_v63 = vrot.slane %v497_v9, 1 }
 0x17c   :  { %v505_v26 = vrot.slane %v504_v57, 1  ;;  %v518_v4 = vadd.f32 %v517_v20, %v516_v50  ;;  %v525_v32 = vadd.f32 %v524_v25, %v523_v22  ;;  %v531_v36 = vrot.slane %v530_v48, 2 }
 0x17d   :  { %v485_v59 = vadd.f32 %v484_v16, %v483_v19  ;;  %v512_v49 = vrot.slane %v511_v45, 1  ;;  %v492_v34 = vadd.f32 %v491_v58, %v490_v35  ;;  %v499_v37 = vadd.f32 %v498_v63, %v497_v9 }
 0x17e   :  { %v506_v2 = vadd.f32 %v505_v26, %v504_v57  ;;  %v519_v5 = vrot.slane %v518_v4, 1  ;;  %v526_v39 = vrot.slane %v525_v32, 1  ;;  %v532_v7 = vadd.f32 %v531_v36, %v530_v48 }
 0x17f   :  { %v513_v38 = vadd.f32 %v512_v49, %v511_v45  ;;  %v1056_v8 = vmul.f32 %v3930_v40, %v3930_v40  ;;  %v915_v11 = vsel %vm887_vm9, %v492_v34, %v485_v59  ;;  %v1057_v41 = vmul.f32 %v3938_v30, %v3938_v30 }
 0x180   :  { %v520_v6 = vadd.f32 %v519_v5, %v518_v4  ;;  %v1058_v53 = vmul.f32 %v3943_v12, %v3943_v12  ;;  %v527_v43 = vadd.f32 %v526_v39, %v525_v32  ;;  %v533_v47 = vrot.slane %v532_v7, 1 }
 0x181   :  { %v916_v13 = vsel %vm889_vm10, %v499_v37, %v915_v11  ;;  %v1059_v14 = vmul.f32 %v3948_v42, %v3948_v42  ;;  %v1060_v40 = vmul.f32 %v3954_v44, %v3954_v44  ;;  %v1061_v1 = vmul.f32 %v3959_v55, %v3959_v55 }
 0x182   :  { %v917_v60 = vsel %vm891_vm11, %v506_v2, %v916_v13  ;;  %v1062_v30 = vmul.f32 %v3967_v21, %v3967_v21  ;;  %v534_v27 = vadd.f32 %v533_v47, %v532_v7  ;;  %v1063_v28 = vmul.f32 %v3975_v51, %v3975_v51 }
 0x183   :  { %v918_v12 = vsel %vm893_vm12, %v513_v38, %v917_v60  ;;  %v1488_v15 = vsel %vm310_vm0, %v1056_v8, 0.0  ;;  %v1495_v17 = vsel %vm310_vm0, %v1057_v41, 0.0  ;;  %v1502_v44 = vsel %vm310_vm0, %v1058_v53, 0.0 }
 0x184   :  { %v919_v42 = vsel %vm895_vm13, %v520_v6, %v918_v12  ;;  %v1489_v31 = vrot.slane %v1488_v15, 4  ;;  %v1496_v33 = vrot.slane %v1495_v17, 4  ;;  %v1503_v50 = vrot.slane %v1502_v44, 4 }
 0x185   :  { %v920_v55 = vsel %vm897_vm14, %v527_v43, %v919_v42  ;;  %v1509_v21 = vsel %vm310_vm0, %v1059_v14, 0.0  ;;  %v1516_v51 = vsel %vm310_vm0, %v1060_v40, 0.0  ;;  %v1523_v16 = vsel %vm310_vm0, %v1061_v1, 0.0 }
 0x186   :  { %v921_v19 = vsel %vm899_vm15, %v534_v27, %v920_v55  ;;  %v1490_v54 = vadd.f32 %v1489_v31, %v1488_v15  ;;  %v1510_v22 = vrot.slane %v1509_v21, 4  ;;  %v1497_v0 = vadd.f32 %v1496_v33, %v1495_v17 }
 0x187   :  { %v1504_v35 = vadd.f32 %v1503_v50, %v1502_v44  ;;  %v1517_v9 = vrot.slane %v1516_v51, 4  ;;  %v1530_v45 = vsel %vm310_vm0, %v1062_v30, 0.0  ;;  %2577 = vadd.xlane.f32.xlu0 %v921_v19  ;;  %v1524_v63 = vrot.slane %v1523_v16, 4 }
 0x188   :  { %v1491_v57 = vrot.slane %v1490_v54, 2  ;;  %v1511_v20 = vadd.f32 %v1510_v22, %v1509_v21  ;;  %v1498_v25 = vrot.slane %v1497_v0, 2  ;;  %v1531_v59 = vrot.slane %v1530_v45, 4 }
 0x189   :  { %v1505_v48 = vrot.slane %v1504_v35, 2  ;;  %v1518_v58 = vadd.f32 %v1517_v9, %v1516_v51  ;;  %v1537_v49 = vsel %vm310_vm0, %v1063_v28, 0.0  ;;  %v1525_v37 = vadd.f32 %v1524_v63, %v1523_v16 }
 0x18a   :  { %v1492_v26 = vadd.f32 %v1491_v57, %v1490_v54  ;;  %v1512_v4 = vrot.slane %v1511_v20, 2  ;;  %v1499_v32 = vadd.f32 %v1498_v25, %v1497_v0  ;;  %v1532_v38 = vadd.f32 %v1531_v59, %v1530_v45 }
 0x18b   :  { %v1506_v36 = vadd.f32 %v1505_v48, %v1504_v35  ;;  %v1519_v34 = vrot.slane %v1518_v58, 2  ;;  %v1538_v39 = vrot.slane %v1537_v49, 4  ;;  %v1526_v11 = vrot.slane %v1525_v37, 2 }
 0x18c   :  { %v1493_v2 = vrot.slane %v1492_v26, 1  ;;  %v1513_v5 = vadd.f32 %v1512_v4, %v1511_v20  ;;  %v1500_v7 = vrot.slane %v1499_v32, 1  ;;  %v1533_v43 = vrot.slane %v1532_v38, 2 }
 0x18d   :  { %v1507_v8 = vrot.slane %v1506_v36, 1  ;;  %v1520_v6 = vadd.f32 %v1519_v34, %v1518_v58  ;;  %v1539_v47 = vadd.f32 %v1538_v39, %v1537_v49  ;;  %v1527_v40 = vadd.f32 %v1526_v11, %v1525_v37 }
 0x18e   :  { %v1494_v41 = vadd.f32 %v1493_v2, %v1492_v26  ;;  %v1514_v53 = vrot.slane %v1513_v5, 1  ;;  %v1501_v13 = vadd.f32 %v1500_v7, %v1499_v32  ;;  %v1534_v30 = vadd.f32 %v1533_v43, %v1532_v38 }
 0x18f   :  { %v1508_v14 = vadd.f32 %v1507_v8, %v1506_v36  ;;  %v1521_v60 = vrot.slane %v1520_v6, 1  ;;  %v1540_v27 = vrot.slane %v1539_v47, 2  ;;  %v1020_v12 = vmul.f32 %v4017_v3, %v4017_v3 }
 0x190   :  { %v1515_v1 = vadd.f32 %v1514_v53, %v1513_v5  ;;  %v1528_v15 = vrot.slane %v1527_v40, 1  ;;  %v1696_v42 = vsel %vm887_vm9, %v1501_v13, %v1494_v41  ;;  %v1021_v31 = vmul.f32 %v4022_v62, %v4022_v62 }
 0x191   :  { %v1522_v28 = vadd.f32 %v1521_v60, %v1520_v6  ;;  %v1535_v17 = vrot.slane %v1534_v30, 1  ;;  %v1541_v44 = vadd.f32 %v1540_v27, %v1539_v47  ;;  %v1697_v55 = vsel %vm889_vm10, %v1508_v14, %v1696_v42 }
 0x192   :  { %v1022_v33 = vmul.f32 %v4029_v52, %v4029_v52  ;;  %v1529_v50 = vadd.f32 %v1528_v15, %v1527_v40  ;;  %v1698_v21 = vsel %vm891_vm11, %v1515_v1, %v1697_v55  ;;  %v1023_v3 = vmul.f32 %v4034_v24, %v4034_v24 }
 0x193   :  { %v1024_v19 = vmul.f32 %v4040_v56, %v4040_v56  ;;  %v1536_v54 = vadd.f32 %v1535_v17, %v1534_v30  ;;  %v1542_v22 = vrot.slane %v1541_v44, 1  ;;  %v1699_v62 = vsel %vm893_vm12, %v1522_v28, %v1698_v21 }
 0x194   :  { %v1025_v51 = vmul.f32 %v4049_v29, %v4049_v29  ;;  %v1700_v0 = vsel %vm895_vm13, %v1529_v50, %v1699_v62  ;;  %v1026_v52 = vmul.f32 %v4054_v61, %v4054_v61  ;;  %v1027_v35 = vmul.f32 %v4061_v18, %v4061_v18 }
 0x195   :  { %v1236_v24 = vsel %vm310_vm0, %v1020_v12, 0.0  ;;  %v1543_v9 = vadd.f32 %v1542_v22, %v1541_v44  ;;  %v1701_v56 = vsel %vm897_vm14, %v1536_v54, %v1700_v0  ;;  %v1243_v20 = vsel %vm310_vm0, %v1021_v31, 0.0 }
 0x196   :  { %v1237_v57 = vrot.slane %v1236_v24, 4  ;;  %v1244_v16 = vrot.slane %v1243_v20, 4  ;;  %v1250_v45 = vsel %vm310_vm0, %v1022_v33, 0.0  ;;  %v1257_v29 = vsel %vm310_vm0, %v1023_v3, 0.0 }
 0x197   :  { %v1264_v25 = vsel %vm310_vm0, %v1024_v19, 0.0  ;;  %v1702_v61 = vsel %vm899_vm15, %v1543_v9, %v1701_v56  ;;  %v1251_v58 = vrot.slane %v1250_v45, 4  ;;  %v1258_v18 = vrot.slane %v1257_v29, 4 }
 0x198   :  { %v1238_v48 = vadd.f32 %v1237_v57, %v1236_v24  ;;  %v1245_v63 = vadd.f32 %v1244_v16, %v1243_v20  ;;  %v1265_v26 = vrot.slane %v1264_v25, 4  ;;  %v1271_v4 = vsel %vm310_vm0, %v1025_v51, 0.0  ;;  %2693 = vadd.xlane.f32.xlu1 %v1702_v61 }
 0x199   :  { %v1252_v49 = vadd.f32 %v1251_v58, %v1250_v45  ;;  %v1259_v32 = vadd.f32 %v1258_v18, %v1257_v29  ;;  %v1272_v36 = vrot.slane %v1271_v4, 4  ;;  %v1278_v2 = vsel %vm310_vm0, %v1026_v52, 0.0 }
 0x19a   :  { %v1239_v59 = vrot.slane %v1238_v48, 2  ;;  %v1246_v34 = vrot.slane %v1245_v63, 2  ;;  %v1266_v37 = vadd.f32 %v1265_v26, %v1264_v25  ;;  %v1285_v5 = vsel %vm310_vm0, %v1027_v35, 0.0 }
 0x19b   :  { %v1253_v39 = vrot.slane %v1252_v49, 2  ;;  %v1260_v7 = vrot.slane %v1259_v32, 2  ;;  %v1273_v8 = vadd.f32 %v1272_v36, %v1271_v4  ;;  %v1279_v41 = vrot.slane %v1278_v2, 4 }
 0x19c   :  { %v1240_v38 = vadd.f32 %v1239_v59, %v1238_v48  ;;  %v1247_v6 = vadd.f32 %v1246_v34, %v1245_v63  ;;  %v1267_v11 = vrot.slane %v1266_v37, 2  ;;  %v1286_v53 = vrot.slane %v1285_v5, 4 }
 0x19d   :  { %v1254_v47 = vadd.f32 %v1253_v39, %v1252_v49  ;;  %v1261_v13 = vadd.f32 %v1260_v7, %v1259_v32  ;;  %v1274_v14 = vrot.slane %v1273_v8, 2  ;;  %v1280_v1 = vadd.f32 %v1279_v41, %v1278_v2 }
 0x19e   :  { %v1241_v43 = vrot.slane %v1240_v38, 1  ;;  %v1248_v60 = vrot.slane %v1247_v6, 1  ;;  %v1268_v40 = vadd.f32 %v1267_v11, %v1266_v37  ;;  %v1287_v30 = vadd.f32 %v1286_v53, %v1285_v5 }
 0x19f   :  { %v1255_v12 = vrot.slane %v1254_v47, 1  ;;  %v1262_v28 = vrot.slane %v1261_v13, 1  ;;  %v1275_v15 = vadd.f32 %v1274_v14, %v1273_v8  ;;  %v1281_v17 = vrot.slane %v1280_v1, 2 }
 0x1a0   :  { %v1242_v27 = vadd.f32 %v1241_v43, %v1240_v38  ;;  %v1249_v42 = vadd.f32 %v1248_v60, %v1247_v6  ;;  %v1269_v31 = vrot.slane %v1268_v40, 1  ;;  %v1288_v44 = vrot.slane %v1287_v30, 2 }
 0x1a1   :  { %v1256_v55 = vadd.f32 %v1255_v12, %v1254_v47  ;;  %v1263_v33 = vadd.f32 %v1262_v28, %v1261_v13  ;;  %v1276_v50 = vrot.slane %v1275_v15, 1  ;;  %vm4641_vm8 = vcmp.eq.s32.totalorder %v3605_v46, 24 }
 0x1a2   :  { %v2936_v21 = vsel %vm4641_vm8, 1.0, %v4602_v23  ;;  %v1270_v3 = vadd.f32 %v1269_v31, %v1268_v40  ;;  %v1282_v19 = vadd.f32 %v1281_v17, %v1280_v1  ;;  %v1289_v54 = vadd.f32 %v1288_v44, %v1287_v30 }
 0x1a3   :  { %v1665_v22 = vsel %vm887_vm9, %v1249_v42, %v1242_v27  ;;  %v1277_v62 = vadd.f32 %v1276_v50, %v1275_v15  ;;  %vm4642_vm2 = vcmp.eq.s32.totalorder %v3605_v46, 25  ;;  %vm4643_vm3 = vcmp.eq.s32.totalorder %v3605_v46, 26 }
 0x1a4   :  { %v1666_v51 = vsel %vm889_vm10, %v1256_v55, %v1665_v22  ;;  %v2937_v0 = vsel %vm4642_vm2, 1.0, %v4602_v23  ;;  %v2938_v52 = vsel %vm4643_vm3, 1.0, %v4602_v23  ;;  %v1283_v35 = vrot.slane %v1282_v19, 1 }
 0x1a5   :  { %v1290_v24 = vrot.slane %v1289_v54, 1  ;;  %v1667_v9 = vsel %vm891_vm11, %v1263_v33, %v1666_v51  ;;  %vm4644_vm8 = vcmp.eq.s32.totalorder %v3605_v46, 27  ;;  %vm4645_vm1 = vcmp.eq.s32.totalorder %v3605_v46, 28 }
 0x1a6   :  { %v2939_v56 = vsel %vm4644_vm8, 1.0, %v4602_v23  ;;  %v1668_v57 = vsel %vm893_vm12, %v1270_v3, %v1667_v9  ;;  %v2940_v20 = vsel %vm4645_vm1, 1.0, %v4602_v23  ;;  %vm4646_vm2 = vcmp.eq.s32.totalorder %v3605_v46, 29 }
 0x1a7   :  { %v2941_v16 = vsel %vm4646_vm2, 1.0, %v4602_v23  ;;  %vm4647_vm3 = vcmp.eq.s32.totalorder %v3605_v46, 30  ;;  %v1284_v29 = vadd.f32 %v1283_v35, %v1282_v19  ;;  %v1291_v25 = vadd.f32 %v1290_v24, %v1289_v54 }
 0x1a8   :  { %v2942_v45 = vsel %vm4647_vm3, 1.0, %v4602_v23  ;;  %v1669_v61 = vsel %vm895_vm13, %v1277_v62, %v1668_v57  ;;  %vm4648_vm8 = vcmp.eq.s32.totalorder %v3605_v46, 31  ;;  %v2310_v58 = vsel %vm310_vm0, %v2936_v21, 0.0 }
 0x1a9   :  { %v2943_v48 = vsel %vm4648_vm8, 1.0, %v4602_v23  ;;  %v2317_v18 = vsel %vm310_vm0, %v2937_v0, 0.0  ;;  %v2324_v63 = vsel %vm310_vm0, %v2938_v52, 0.0  ;;  %v2331_v26 = vsel %vm310_vm0, %v2939_v56, 0.0 }
 0x1aa   :  { %v1670_v4 = vsel %vm897_vm14, %v1284_v29, %v1669_v61  ;;  %v2311_v59 = vrot.slane %v2310_v58, 4  ;;  %v2318_v49 = vrot.slane %v2317_v18, 4  ;;  %v2325_v32 = vrot.slane %v2324_v63, 4 }
 0x1ab   :  { %v1671_v36 = vsel %vm899_vm15, %v1291_v25, %v1670_v4  ;;  %v2332_v34 = vrot.slane %v2331_v26, 4  ;;  %v2338_v37 = vsel %vm310_vm0, %v2940_v20, 0.0  ;;  %v2345_v46 = vsel %vm310_vm0, %v2941_v16, 0.0 }
 0x1ac   :  { %v2312_v2 = vadd.f32 %v2311_v59, %v2310_v58  ;;  %v2319_v5 = vadd.f32 %v2318_v49, %v2317_v18  ;;  %v2326_v38 = vadd.f32 %v2325_v32, %v2324_v63  ;;  %v2339_v7 = vrot.slane %v2338_v37, 4  ;;  %2682 = vadd.xlane.f32.xlu0 %v1671_v36 }
 0x1ad   :  { %v2333_v39 = vadd.f32 %v2332_v34, %v2331_v26  ;;  %v2346_v8 = vrot.slane %v2345_v46, 4  ;;  %v2352_v6 = vsel %vm310_vm0, %v2942_v45, 0.0  ;;  %v2359_v60 = vsel %vm310_vm0, %v2943_v48, 0.0 }
 0x1ae   :  { %v2313_v11 = vrot.slane %v2312_v2, 2  ;;  %v2320_v41 = vrot.slane %v2319_v5, 2  ;;  %v2327_v53 = vrot.slane %v2326_v38, 2  ;;  %v2353_v43 = vrot.slane %v2352_v6, 4 }
 0x1af   :  { %v2334_v47 = vrot.slane %v2333_v39, 2  ;;  %v2340_v13 = vadd.f32 %v2339_v7, %v2338_v37  ;;  %v2347_v14 = vadd.f32 %v2346_v8, %v2345_v46  ;;  %v2360_v42 = vrot.slane %v2359_v60, 4 }
 0x1b0   :  { %v2314_v40 = vadd.f32 %v2313_v11, %v2312_v2  ;;  %v2321_v1 = vadd.f32 %v2320_v41, %v2319_v5  ;;  %v2328_v30 = vadd.f32 %v2327_v53, %v2326_v38  ;;  %v2354_v27 = vadd.f32 %v2353_v43, %v2352_v6 }
 0x1b1   :  { %v2335_v12 = vadd.f32 %v2334_v47, %v2333_v39  ;;  %v2341_v28 = vrot.slane %v2340_v13, 2  ;;  %v2348_v15 = vrot.slane %v2347_v14, 2  ;;  %v2361_v3 = vadd.f32 %v2360_v42, %v2359_v60 }
 0x1b2   :  { %v2315_v31 = vrot.slane %v2314_v40, 1  ;;  %v2322_v17 = vrot.slane %v2321_v1, 1  ;;  %v2329_v44 = vrot.slane %v2328_v30, 1  ;;  %v2355_v55 = vrot.slane %v2354_v27, 2 }
 0x1b3   :  { %v2336_v33 = vrot.slane %v2335_v12, 1  ;;  %v2342_v50 = vadd.f32 %v2341_v28, %v2340_v13  ;;  %v2349_v21 = vadd.f32 %v2348_v15, %v2347_v14  ;;  %v2362_v35 = vrot.slane %v2361_v3, 2 }
 0x1b4   :  { %v2316_v19 = vadd.f32 %v2315_v31, %v2314_v40  ;;  %v2323_v54 = vadd.f32 %v2322_v17, %v2321_v1  ;;  %v2330_v22 = vadd.f32 %v2329_v44, %v2328_v30  ;;  %v2356_v62 = vadd.f32 %v2355_v55, %v2354_v27 }
 0x1b5   :  { %v2337_v51 = vadd.f32 %v2336_v33, %v2335_v12  ;;  %v2343_v0 = vrot.slane %v2342_v50, 1  ;;  %v2350_v52 = vrot.slane %v2349_v21, 1  ;;  %v2900_v56 = vsel %vm180_vm5, 1.0, %v4602_v23 }
 0x1b6   :  { %v2357_v24 = vrot.slane %v2356_v62, 1  ;;  %v2518_v9 = vsel %vm887_vm9, %v2323_v54, %v2316_v19  ;;  %v2901_v57 = vsel %vm181_vm6, 1.0, %v4602_v23  ;;  %v2363_v45 = vadd.f32 %v2362_v35, %v2361_v3 }
 0x1b7   :  { %v2344_v20 = vadd.f32 %v2343_v0, %v2342_v50  ;;  %v2351_v16 = vadd.f32 %v2350_v52, %v2349_v21  ;;  %v2519_v29 = vsel %vm889_vm10, %v2330_v22, %v2518_v9  ;;  %v2902_v48 = vsel %vm182_vm7, 1.0, %v4602_v23 }
 0x1b8   :  { %v2358_v25 = vadd.f32 %v2357_v24, %v2356_v62  ;;  %v2520_v61 = vsel %vm891_vm11, %v2337_v51, %v2519_v29  ;;  %v2903_v58 = vsel %vm183_vm4, 1.0, %v4602_v23  ;;  %v2364_v18 = vrot.slane %v2363_v45, 1  ;;  %v4243_v29 = vld [vmem:[%s4542_s1 + $0x2] sm:$0x3] }
 0x1b9   :  { %v2521_v63 = vsel %vm893_vm12, %v2344_v20, %v2520_v61  ;;  %vm4649_vm1 = vcmp.eq.s32.totalorder %v3708_v10, 28  ;;  %vm4650_vm6 = vcmp.eq.s32.totalorder %v3708_v10, 29  ;;  %vm4651_vm7 = vcmp.eq.s32.totalorder %v3708_v10, 30 }
 0x1ba   :  { %v2904_v26 = vsel %vm4649_vm1, 1.0, %v4602_v23  ;;  %v2905_v4 = vsel %vm4650_vm6, 1.0, %v4602_v23  ;;  %v2522_v59 = vsel %vm895_vm13, %v2351_v16, %v2521_v63  ;;  %v2906_v49 = vsel %vm4651_vm7, 1.0, %v4602_v23  ;;  %v4255_v63 = vld [vmem:[%s4541_s0 + $0x8a] sm:$0x3] }
 0x1bb   :  { %vm4652_vm4 = vcmp.eq.s32.totalorder %v3708_v10, 31  ;;  %v2058_v36 = vsel %vm310_vm0, %v2900_v56, 0.0  ;;  %v2365_v34 = vadd.f32 %v2364_v18, %v2363_v45  ;;  %v2523_v37 = vsel %vm897_vm14, %v2358_v25, %v2522_v59  ;;  %v4250_v18 = vld [vmem:[%s4541_s0 + $0x88] sm:$0x3] }
 0x1bc   :  { %v2907_v32 = vsel %vm4652_vm4, 1.0, %v4602_v23  ;;  %v2059_v46 = vrot.slane %v2058_v36, 4  ;;  %v2065_v2 = vsel %vm310_vm0, %v2901_v57, 0.0  ;;  %v2072_v38 = vsel %vm310_vm0, %v2902_v48, 0.0 }
 0x1bd   :  { %v2066_v5 = vrot.slane %v2065_v2, 4  ;;  %v2079_v39 = vsel %vm310_vm0, %v2903_v58, 0.0  ;;  %v2086_v7 = vsel %vm310_vm0, %v2904_v26, 0.0  ;;  %v2524_v8 = vsel %vm899_vm15, %v2365_v34, %v2523_v37  ;;  %v4260_v26 = vld [vmem:[%s4541_s0 + $0x8c] sm:$0x3] }
 0x1be   :  { %v2060_v6 = vadd.f32 %v2059_v46, %v2058_v36  ;;  %v2073_v10 = vrot.slane %v2072_v38, 4  ;;  %v2080_v11 = vrot.slane %v2079_v39, 4  ;;  %v2087_v53 = vrot.slane %v2086_v7, 4  ;;  %2786 = vadd.xlane.f32.xlu1 %v2524_v8 }
 0x1bf   :  { %v2067_v41 = vadd.f32 %v2066_v5, %v2065_v2  ;;  %v2093_v43 = vsel %vm310_vm0, %v2905_v4, 0.0  ;;  %v2100_v30 = vsel %vm310_vm0, %v2906_v49, 0.0  ;;  %v2107_v27 = vsel %vm310_vm0, %v2907_v32, 0.0  ;;  %v4266_v49 = vld [vmem:[%s4541_s0 + $0x8e] sm:$0x3] }
 0x1c0   :  { %v2061_v47 = vrot.slane %v2060_v6, 2  ;;  %v2074_v13 = vadd.f32 %v2073_v10, %v2072_v38  ;;  %v2081_v14 = vadd.f32 %v2080_v11, %v2079_v39  ;;  %v2094_v60 = vrot.slane %v2093_v43, 4 }
 0x1c1   :  { %v2068_v40 = vrot.slane %v2067_v41, 2  ;;  %v2088_v1 = vadd.f32 %v2087_v53, %v2086_v7  ;;  %v2101_v44 = vrot.slane %v2100_v30, 4  ;;  %v2108_v55 = vrot.slane %v2107_v27, 4 }
 0x1c2   :  { %v2062_v12 = vadd.f32 %v2061_v47, %v2060_v6  ;;  %v2075_v28 = vrot.slane %v2074_v13, 2  ;;  %v2082_v15 = vrot.slane %v2081_v14, 2  ;;  %v2095_v42 = vadd.f32 %v2094_v60, %v2093_v43 }
 0x1c3   :  { %v2069_v31 = vadd.f32 %v2068_v40, %v2067_v41  ;;  %v2089_v17 = vrot.slane %v2088_v1, 2  ;;  %v2102_v22 = vadd.f32 %v2101_v44, %v2100_v30  ;;  %v2109_v62 = vadd.f32 %v2108_v55, %v2107_v27  ;;  %v4295_v40 = vld [vmem:[%s4541_s0 + $0x40] sm:$0x3] }
 0x1c4   :  { %v2063_v33 = vrot.slane %v2062_v12, 1  ;;  %v2076_v50 = vadd.f32 %v2075_v28, %v2074_v13  ;;  %v2083_v21 = vadd.f32 %v2082_v15, %v2081_v14  ;;  %v2096_v3 = vrot.slane %v2095_v42, 2  ;;  %v4306_v28 = vld [vmem:[%s4541_s0 + $0x42] sm:$0x3]  ;;  %v4311_v15 = vld [vmem:[%s4541_s0 + $0x44] sm:$0x3] }
 0x1c5   :  { %v2070_v19 = vrot.slane %v2069_v31, 1  ;;  %v2090_v54 = vadd.f32 %v2089_v17, %v2088_v1  ;;  %v2103_v56 = vrot.slane %v2102_v22, 2  ;;  %v2110_v57 = vrot.slane %v2109_v62, 2  ;;  %v4300_v1 = vld [vmem:[%s4542_s1] sm:$0x3] }
 0x1c6   :  { %v2064_v51 = vadd.f32 %v2063_v33, %v2062_v12  ;;  %v2077_v0 = vrot.slane %v2076_v50, 1  ;;  %v2084_v52 = vrot.slane %v2083_v21, 1  ;;  %v2097_v35 = vadd.f32 %v2096_v3, %v2095_v42  ;;  %v4316_v42 = vld [vmem:[%s4541_s0 + $0x46] sm:$0x3] }
 0x1c7   :  { %v2071_v24 = vadd.f32 %v2070_v19, %v2069_v31  ;;  %v2091_v9 = vrot.slane %v2090_v54, 1  ;;  %vm224_vm5 = vcmp.eq.s32.totalorder %v4243_v29, 32  ;;  %v2104_v61 = vadd.f32 %v2103_v56, %v2102_v22 }
 0x1c8   :  { %v2078_v20 = vadd.f32 %v2077_v0, %v2076_v50  ;;  %v2085_v16 = vadd.f32 %v2084_v52, %v2083_v21  ;;  %v2098_v45 = vrot.slane %v2097_v35, 1  ;;  %v2111_v48 = vadd.f32 %v2110_v57, %v2109_v62 }
 0x1c9   :  { %v2092_v25 = vadd.f32 %v2091_v9, %v2090_v54  ;;  %v2487_v58 = vsel %vm887_vm9, %v2071_v24, %v2064_v51  ;;  %vm225_vm2 = vcmp.eq.s32.totalorder %v4243_v29, 33  ;;  %vm226_vm3 = vcmp.eq.s32.totalorder %v4243_v29, 34 }
 0x1ca   :  { %v2099_v4 = vadd.f32 %v2098_v45, %v2097_v35  ;;  %v2488_v59 = vsel %vm889_vm10, %v2078_v20, %v2487_v58  ;;  %v2105_v32 = vrot.slane %v2104_v61, 1  ;;  %v2112_v36 = vrot.slane %v2111_v48, 1 }
 0x1cb   :  { %v2489_v34 = vsel %vm891_vm11, %v2085_v16, %v2488_v59  ;;  %vm227_vm8 = vcmp.eq.s32.totalorder %v4243_v29, 35  ;;  %v306_v46 = vsel %vm224_vm5, %v4250_v18, 0.0  ;;  %v307_v2 = vsel %vm225_vm2, %v4255_v63, 0.0 }
 0x1cc   :  { %v2490_v37 = vsel %vm893_vm12, %v2092_v25, %v2489_v34  ;;  %v308_v5 = vsel %vm226_vm3, %v4260_v26, 0.0  ;;  %v2106_v38 = vadd.f32 %v2105_v32, %v2104_v61  ;;  %v2113_v39 = vadd.f32 %v2112_v36, %v2111_v48 }
 0x1cd   :  { %v2491_v7 = vsel %vm895_vm13, %v2099_v4, %v2490_v37  ;;  %v309_v8 = vsel %vm227_vm8, %v4266_v49, 0.0  ;;  %v787_v6 = vsel %vm310_vm0, %v306_v46, 0.0  ;;  %v794_v10 = vsel %vm310_vm0, %v307_v2, 0.0  ;;  %v237_v46 = vld [vmem:[#allocation2 + $0x48] sm:$0xf] }
 0x1ce   :  { %v801_v11 = vsel %vm310_vm0, %v308_v5, 0.0  ;;  %v808_v41 = vsel %vm310_vm0, %v309_v8, 0.0  ;;  %v2492_v53 = vsel %vm897_vm14, %v2106_v38, %v2491_v7  ;;  %v788_v43 = vrot.slane %v787_v6, 4 }
 0x1cf   :  { %v795_v47 = vrot.slane %v794_v10, 4  ;;  %v802_v13 = vrot.slane %v801_v11, 4  ;;  %v2493_v14 = vsel %vm899_vm15, %v2113_v39, %v2492_v53  ;;  %v809_v60 = vrot.slane %v808_v41, 4 }
 0x1d0   :  { %vm188_vm12 = vcmp.eq.s32.totalorder %v4300_v1, 32  ;;  %v789_v30 = vadd.f32 %v788_v43, %v787_v6  ;;  %vm189_vm13 = vcmp.eq.s32.totalorder %v4300_v1, 33  ;;  %vm190_vm14 = vcmp.eq.s32.totalorder %v4300_v1, 34  ;;  %2775 = vadd.xlane.f32.xlu0 %v2493_v14 }
 0x1d1   :  { %v796_v27 = vadd.f32 %v795_v47, %v794_v10  ;;  %v803_v12 = vadd.f32 %v802_v13, %v801_v11  ;;  %v810_v31 = vadd.f32 %v809_v60, %v808_v41  ;;  %vm191_vm15 = vcmp.eq.s32.totalorder %v4300_v1, 35 }
 0x1d2   :  { %v790_v17 = vrot.slane %v789_v30, 2  ;;  %v270_v33 = vsel %vm188_vm12, %v4295_v40, 0.0  ;;  %v271_v21 = vsel %vm189_vm13, %v4306_v28, 0.0  ;;  %v272_v3 = vsel %vm190_vm14, %v4311_v15, 0.0 }
 0x1d3   :  { %v797_v44 = vrot.slane %v796_v27, 2  ;;  %v804_v55 = vrot.slane %v803_v12, 2  ;;  %v811_v50 = vrot.slane %v810_v31, 2  ;;  %v273_v19 = vsel %vm191_vm15, %v4316_v42, 0.0 }
 0x1d4   :  { %v791_v54 = vadd.f32 %v790_v17, %v789_v30  ;;  %v535_v51 = vsel %vm310_vm0, %v270_v33, 0.0  ;;  %v542_v35 = vsel %vm310_vm0, %v271_v21, 0.0  ;;  %v549_v24 = vsel %vm310_vm0, %v272_v3, 0.0 }
 0x1d5   :  { %v798_v22 = vadd.f32 %v797_v44, %v796_v27  ;;  %v805_v62 = vadd.f32 %v804_v55, %v803_v12  ;;  %v812_v0 = vadd.f32 %v811_v50, %v810_v31  ;;  %v536_v52 = vrot.slane %v535_v51, 4 }
 0x1d6   :  { %v792_v9 = vrot.slane %v791_v54, 1  ;;  %v543_v20 = vrot.slane %v542_v35, 4  ;;  %v550_v25 = vrot.slane %v549_v24, 4  ;;  %v556_v61 = vsel %vm310_vm0, %v273_v19, 0.0 }
 0x1d7   :  { %v799_v56 = vrot.slane %v798_v22, 1  ;;  %v806_v57 = vrot.slane %v805_v62, 1  ;;  %v813_v16 = vrot.slane %v812_v0, 1  ;;  %v537_v45 = vadd.f32 %v536_v52, %v535_v51 }
 0x1d8   :  { %v793_v48 = vadd.f32 %v792_v9, %v791_v54  ;;  %v544_v59 = vadd.f32 %v543_v20, %v542_v35  ;;  %v551_v34 = vadd.f32 %v550_v25, %v549_v24  ;;  %v557_v37 = vrot.slane %v556_v61, 4 }
 0x1d9   :  { %v800_v58 = vadd.f32 %v799_v56, %v798_v22  ;;  %v807_v4 = vadd.f32 %v806_v57, %v805_v62  ;;  %v814_v32 = vadd.f32 %v813_v16, %v812_v0  ;;  %v538_v36 = vrot.slane %v537_v45, 2  ;;  %v232_v0 = vld [vmem:[#allocation2 + $0x20] sm:$0xf] }
 0x1da   :  { %v545_v5 = vrot.slane %v544_v59, 2  ;;  %v1064_v38 = vmul.f32 %v4250_v18, %v4250_v18  ;;  %v1065_v39 = vmul.f32 %v4255_v63, %v4255_v63  ;;  %v552_v6 = vrot.slane %v551_v34, 2 }
 0x1db   :  { %v953_v2 = vsel %vm887_vm9, %v800_v58, %v793_v48  ;;  %v539_v8 = vadd.f32 %v538_v36, %v537_v45  ;;  %v558_v10 = vadd.f32 %v557_v37, %v556_v61  ;;  %vm2579_vm1 = vcmask 1043456  }
 0x1dc   :  { %v954_v7 = vsel %vm889_vm10, %v807_v4, %v953_v2  ;;  %v546_v41 = vadd.f32 %v545_v5, %v544_v59  ;;  %v1066_v53 = vmul.f32 %v4260_v26, %v4260_v26  ;;  %v1067_v43 = vmul.f32 %v4266_v49, %v4266_v49 }
 0x1dd   :  { %v955_v11 = vsel %vm891_vm11, %v814_v32, %v954_v7  ;;  %v540_v18 = vrot.slane %v539_v8, 1  ;;  %v553_v13 = vadd.f32 %v552_v6, %v551_v34  ;;  %v559_v14 = vrot.slane %v558_v10, 2 }
 0x1de   :  { %v975_v47 = vadd.f32 %v955_v11, %v237_v46  ;;  %v547_v63 = vrot.slane %v546_v41, 1  ;;  %v1544_v60 = vsel %vm310_vm0, %v1064_v38, 0.0  ;;  %v1551_v30 = vsel %vm310_vm0, %v1065_v39, 0.0 }
 0x1df   :  { %v1558_v27 = vsel %vm310_vm0, %v1066_v53, 0.0  ;;  %v541_v12 = vadd.f32 %v540_v18, %v539_v8  ;;  %v554_v31 = vrot.slane %v553_v13, 1  ;;  %v560_v17 = vadd.f32 %v559_v14, %v558_v10  ;;  %v995_v18 = vld [vmem:[#allocation3 + $0x48] sm:$0xf] }
 0x1e0   :  { %985 = vst [vmem:[#allocation2 + $0x48] sm:$0xf] %v975_v47  ;;  %v1545_v44 = vrot.slane %v1544_v60, 4  ;;  %v548_v26 = vadd.f32 %v547_v63, %v546_v41  ;;  %v1552_v55 = vrot.slane %v1551_v30, 4  ;;  %v1559_v33 = vrot.slane %v1558_v27, 4 }
 0x1e1   :  { %v1565_v49 = vsel %vm310_vm0, %v1067_v43, 0.0  ;;  %v555_v50 = vadd.f32 %v554_v31, %v553_v13  ;;  %v561_v21 = vrot.slane %v560_v17, 1  ;;  %v1028_v51 = vmul.f32 %v4295_v40, %v4295_v40 }
 0x1e2   :  { %v1546_v3 = vadd.f32 %v1545_v44, %v1544_v60  ;;  %v1566_v19 = vrot.slane %v1565_v49, 4  ;;  %v922_v54 = vsel %vm887_vm9, %v548_v26, %v541_v12  ;;  %v1553_v22 = vadd.f32 %v1552_v55, %v1551_v30 }
 0x1e3   :  { %v1560_v62 = vadd.f32 %v1559_v33, %v1558_v27  ;;  %v562_v52 = vadd.f32 %v561_v21, %v560_v17  ;;  %v923_v35 = vsel %vm889_vm10, %v555_v50, %v922_v54  ;;  %v1029_v20 = vmul.f32 %v4306_v28, %v4306_v28  ;;  %v4376_v17 = vpop.xlane.xlu1 %2583 }
 0x1e4   :  { %v1547_v24 = vrot.slane %v1546_v3, 2  ;;  %v1567_v9 = vadd.f32 %v1566_v19, %v1565_v49  ;;  %v1554_v56 = vrot.slane %v1553_v22, 2  ;;  %v1030_v16 = vmul.f32 %v4311_v15, %v4311_v15  ;;  %v4385_v49 = vpop.xlane.xlu0 %2571 }
 0x1e5   :  { %v1561_v57 = vrot.slane %v1560_v62, 2  ;;  %v924_v45 = vsel %vm891_vm11, %v562_v52, %v923_v35  ;;  %v1031_v40 = vmul.f32 %v4316_v42, %v4316_v42  ;;  %v1292_v32 = vsel %vm310_vm0, %v1028_v51, 0.0 }
 0x1e6   :  { %v1548_v25 = vadd.f32 %v1547_v24, %v1546_v3  ;;  %v1568_v61 = vrot.slane %v1567_v9, 2  ;;  %v970_v58 = vadd.f32 %v924_v45, %v232_v0  ;;  %v1555_v4 = vadd.f32 %v1554_v56, %v1553_v22 }
 0x1e7   :  { %v2570_v48 = vld [vmem:[#allocation2 + $0x48] sm:$0xf]  ;;  %v1562_v59 = vadd.f32 %v1561_v57, %v1560_v62  ;;  %v1293_v37 = vrot.slane %v1292_v32, 4  ;;  %v1299_v2 = vsel %vm310_vm0, %v1029_v20, 0.0  ;;  %v1306_v5 = vsel %vm310_vm0, %v1030_v16, 0.0 }
 0x1e8   :  { %v2591_v36 = vsel %vm2579_vm1, %v2570_v48, 0.0  ;;  %v1549_v34 = vrot.slane %v1548_v25, 1  ;;  %v1569_v28 = vadd.f32 %v1568_v61, %v1567_v9  ;;  %980 = vst [vmem:[#allocation2 + $0x20] sm:$0xf] %v970_v58  ;;  %v1556_v15 = vrot.slane %v1555_v4, 1 }
 0x1e9   :  { %2592 = vadd.xlane.f32.xlu1 %v2591_v36  ;;  %v1563_v46 = vrot.slane %v1562_v59, 1  ;;  %v1294_v39 = vadd.f32 %v1293_v37, %v1292_v32  ;;  %v1300_v7 = vrot.slane %v1299_v2, 4  ;;  %v1307_v10 = vrot.slane %v1306_v5, 4  ;;  %v4397_v32 = vpop.xlane.xlu0 %2573  ;;  %v990_v36 = vld [vmem:[#allocation3 + $0x20] sm:$0xf] }
 0x1ea   :  { %v1550_v42 = vadd.f32 %v1549_v34, %v1548_v25  ;;  %v1570_v38 = vrot.slane %v1569_v28, 1  ;;  %v1557_v8 = vadd.f32 %v1556_v15, %v1555_v4  ;;  %v1313_v11 = vsel %vm310_vm0, %v1031_v40, 0.0  ;;  %v4392_v40 = vpop.xlane.xlu1 %2585 }
 0x1eb   :  { %v1564_v6 = vadd.f32 %v1563_v46, %v1562_v59  ;;  %v1295_v53 = vrot.slane %v1294_v39, 2  ;;  %v1301_v43 = vadd.f32 %v1300_v7, %v1299_v2  ;;  %v1314_v47 = vrot.slane %v1313_v11, 4 }
 0x1ec   :  { %v1571_v41 = vadd.f32 %v1570_v38, %v1569_v28  ;;  %v1703_v13 = vsel %vm887_vm9, %v1557_v8, %v1550_v42  ;;  %v1308_v14 = vadd.f32 %v1307_v10, %v1306_v5  ;;  %v2944_v63 = vsel %vm224_vm5, 1.0, %v4602_v23 }
 0x1ed   :  { %v2945_v60 = vsel %vm225_vm2, 1.0, %v4602_v23  ;;  %v1704_v30 = vsel %vm889_vm10, %v1564_v6, %v1703_v13  ;;  %v1296_v27 = vadd.f32 %v1295_v53, %v1294_v39  ;;  %v1302_v12 = vrot.slane %v1301_v43, 2 }
 0x1ee   :  { %v1315_v31 = vadd.f32 %v1314_v47, %v1313_v11  ;;  %v1705_v44 = vsel %vm891_vm11, %v1571_v41, %v1704_v30  ;;  %v1309_v26 = vrot.slane %v1308_v14, 2  ;;  %v2946_v55 = vsel %vm226_vm3, 1.0, %v4602_v23 }
 0x1ef   :  { %v2947_v33 = vsel %vm227_vm8, 1.0, %v4602_v23  ;;  %v2565_v50 = vld [vmem:[#allocation2 + $0x20] sm:$0xf]  ;;  %v1725_v21 = vadd.f32 %v1705_v44, %v995_v18  ;;  %v1297_v3 = vrot.slane %v1296_v27, 1  ;;  %v1303_v19 = vadd.f32 %v1302_v12, %v1301_v43  ;;  %v4416_v12 = vpop.xlane.xlu0 %2676 }
 0x1f0   :  { %v1316_v54 = vrot.slane %v1315_v31, 2  ;;  %v2580_v22 = vsel %vm2579_vm1, %v2565_v50, 0.0  ;;  %v1310_v62 = vadd.f32 %v1309_v26, %v1308_v14  ;;  %v2366_v51 = vsel %vm310_vm0, %v2944_v63, 0.0  ;;  %v4413_v14 = vpop.xlane.xlu1 %2678 }
 0x1f1   :  { %v2373_v0 = vsel %vm310_vm0, %v2945_v60, 0.0  ;;  %2581 = vadd.xlane.f32.xlu0 %v2580_v22  ;;  %1735 = vst [vmem:[#allocation3 + $0x48] sm:$0xf] %v1725_v21  ;;  %v1298_v52 = vadd.f32 %v1297_v3, %v1296_v27  ;;  %v1304_v35 = vrot.slane %v1303_v19, 1  ;;  %v2367_v24 = vrot.slane %v2366_v51, 4 }
 0x1f2   :  { %v1317_v29 = vadd.f32 %v1316_v54, %v1315_v31  ;;  %v1311_v9 = vrot.slane %v1310_v62, 1  ;;  %v2374_v56 = vrot.slane %v2373_v0, 4  ;;  %v2380_v57 = vsel %vm310_vm0, %v2946_v55, 0.0  ;;  %v1745_v22 = vld [vmem:[#allocation4 + $0x48] sm:$0xf] }
 0x1f3   :  { %v2387_v20 = vsel %vm310_vm0, %v2947_v33, 0.0  ;;  %v1305_v16 = vadd.f32 %v1304_v35, %v1303_v19  ;;  %v2368_v25 = vadd.f32 %v2367_v24, %v2366_v51  ;;  %v2381_v61 = vrot.slane %v2380_v57, 4 }
 0x1f4   :  { %v1318_v45 = vrot.slane %v1317_v29, 1  ;;  %v1312_v48 = vadd.f32 %v1311_v9, %v1310_v62  ;;  %v2375_v58 = vadd.f32 %v2374_v56, %v2373_v0  ;;  %v2388_v4 = vrot.slane %v2387_v20, 4  ;;  %v4422_v9 = vpop.xlane.xlu1 %2689 }
 0x1f5   :  { %v2908_v59 = vsel %vm188_vm12, 1.0, %v4602_v23  ;;  %v1672_v28 = vsel %vm887_vm9, %v1305_v16, %v1298_v52  ;;  %v2369_v37 = vrot.slane %v2368_v25, 2  ;;  %v2382_v15 = vadd.f32 %v2381_v61, %v2380_v57 }
 0x1f6   :  { %v1319_v34 = vadd.f32 %v1318_v45, %v1317_v29  ;;  %v1673_v46 = vsel %vm889_vm10, %v1312_v48, %v1672_v28  ;;  %v2376_v2 = vrot.slane %v2375_v58, 2  ;;  %v2389_v5 = vadd.f32 %v2388_v4, %v2387_v20  ;;  %v4425_v45 = vpop.xlane.xlu0 %2687 }
 0x1f7   :  { %v2909_v42 = vsel %vm189_vm13, 1.0, %v4602_v23  ;;  %v2370_v39 = vadd.f32 %v2369_v37, %v2368_v25  ;;  %v2383_v7 = vrot.slane %v2382_v15, 2  ;;  %v2910_v8 = vsel %vm190_vm14, 1.0, %v4602_v23 }
 0x1f8   :  { %v1674_v38 = vsel %vm891_vm11, %v1319_v34, %v1673_v46  ;;  %v2675_v6 = vld [vmem:[#allocation3 + $0x48] sm:$0xf]  ;;  %v2377_v11 = vadd.f32 %v2376_v2, %v2375_v58  ;;  %v2390_v41 = vrot.slane %v2389_v5, 2  ;;  %v2911_v53 = vsel %vm191_vm15, 1.0, %v4602_v23 }
 0x1f9   :  { %v1720_v10 = vadd.f32 %v1674_v38, %v990_v36  ;;  %v2695_v43 = vsel %vm2579_vm1, %v2675_v6, 0.0  ;;  %v2371_v47 = vrot.slane %v2370_v39, 1  ;;  %v2384_v18 = vadd.f32 %v2383_v7, %v2382_v15  ;;  %v2772_v38 = vpop.xlane.xlu1 %2771 }
 0x1fa   :  { %v2114_v13 = vsel %vm310_vm0, %v2908_v59, 0.0  ;;  %2696 = vadd.xlane.f32.xlu1 %v2695_v43  ;;  %v2378_v63 = vrot.slane %v2377_v11, 1  ;;  %v2391_v60 = vadd.f32 %v2390_v41, %v2389_v5  ;;  %v2121_v27 = vsel %vm310_vm0, %v2909_v42, 0.0  ;;  %v1740_v43 = vld [vmem:[#allocation4 + $0x20] sm:$0xf] }
 0x1fb   :  { %1730 = vst [vmem:[#allocation3 + $0x20] sm:$0xf] %v1720_v10  ;;  %v2115_v30 = vrot.slane %v2114_v13, 4  ;;  %v2372_v31 = vadd.f32 %v2371_v47, %v2370_v39  ;;  %v2385_v1 = vrot.slane %v2384_v18, 1  ;;  %v2122_v23 = vrot.slane %v2121_v27, 4 }
 0x1fc   :  { %v2128_v44 = vsel %vm310_vm0, %v2910_v8, 0.0  ;;  %v2379_v26 = vadd.f32 %v2378_v63, %v2377_v11  ;;  %v2392_v55 = vrot.slane %v2391_v60, 1  ;;  %v2135_v19 = vsel %vm310_vm0, %v2911_v53, 0.0  ;;  %v2770_v8 = vpop.xlane.xlu0 %2769 }
 0x1fd   :  { %v2116_v33 = vadd.f32 %v2115_v30, %v2114_v13  ;;  %v2129_v50 = vrot.slane %v2128_v44, 4  ;;  %v2386_v21 = vadd.f32 %v2385_v1, %v2384_v18  ;;  %v2123_v3 = vadd.f32 %v2122_v23, %v2121_v27  ;;  %v4442_v23 = vpop.xlane.xlu1 %2782 }
 0x1fe   :  { %v2604_v54 = vlaneseq  ;;  %v2393_v62 = vadd.f32 %v2392_v55, %v2391_v60  ;;  %v2525_v51 = vsel %vm887_vm9, %v2379_v26, %v2372_v31  ;;  %v2136_v24 = vrot.slane %v2135_v19, 4 }
 0x1ff   :  { %v2117_v0 = vrot.slane %v2116_v33, 2  ;;  %v2130_v52 = vadd.f32 %v2129_v50, %v2128_v44  ;;  %v2526_v35 = vsel %vm889_vm10, %v2386_v21, %v2525_v51  ;;  %v2124_v29 = vrot.slane %v2123_v3, 2 }
 0x200   :  { %v2527_v56 = vsel %vm891_vm11, %v2393_v62, %v2526_v35  ;;  %v2605_v16 = vand.u32 127, %v2604_v54  ;;  %v2137_v58 = vadd.f32 %v2136_v24, %v2135_v19  ;;  %v2607_v15 = vshrl.u32 %v2604_v54, 7  ;;  %v4444_v44 = vpop.xlane.xlu0 %2780 }
 0x201   :  { %v2118_v57 = vadd.f32 %v2117_v0, %v2116_v33  ;;  %v2131_v20 = vrot.slane %v2130_v52, 2  ;;  %v2547_v61 = vadd.f32 %v2527_v56, %v1745_v22  ;;  %v2125_v48 = vadd.f32 %v2124_v29, %v2123_v3  ;;  %v2588_v26 = vpop.xlane.xlu1 %2587 }
 0x202   :  { %v2670_v25 = vld [vmem:[#allocation3 + $0x20] sm:$0xf]  ;;  %v2610_v34 = vadd.s32 4294967288, %v2605_v16  ;;  %v2138_v37 = vrot.slane %v2137_v58, 2  ;;  %v4431_v11 = vsub.s32 %v2605_v16, %v2607_v15  ;;  %vm2615_vm0 = vcmask 130112  }
 0x203   :  { %v2684_v4 = vsel %vm2579_vm1, %v2670_v25, 0.0  ;;  %v2119_v59 = vrot.slane %v2118_v57, 1  ;;  %v2132_v36 = vadd.f32 %v2131_v20, %v2130_v52  ;;  %2557 = vst [vmem:[#allocation4 + $0x48] sm:$0xf] %v2547_v61  ;;  %v2126_v28 = vrot.slane %v2125_v48, 1 }
 0x204   :  { %2685 = vadd.xlane.f32.xlu0 %v2684_v4  ;;  %v2139_v42 = vadd.f32 %v2138_v37, %v2137_v58  ;;  %v4428_v7 = vsub.s32 %v2610_v34, %v2607_v15  ;;  %v2804_v18 = vrot.slane %v2770_v8, %v4431_v11  ;;  %v2576_v55 = vpop.xlane.xlu0 %2575  ;;  %v2617_v62 = vadd.s32 4294967280, %v2605_v16 }
 0x205   :  { %v2120_v46 = vadd.f32 %v2119_v59, %v2118_v57  ;;  %v2133_v2 = vrot.slane %v2132_v36, 1  ;;  %v2127_v5 = vadd.f32 %v2126_v28, %v2125_v48  ;;  %v2692_v33 = vpop.xlane.xlu1 %2691  ;;  %v2624_v51 = vadd.s32 4294967272, %v2605_v16 }
 0x206   :  { %v2140_v6 = vrot.slane %v2139_v42, 1  ;;  %v2808_v53 = vrot.slane %v2772_v38, %v4428_v7  ;;  %v2631_v35 = vadd.s32 4294967264, %v2605_v16  ;;  %v4452_v29 = vsub.s32 %v2617_v62, %v2607_v15 }
 0x207   :  { %v2134_v39 = vadd.f32 %v2133_v2, %v2132_v36  ;;  %v2494_v10 = vsel %vm887_vm9, %v2127_v5, %v2120_v46  ;;  %v4454_v24 = vsub.s32 %v2624_v51, %v2607_v15  ;;  %v2645_v57 = vrot.slane %v4392_v40, %v4428_v7 }
 0x208   :  { %v2141_v47 = vadd.f32 %v2140_v6, %v2139_v42  ;;  %v4439_v30 = vsel %vm2615_vm0, %v2808_v53, %v2804_v18  ;;  %v2681_v50 = vpop.xlane.xlu0 %2680  ;;  %v4456_v56 = vsub.s32 %v2631_v35, %v2607_v15  ;;  %v2650_v61 = vrot.slane %v2588_v26, %v4452_v29 }
 0x209   :  { %v2495_v41 = vsel %vm889_vm10, %v2134_v39, %v2494_v10  ;;  %v4446_v21 = vpop.xlane.xlu1 %2784  ;;  %v2641_v48 = vrot.slane %v4376_v17, %v4431_v11  ;;  %v2614_v16 = vrot.slane %v4397_v32, %v4428_v7  ;;  %vm2622_vm10 = vcmask 195712  }
 0x20a   :  { %v2768_v13 = vld [vmem:[#allocation4 + $0x48] sm:$0xf]  ;;  %v2496_v60 = vsel %vm891_vm11, %v2141_v47, %v2495_v41  ;;  %v2621_v4 = vrot.slane %v2576_v55, %v4452_v29  ;;  %vm2629_vm11 = vcmask 261312   ;;  %v2609_v40 = vrot.slane %v4385_v49, %v4431_v11 }
 0x20b   :  { %v2788_v63 = vsel %vm2579_vm1, %v2768_v13, 0.0  ;;  %v2542_v27 = vadd.f32 %v2496_v60, %v1740_v43  ;;  %v2646_v36 = vsel %vm2615_vm0, %v2645_v57, %v2641_v48  ;;  %vm2636_vm6 = vcmask 326912  }
 0x20c   :  { %2789 = vadd.xlane.f32.xlu1 %v2788_v63  ;;  %v4448_v3 = vpop.xlane.xlu0 %2773  ;;  %v2651_v17 = vsel %vm2622_vm10, %v2650_v61, %v2646_v36  ;;  %v2616_v32 = vsel %vm2615_vm0, %v2614_v16, %v2609_v40  ;;  %vm2664_vm7 = vcmask 287744   ;;  %v2739_v38 = vrot.slane %v4422_v9, %v4428_v7 }
 0x20d   :  { %2552 = vst [vmem:[#allocation4 + $0x20] sm:$0xf] %v2542_v27  ;;  %v2590_v19 = vpop.xlane.xlu1 %2589  ;;  %v2623_v15 = vsel %vm2622_vm10, %v2621_v4, %v2616_v32  ;;  %v2735_v39 = vrot.slane %v4425_v45, %v4431_v11  ;;  %v2744_v6 = vrot.slane %v2692_v33, %v4452_v29  ;;  %v2715_v10 = vrot.slane %v4413_v14, %v4428_v7 }
 0x20e   :  { %v2655_v58 = vrot.slane %v2590_v19, %v4454_v24  ;;  %v2711_v41 = vrot.slane %v4416_v12, %v4431_v11  ;;  %v2720_v43 = vrot.slane %v2681_v50, %v4452_v29  ;;  %v2832_v55 = vrot.slane %v4442_v23, %v4428_v7 }
 0x20f   :  { %v2740_v9 = vsel %vm2615_vm0, %v2739_v38, %v2735_v39  ;;  %v2828_v33 = vrot.slane %v4444_v44, %v4431_v11  ;;  %v2837_v19 = vrot.slane %v4446_v21, %v4452_v29 }
 0x210   :  { %v2656_v28 = vsel %vm2629_vm11, %v2655_v58, %v2651_v17  ;;  %v2745_v45 = vsel %vm2622_vm10, %v2744_v6, %v2740_v9  ;;  %v2716_v13 = vsel %vm2615_vm0, %v2715_v10, %v2711_v41 }
 0x211   :  { %v2721_v60 = vsel %vm2622_vm10, %v2720_v43, %v2716_v13  ;;  %v2833_v51 = vsel %vm2615_vm0, %v2832_v55, %v2828_v33 }
 0x212   :  { %v2838_v23 = vsel %vm2622_vm10, %v2837_v19, %v2833_v51 }
 0x214   :  { %v2763_v31 = vld [vmem:[#allocation4 + $0x20] sm:$0xf]  ;;  %v2578_v54 = vpop.xlane.xlu0 %2577 }
 0x215   :  { %v2777_v1 = vsel %vm2579_vm1, %v2763_v31, 0.0  ;;  %v2628_v34 = vrot.slane %v2578_v54, %v4454_v24 }
 0x216   :  { %2778 = vadd.xlane.f32.xlu0 %v2777_v1 }
 0x217   :  { %v2630_v49 = vsel %vm2629_vm11, %v2628_v34, %v2623_v15 }
 0x225   :  { %v2694_v22 = vpop.xlane.xlu1 %2693 }
 0x226   :  { %v2749_v53 = vrot.slane %v2694_v22, %v4454_v24  ;;  %v2813_v22 = vrot.slane %v4448_v3, %v4452_v29 }
 0x228   :  { %v2750_v63 = vsel %vm2629_vm11, %v2749_v53, %v2745_v45  ;;  %v2814_v21 = vsel %vm2622_vm10, %v2813_v22, %v4439_v30 }
 0x239   :  { %v2683_v0 = vpop.xlane.xlu0 %2682 }
 0x23a   :  { %v2725_v18 = vrot.slane %v2683_v0, %v4454_v24 }
 0x23c   :  { %v2726_v31 = vsel %vm2629_vm11, %v2725_v18, %v2721_v60 }
 0x24b   :  { %v4450_v52 = vpop.xlane.xlu1 %2786 }
 0x24c   :  { %v2842_v54 = vrot.slane %v4450_v52, %v4454_v24 }
 0x24e   :  { %v2843_v11 = vsel %vm2629_vm11, %v2842_v54, %v2838_v23 }
 0x25d   :  { %v4460_v20 = vpop.xlane.xlu0 %2775 }
 0x25e   :  { %v2818_v7 = vrot.slane %v4460_v20, %v4454_v24 }
 0x260   :  { %v2819_v3 = vsel %vm2629_vm11, %v2818_v7, %v2814_v21 }
 0x276   :  { %v2593_v25 = vpop.xlane.xlu1 %2592 }
 0x277   :  { %v2660_v59 = vrot.slane %v2593_v25, %v4456_v56 }
 0x279   :  { %v2661_v46 = vsel %vm2636_vm6, %v2660_v59, %v2656_v28 }
 0x27e   :  { %v2582_v37 = vpop.xlane.xlu0 %2581 }
 0x27f   :  { %v2635_v2 = vrot.slane %v2582_v37, %v4456_v56 }
 0x281   :  { %v2637_v5 = vsel %vm2636_vm6, %v2635_v2, %v2630_v49 }
 0x282   :  { %v2662_v42 = vsel %vm887_vm9, %v2661_v46, %v2637_v5 }
 0x283   :  { %2665 = vst.msk [vmem:[%s4543_s2] sm:$0x3] %vm2664_vm7, %v2662_v42 }
 0x287   :  { %v2697_v8 = vpop.xlane.xlu1 %2696 }
 0x288   :  { %v2754_v47 = vrot.slane %v2697_v8, %v4456_v56 }
 0x28a   :  { %v2755_v12 = vsel %vm2636_vm6, %v2754_v47, %v2750_v63 }
 0x291   :  { %v2686_v14 = vpop.xlane.xlu0 %2685 }
 0x292   :  { %v2730_v27 = vrot.slane %v2686_v14, %v4456_v56 }
 0x294   :  { %v2731_v1 = vsel %vm2636_vm6, %v2730_v27, %v2726_v31 }
 0x295   :  { %v2756_v26 = vsel %vm887_vm9, %v2755_v12, %v2731_v1 }
 0x296   :  { %2758 = vst.msk [vmem:[%s4544_s3] sm:$0x3] %vm2664_vm7, %v2756_v26 }
 0x299   :  { %v2790_v50 = vpop.xlane.xlu1 %2789 }
 0x29a   :  { %v2847_v62 = vrot.slane %v2790_v50, %v4456_v56 }
 0x29c   :  { %v2848_v0 = vsel %vm2636_vm6, %v2847_v62, %v2843_v11 }
 0x2a3   :  { %v2779_v44 = vpop.xlane.xlu0 %2778 }
 0x2a4   :  { %v2823_v52 = vrot.slane %v2779_v44, %v4456_v56 }
 0x2a6   :  { %v2824_v35 = vsel %vm2636_vm6, %v2823_v52, %v2819_v3 }
 0x2a7   :  { %v2849_v29 = vsel %vm887_vm9, %v2848_v0, %v2824_v35 }
 0x2a8   :  { %2851 = vst.msk [vmem:[%s4545_s4] sm:$0x3] %vm2664_vm7, %v2849_v29 }

</bundles_post_ra>
